<compile_context>
chip_gen: v7x
topology: tpu7x:2x2x1
jax: 0.10.0
libtpu: 0.0.40
codegen_flags: <defaults>
</compile_context>

<pallas_src>
import functools

import jax
import jax.numpy as jnp
from jax import lax
from jax.experimental import pallas as pl
from jax.experimental.pallas import tpu as pltpu


# ----------------------------------------------------------------------------
# Fused ToMNet kernel
# ----------------------------------------------------------------------------

def _layer_norm(x, g, b, eps=1e-5):
    m = jnp.mean(x, axis=-1, keepdims=True)
    v = jnp.mean((x - m) ** 2, axis=-1, keepdims=True)
    return (x - m) * lax.rsqrt(v + eps) * g + b


def _tomnet_kernel(
    # CharacterNet
    xc_ref, c_wih_ref, c_whh_ref, c_b_ref, c_lng_ref, c_lnb_ref,
    c_wmu_ref, c_bmu_ref, c_wlv_ref, c_blv_ref, eps_c_ref,
    # MentalNet
    xm_ref, m_wih_ref, m_whh_ref, m_b_ref, rev_oh_ref, mask_ref,
    m_lng_ref, m_lnb_ref, m_wa_ref, m_ba_ref,
    m_wmu_ref, m_bmu_ref, m_wlv_ref, m_blv_ref, eps_m_ref,
    # Fusion MLP + heads
    last_emb_ref, f_w1_ref, f_b1_ref, f_g1_ref, f_be1_ref,
    f_w2_ref, f_b2_ref, f_g2_ref, f_be2_ref,
    w_next_ref, b_next_ref, w_goal_ref, b_goal_ref,
    # output (packed, lane-dense)
    out_ref,
    # scratch
    out3_scr,
    *, T_sup, BK, B, K, Hc, T_q, Hm, Z, num_nodes, num_goals, pad_to,
):
    f32 = jnp.float32
    bf16 = jnp.bfloat16

    # ---------------- CharacterNet: LSTM over support trajectories ----------
    # Hoisted input projection: one pipelined MXU matmul for all T steps.
    proj_c = jnp.dot(xc_ref[...].astype(bf16), c_wih_ref[...].astype(bf16),
                     preferred_element_type=f32) + c_b_ref[...]   # (T_sup*BK, 4Hc)
    c_whh = c_whh_ref[...].astype(bf16)
    h_c = jnp.zeros((BK, Hc), f32)
    c_c = jnp.zeros((BK, Hc), f32)
    for t in range(T_sup):                      # static trip count -> unrolled
        gates = proj_c[t * BK:(t + 1) * BK, :] + jnp.dot(
            h_c.astype(bf16), c_whh, preferred_element_type=f32)   # (BK, 4Hc)
        sg = jax.nn.sigmoid(gates)              # full-width EUP pushes
        th = jnp.tanh(gates)
        i_g = sg[:, 0 * Hc:1 * Hc]
        f_g = sg[:, 1 * Hc:2 * Hc]
        g_g = th[:, 2 * Hc:3 * Hc]
        o_g = sg[:, 3 * Hc:4 * Hc]
        c_c = f_g * c_c + i_g * g_g
        h_c = o_g * jnp.tanh(c_c)

    # dropout = identity (eval); LayerNorm over hidden dim
    hn_c = _layer_norm(h_c, c_lng_ref[...], c_lnb_ref[...])          # (BK, Hc)
    # mean over the K support trajectories (rows b*K .. b*K+K-1), pure VPU
    chars = jnp.concatenate(
        [jnp.mean(hn_c[b * K:(b + 1) * K, :], axis=0, keepdims=True)
         for b in range(B)], axis=0)                                 # (B, Hc)
    mu_c = jnp.dot(chars, c_wmu_ref[...], preferred_element_type=f32) + c_bmu_ref[...]
    lv_c = jnp.dot(chars, c_wlv_ref[...], preferred_element_type=f32) + c_blv_ref[...]
    z_c = mu_c + eps_c_ref[...] * jnp.exp(0.5 * lv_c)

    # ---------------- MentalNet: bi-LSTM, both directions in one matmul -----
    H2 = 2 * Hm
    proj_m = jnp.dot(xm_ref[...].astype(bf16), m_wih_ref[...].astype(bf16),
                     preferred_element_type=f32) + m_b_ref[...]      # (T_q*B, 8Hm)
    m_whh = m_whh_ref[...].astype(bf16)
    h_m = jnp.zeros((B, H2), f32)               # [h_fwd | h_rev]
    c_m = jnp.zeros((B, H2), f32)
    for t in range(T_q):                        # static trip count -> unrolled
        gates = proj_m[t * B:(t + 1) * B, :] + jnp.dot(
            h_m.astype(bf16), m_whh, preferred_element_type=f32)     # (B, 8Hm)
        sg = jax.nn.sigmoid(gates)
        th = jnp.tanh(gates)
        i_g = sg[:, 0 * H2:1 * H2]              # [i_f | i_r]
        f_g = sg[:, 1 * H2:2 * H2]
        g_g = th[:, 2 * H2:3 * H2]
        o_g = sg[:, 3 * H2:4 * H2]
        c_m = f_g * c_m + i_g * g_g
        h_m = o_g * jnp.tanh(c_m)
        out3_scr[:, t, :] = h_m                 # keep per-step states in VMEM

    out_bt = out3_scr[...]                      # (B, T_q, 2Hm)
    out_f = out_bt[:, :, :Hm]                   # forward direction, time order
    out_r = out_bt[:, :, Hm:]                   # reverse direction, reversed-step order
    # map reverse-direction states back to original time order (one-hot permute)
    bwd = jnp.einsum('bts,bsh->bth', rev_oh_ref[...], out_r,
                     preferred_element_type=f32)                      # (B, T_q, Hm)
    out3 = jnp.concatenate([out_f, bwd], axis=-1)                     # (B, T_q, 2Hm)
    out3 = _layer_norm(out3, m_lng_ref[...], m_lnb_ref[...])

    # masked attention pooling over time (pure VPU)
    mask = mask_ref[...]                                              # (B, T_q)
    scores = jnp.sum(out3 * m_wa_ref[...], axis=-1) + m_ba_ref[...]   # (B, T_q)
    scores = jnp.where(mask > 0.0, scores, -1e30)
    scores = scores - jnp.max(scores, axis=-1, keepdims=True)
    e = jnp.exp(scores) * mask
    denom = jnp.maximum(jnp.sum(e, axis=-1, keepdims=True), 1e-20)    # NaN guard
    w = e / denom
    feat = jnp.sum(w[:, :, None] * out3, axis=1)                      # (B, 2Hm)

    mu_m = jnp.dot(feat, m_wmu_ref[...], preferred_element_type=f32) + m_bmu_ref[...]
    lv_m = jnp.dot(feat, m_wlv_ref[...], preferred_element_type=f32) + m_blv_ref[...]
    z_m = mu_m + eps_m_ref[...] * jnp.exp(0.5 * lv_m)

    # ---------------- fusion MLP + prediction heads --------------------------
    fin = jnp.concatenate([z_c, z_m, last_emb_ref[...]], axis=1)
    h1 = jnp.dot(fin, f_w1_ref[...], preferred_element_type=f32) + f_b1_ref[...]
    h1 = jnp.maximum(_layer_norm(h1, f_g1_ref[...], f_be1_ref[...]), 0.0)  # dropout = id
    h2 = jnp.dot(h1, f_w2_ref[...], preferred_element_type=f32) + f_b2_ref[...]
    h2 = jnp.maximum(_layer_norm(h2, f_g2_ref[...], f_be2_ref[...]), 0.0)  # dropout = id
    nxt = jnp.dot(h2, w_next_ref[...], preferred_element_type=f32) + b_next_ref[...]
    gl = jnp.dot(h2, w_goal_ref[...], preferred_element_type=f32) + b_goal_ref[...]

    # single lane-dense packed output: [mu_c | lv_c | mu_m | lv_m | next | goal | pad]
    total = 4 * Z + num_nodes + num_goals
    pieces = [mu_c, lv_c, mu_m, lv_m, nxt, gl]
    if pad_to > total:
        pieces.append(jnp.zeros((pieces[0].shape[0], pad_to - total), f32))
    out_ref[...] = jnp.concatenate(pieces, axis=1)


# ----------------------------------------------------------------------------
# Bi-LSTM weight packing: block-diagonal, gate-major direction interleave.
# Gate layout of the fused matmul output: [i_f,i_r | f_f,f_r | g_f,g_r | o_f,o_r]
# matching the fused state layout [h_f | h_r].
# ----------------------------------------------------------------------------

def _pack_bidir_cols(w_f, w_r, H):
    cols = []
    for g in range(4):                       # PyTorch gate order (i, f, g, o)
        cols.append(w_f[:, g * H:(g + 1) * H])
        cols.append(w_r[:, g * H:(g + 1) * H])
    return cols


def _pack_bidir_blockdiag(w_f, w_r, H):
    zf = jnp.zeros((w_f.shape[0], H), w_f.dtype)
    zr = jnp.zeros((w_r.shape[0], H), w_r.dtype)
    top, bot = [], []
    for g in range(4):
        top += [w_f[:, g * H:(g + 1) * H], zf]
        bot += [zr, w_r[:, g * H:(g + 1) * H]]
    return jnp.concatenate([jnp.concatenate(top, axis=1),
                            jnp.concatenate(bot, axis=1)], axis=0)


# ----------------------------------------------------------------------------
# Deterministic parameter construction (shapes follow the PyTorch __init__)
# ----------------------------------------------------------------------------

def init_params(key, *, num_nodes, d_emb, h_char, h_ment, dvib_z, z_fuse, num_goals):
    keys = jax.random.split(key, 32)
    kit = iter(keys)

    def nrm(shape, scale=0.1):
        return (scale * jax.random.normal(next(kit), shape)).astype(jnp.float32)

    p = {}
    emb = nrm((num_nodes, d_emb))
    p["emb"] = emb.at[0].set(0.0)                       # padding_idx=0

    # CharacterNet: unidirectional LSTM d_emb -> h_char
    p["c_wih"] = nrm((d_emb, 4 * h_char))
    p["c_whh"] = nrm((h_char, 4 * h_char))
    p["c_b"] = nrm((1, 4 * h_char))                     # b_ih + b_hh combined
    p["c_lng"] = jnp.ones((1, h_char), jnp.float32)
    p["c_lnb"] = jnp.zeros((1, h_char), jnp.float32)
    p["c_wmu"] = nrm((h_char, dvib_z)); p["c_bmu"] = nrm((1, dvib_z))
    p["c_wlv"] = nrm((h_char, dvib_z)); p["c_blv"] = nrm((1, dvib_z))

    # MentalNet: bidirectional LSTM d_emb -> h_ment (per direction)
    p["m_wih_f"] = nrm((d_emb, 4 * h_ment)); p["m_whh_f"] = nrm((h_ment, 4 * h_ment))
    p["m_b_f"] = nrm((1, 4 * h_ment))
    p["m_wih_r"] = nrm((d_emb, 4 * h_ment)); p["m_whh_r"] = nrm((h_ment, 4 * h_ment))
    p["m_b_r"] = nrm((1, 4 * h_ment))
    p["m_lng"] = jnp.ones((1, 2 * h_ment), jnp.float32)
    p["m_lnb"] = jnp.zeros((1, 2 * h_ment), jnp.float32)
    p["m_wa"] = nrm((1, 2 * h_ment)); p["m_ba"] = nrm((1, 1))
    p["m_wmu"] = nrm((2 * h_ment, dvib_z)); p["m_bmu"] = nrm((1, dvib_z))
    p["m_wlv"] = nrm((2 * h_ment, dvib_z)); p["m_blv"] = nrm((1, dvib_z))

    # Fusion MLP + heads
    fusion_dim = 2 * dvib_z + d_emb
    p["f_w1"] = nrm((fusion_dim, 128)); p["f_b1"] = nrm((1, 128))
    p["f_g1"] = jnp.ones((1, 128), jnp.float32); p["f_be1"] = jnp.zeros((1, 128), jnp.float32)
    p["f_w2"] = nrm((128, z_fuse)); p["f_b2"] = nrm((1, z_fuse))
    p["f_g2"] = jnp.ones((1, z_fuse), jnp.float32); p["f_be2"] = jnp.zeros((1, z_fuse), jnp.float32)
    p["w_next"] = nrm((z_fuse, num_nodes)); p["b_next"] = nrm((1, num_nodes))
    p["w_goal"] = nrm((z_fuse, num_goals)); p["b_goal"] = nrm((1, num_goals))
    return p


# ----------------------------------------------------------------------------
# ToMNet forward (single fused pallas_call)
# ----------------------------------------------------------------------------

def tomnet_forward(params, sup, prefix, prefix_len, rng):
    B, K, T_sup = sup.shape
    _, T_q = prefix.shape
    emb = params["emb"]
    num_nodes, D = emb.shape
    Hc = params["c_whh"].shape[0]
    Hm = params["m_whh_f"].shape[0]
    Z = params["c_wmu"].shape[1]
    num_goals = params["w_goal"].shape[1]
    k_char, k_ment = jax.random.split(rng)

    # ---- XLA glue: embedding gathers, per-length reversal, masks ----
    sup_emb = emb[sup.reshape(B * K, T_sup)]                          # (BK, T, D)
    xc = jnp.transpose(sup_emb, (1, 0, 2)).reshape(T_sup * B * K, D)  # time-major, flat

    pre_emb = emb[prefix]                                             # (B, T_q, D)
    t_idx = jnp.arange(T_q, dtype=jnp.int32)
    # packed-sequence backward direction: reverse each sequence within its length
    idx_rev = jnp.clip(prefix_len[:, None] - 1 - t_idx[None, :], 0, T_q - 1)  # (B, T)
    pre_emb_rev = jnp.take_along_axis(pre_emb, idx_rev[:, :, None], axis=1)
    x_f = jnp.transpose(pre_emb, (1, 0, 2))                           # (T, B, D)
    x_r = jnp.transpose(pre_emb_rev, (1, 0, 2))
    xm = jnp.concatenate([x_f, x_r], axis=-1).reshape(T_q * B, 2 * D)

    mask = (t_idx[None, :] < prefix_len[:, None]).astype(jnp.float32)             # (B, T)
    rev_oh = (t_idx[None, None, :] == idx_rev[:, :, None]).astype(jnp.float32)    # (B, T, T)

    last_idx = jnp.clip(prefix_len - 1, 0, T_q - 1)
    last_emb = emb[prefix[jnp.arange(B), last_idx]]                   # (B, D)

    eps_c = jax.random.normal(k_char, (B, Z), jnp.float32)
    eps_m = jax.random.normal(k_ment, (B, Z), jnp.float32)

    # fused bi-LSTM weights (one 8H-wide matmul per timestep)
    m_wih = _pack_bidir_blockdiag(params["m_wih_f"], params["m_wih_r"], Hm)   # (2D, 8Hm)
    m_whh = _pack_bidir_blockdiag(params["m_whh_f"], params["m_whh_r"], Hm)   # (2Hm, 8Hm)
    m_b = jnp.concatenate(_pack_bidir_cols(params["m_b_f"], params["m_b_r"], Hm), axis=1)

    total = 4 * Z + num_nodes + num_goals
    pad_to = ((total + 127) // 128) * 128

    kernel = functools.partial(
        _tomnet_kernel, T_sup=T_sup, BK=B * K, B=B, K=K, Hc=Hc, T_q=T_q,
        Hm=Hm, Z=Z, num_nodes=num_nodes, num_goals=num_goals, pad_to=pad_to)

    inputs = [
        xc, params["c_wih"], params["c_whh"], params["c_b"],
        params["c_lng"], params["c_lnb"],
        params["c_wmu"], params["c_bmu"], params["c_wlv"], params["c_blv"], eps_c,
        xm, m_wih, m_whh, m_b, rev_oh, mask,
        params["m_lng"], params["m_lnb"], params["m_wa"], params["m_ba"],
        params["m_wmu"], params["m_bmu"], params["m_wlv"], params["m_blv"], eps_m,
        last_emb, params["f_w1"], params["f_b1"], params["f_g1"], params["f_be1"],
        params["f_w2"], params["f_b2"], params["f_g2"], params["f_be2"],
        params["w_next"], params["b_next"], params["w_goal"], params["b_goal"],
    ]
    # TODO(synk): on v7x a "parallel" grid axis (or pl.core_map) could split the
    # batch across the 2 TensorCores; at these shapes a single invocation wins.
    packed = pl.pallas_call(
        kernel,
        out_shape=jax.ShapeDtypeStruct((B, pad_to), jnp.float32),
        in_specs=[pl.BlockSpec(memory_space=pltpu.MemorySpace.VMEM)] * len(inputs),
        out_specs=pl.BlockSpec(memory_space=pltpu.MemorySpace.VMEM),
        scratch_shapes=[pltpu.VMEM((B, T_q, 2 * Hm), jnp.float32)],
    )(*inputs)

    mu_c = packed[:, 0:Z]
    lv_c = packed[:, Z:2 * Z]
    mu_m = packed[:, 2 * Z:3 * Z]
    lv_m = packed[:, 3 * Z:4 * Z]
    next_logits = packed[:, 4 * Z:4 * Z + num_nodes]
    goal_logits = packed[:, 4 * Z + num_nodes:4 * Z + num_nodes + num_goals]
    return next_logits, goal_logits, mu_c, lv_c, mu_m, lv_m


# ----------------------------------------------------------------------------
if __name__ == "__main__":
    B, K, T_sup, T_q = 2, 4, 8, 8
    num_nodes, d_emb = 32, 16
    h_char = h_ment = 32
    dvib_z = 32          # dvib_z_dim
    z_fuse = 32          # z_dim of the fusion MLP
    num_goals = 8

    root = jax.random.PRNGKey(0)
    k_param, k_sup, k_pre, k_eps = jax.random.split(root, 4)
    params = init_params(k_param, num_nodes=num_nodes, d_emb=d_emb,
                         h_char=h_char, h_ment=h_ment, dvib_z=dvib_z,
                         z_fuse=z_fuse, num_goals=num_goals)

    sup = jax.random.randint(k_sup, (B, K, T_sup), 1, num_nodes, dtype=jnp.int32)
    prefix = jax.random.randint(k_pre, (B, T_q), 1, num_nodes, dtype=jnp.int32)
    prefix_len = jnp.array([5, 8], dtype=jnp.int32)

    fwd = jax.jit(tomnet_forward)
    outs = fwd(params, sup, prefix, prefix_len, k_eps)
    outs = jax.block_until_ready(outs)

    next_logits, goal_logits, mu_c, lv_c, mu_m, lv_m = outs
    assert next_logits.shape == (B, num_nodes)
    assert goal_logits.shape == (B, num_goals)
    assert mu_c.shape == (B, dvib_z) and lv_c.shape == (B, dvib_z)
    assert mu_m.shape == (B, dvib_z) and lv_m.shape == (B, dvib_z)
    assert bool(jnp.all(jnp.isfinite(next_logits)))
    print("KERNEL_OK")
</pallas_src>

<mosaic_0001>
module attributes {stable_mosaic.version = 11 : i64} {
  func.func @_tomnet_kernel(%arg0: memref<64x16xf32, #tpu.memory_space<vmem>>, %arg1: memref<16x128xf32, #tpu.memory_space<vmem>>, %arg2: memref<32x128xf32, #tpu.memory_space<vmem>>, %arg3: memref<1x128xf32, #tpu.memory_space<vmem>>, %arg4: memref<1x32xf32, #tpu.memory_space<vmem>>, %arg5: memref<1x32xf32, #tpu.memory_space<vmem>>, %arg6: memref<32x32xf32, #tpu.memory_space<vmem>>, %arg7: memref<1x32xf32, #tpu.memory_space<vmem>>, %arg8: memref<32x32xf32, #tpu.memory_space<vmem>>, %arg9: memref<1x32xf32, #tpu.memory_space<vmem>>, %arg10: memref<2x32xf32, #tpu.memory_space<vmem>>, %arg11: memref<16x32xf32, #tpu.memory_space<vmem>>, %arg12: memref<32x256xf32, #tpu.memory_space<vmem>>, %arg13: memref<64x256xf32, #tpu.memory_space<vmem>>, %arg14: memref<1x256xf32, #tpu.memory_space<vmem>>, %arg15: memref<2x8x8xf32, #tpu.memory_space<vmem>>, %arg16: memref<2x8xf32, #tpu.memory_space<vmem>>, %arg17: memref<1x64xf32, #tpu.memory_space<vmem>>, %arg18: memref<1x64xf32, #tpu.memory_space<vmem>>, %arg19: memref<1x64xf32, #tpu.memory_space<vmem>>, %arg20: memref<1x1xf32, #tpu.memory_space<vmem>>, %arg21: memref<64x32xf32, #tpu.memory_space<vmem>>, %arg22: memref<1x32xf32, #tpu.memory_space<vmem>>, %arg23: memref<64x32xf32, #tpu.memory_space<vmem>>, %arg24: memref<1x32xf32, #tpu.memory_space<vmem>>, %arg25: memref<2x32xf32, #tpu.memory_space<vmem>>, %arg26: memref<2x16xf32, #tpu.memory_space<vmem>>, %arg27: memref<80x128xf32, #tpu.memory_space<vmem>>, %arg28: memref<1x128xf32, #tpu.memory_space<vmem>>, %arg29: memref<1x128xf32, #tpu.memory_space<vmem>>, %arg30: memref<1x128xf32, #tpu.memory_space<vmem>>, %arg31: memref<128x32xf32, #tpu.memory_space<vmem>>, %arg32: memref<1x32xf32, #tpu.memory_space<vmem>>, %arg33: memref<1x32xf32, #tpu.memory_space<vmem>>, %arg34: memref<1x32xf32, #tpu.memory_space<vmem>>, %arg35: memref<32x32xf32, #tpu.memory_space<vmem>>, %arg36: memref<1x32xf32, #tpu.memory_space<vmem>>, %arg37: memref<32x8xf32, #tpu.memory_space<vmem>>, %arg38: memref<1x8xf32, #tpu.memory_space<vmem>>, %arg39: memref<2x256xf32, #tpu.memory_space<vmem>>, %arg40: memref<2x8x64xf32, #tpu.memory_space<vmem>>) attributes {dimension_semantics = [], scalar_prefetch = 0 : i64, scratch_operands = 1 : i64, tpu.core_type = #tpu.core_type<tc>} {
    %c0 = arith.constant 0 : index
    %c0_0 = arith.constant 0 : index
    %0 = vector.load %arg0[%c0, %c0_0] : memref<64x16xf32, #tpu.memory_space<vmem>>, vector<64x16xf32>
    %1 = arith.truncf %0 : vector<64x16xf32> to vector<64x16xbf16>
    %c0_1 = arith.constant 0 : index
    %c0_2 = arith.constant 0 : index
    %2 = vector.load %arg1[%c0_1, %c0_2] : memref<16x128xf32, #tpu.memory_space<vmem>>, vector<16x128xf32>
    %3 = arith.truncf %2 : vector<16x128xf32> to vector<16x128xbf16>
    %cst = arith.constant dense<0.000000e+00> : vector<64x128xf32>
    %4 = tpu.matmul %1, %3, %cst {dimension_numbers = #tpu.dot_dimension_numbers<[1], [0], [0], [1], [0, 0, 1, 1], [], []>} : vector<64x16xbf16>, vector<16x128xbf16>, vector<64x128xf32> -> vector<64x128xf32>
    %c0_3 = arith.constant 0 : index
    %c0_4 = arith.constant 0 : index
    %5 = vector.load %arg3[%c0_3, %c0_4] : memref<1x128xf32, #tpu.memory_space<vmem>>, vector<1x128xf32>
    %6 = vector.broadcast %5 : vector<1x128xf32> to vector<64x128xf32>
    %7 = arith.addf %4, %6 : vector<64x128xf32>
    %c0_5 = arith.constant 0 : index
    %c0_6 = arith.constant 0 : index
    %8 = vector.load %arg2[%c0_5, %c0_6] : memref<32x128xf32, #tpu.memory_space<vmem>>, vector<32x128xf32>
    %9 = arith.truncf %8 : vector<32x128xf32> to vector<32x128xbf16>
    %cst_7 = arith.constant 0.000000e+00 : f32
    %10 = vector.broadcast %cst_7 : f32 to vector<8x32xf32>
    %cst_8 = arith.constant 0.000000e+00 : f32
    %11 = vector.broadcast %cst_8 : f32 to vector<8x32xf32>
    %12 = vector.extract_strided_slice %7 {offsets = [0, 0], sizes = [8, 128], strides = [1, 1]} : vector<64x128xf32> to vector<8x128xf32>
    %13 = arith.truncf %10 : vector<8x32xf32> to vector<8x32xbf16>
    %cst_9 = arith.constant dense<0.000000e+00> : vector<8x128xf32>
    %14 = tpu.matmul %13, %9, %cst_9 {dimension_numbers = #tpu.dot_dimension_numbers<[1], [0], [0], [1], [0, 0, 1, 1], [], []>} : vector<8x32xbf16>, vector<32x128xbf16>, vector<8x128xf32> -> vector<8x128xf32>
    %15 = arith.addf %12, %14 : vector<8x128xf32>
    %16 = arith.negf %15 : vector<8x128xf32>
    %17 = math.exp %16 : vector<8x128xf32>
    %cst_10 = arith.constant 1.000000e+00 : f32
    %18 = vector.broadcast %cst_10 : f32 to vector<8x128xf32>
    %19 = arith.addf %18, %17 : vector<8x128xf32>
    %20 = arith.divf %18, %19 : vector<8x128xf32>
    %21 = math.tanh %15 : vector<8x128xf32>
    %22 = vector.extract_strided_slice %20 {offsets = [0, 0], sizes = [8, 32], strides = [1, 1]} : vector<8x128xf32> to vector<8x32xf32>
    %23 = vector.extract_strided_slice %20 {offsets = [0, 32], sizes = [8, 32], strides = [1, 1]} : vector<8x128xf32> to vector<8x32xf32>
    %24 = vector.extract_strided_slice %21 {offsets = [0, 64], sizes = [8, 32], strides = [1, 1]} : vector<8x128xf32> to vector<8x32xf32>
    %25 = vector.extract_strided_slice %20 {offsets = [0, 96], sizes = [8, 32], strides = [1, 1]} : vector<8x128xf32> to vector<8x32xf32>
    %26 = arith.mulf %23, %11 : vector<8x32xf32>
    %27 = arith.mulf %22, %24 : vector<8x32xf32>
    %28 = arith.addf %26, %27 : vector<8x32xf32>
    %29 = math.tanh %28 : vector<8x32xf32>
    %30 = arith.mulf %25, %29 : vector<8x32xf32>
    %31 = vector.extract_strided_slice %7 {offsets = [8, 0], sizes = [8, 128], strides = [1, 1]} : vector<64x128xf32> to vector<8x128xf32>
    %32 = arith.truncf %30 : vector<8x32xf32> to vector<8x32xbf16>
    %cst_11 = arith.constant dense<0.000000e+00> : vector<8x128xf32>
    %33 = tpu.matmul %32, %9, %cst_11 {dimension_numbers = #tpu.dot_dimension_numbers<[1], [0], [0], [1], [0, 0, 1, 1], [], []>} : vector<8x32xbf16>, vector<32x128xbf16>, vector<8x128xf32> -> vector<8x128xf32>
    %34 = arith.addf %31, %33 : vector<8x128xf32>
    %35 = arith.negf %34 : vector<8x128xf32>
    %36 = math.exp %35 : vector<8x128xf32>
    %cst_12 = arith.constant 1.000000e+00 : f32
    %37 = vector.broadcast %cst_12 : f32 to vector<8x128xf32>
    %38 = arith.addf %37, %36 : vector<8x128xf32>
    %39 = arith.divf %37, %38 : vector<8x128xf32>
    %40 = math.tanh %34 : vector<8x128xf32>
    %41 = vector.extract_strided_slice %39 {offsets = [0, 0], sizes = [8, 32], strides = [1, 1]} : vector<8x128xf32> to vector<8x32xf32>
    %42 = vector.extract_strided_slice %39 {offsets = [0, 32], sizes = [8, 32], strides = [1, 1]} : vector<8x128xf32> to vector<8x32xf32>
    %43 = vector.extract_strided_slice %40 {offsets = [0, 64], sizes = [8, 32], strides = [1, 1]} : vector<8x128xf32> to vector<8x32xf32>
    %44 = vector.extract_strided_slice %39 {offsets = [0, 96], sizes = [8, 32], strides = [1, 1]} : vector<8x128xf32> to vector<8x32xf32>
    %45 = arith.mulf %42, %28 : vector<8x32xf32>
    %46 = arith.mulf %41, %43 : vector<8x32xf32>
    %47 = arith.addf %45, %46 : vector<8x32xf32>
    %48 = math.tanh %47 : vector<8x32xf32>
    %49 = arith.mulf %44, %48 : vector<8x32xf32>
    %50 = vector.extract_strided_slice %7 {offsets = [16, 0], sizes = [8, 128], strides = [1, 1]} : vector<64x128xf32> to vector<8x128xf32>
    %51 = arith.truncf %49 : vector<8x32xf32> to vector<8x32xbf16>
    %cst_13 = arith.constant dense<0.000000e+00> : vector<8x128xf32>
    %52 = tpu.matmul %51, %9, %cst_13 {dimension_numbers = #tpu.dot_dimension_numbers<[1], [0], [0], [1], [0, 0, 1, 1], [], []>} : vector<8x32xbf16>, vector<32x128xbf16>, vector<8x128xf32> -> vector<8x128xf32>
    %53 = arith.addf %50, %52 : vector<8x128xf32>
    %54 = arith.negf %53 : vector<8x128xf32>
    %55 = math.exp %54 : vector<8x128xf32>
    %cst_14 = arith.constant 1.000000e+00 : f32
    %56 = vector.broadcast %cst_14 : f32 to vector<8x128xf32>
    %57 = arith.addf %56, %55 : vector<8x128xf32>
    %58 = arith.divf %56, %57 : vector<8x128xf32>
    %59 = math.tanh %53 : vector<8x128xf32>
    %60 = vector.extract_strided_slice %58 {offsets = [0, 0], sizes = [8, 32], strides = [1, 1]} : vector<8x128xf32> to vector<8x32xf32>
    %61 = vector.extract_strided_slice %58 {offsets = [0, 32], sizes = [8, 32], strides = [1, 1]} : vector<8x128xf32> to vector<8x32xf32>
    %62 = vector.extract_strided_slice %59 {offsets = [0, 64], sizes = [8, 32], strides = [1, 1]} : vector<8x128xf32> to vector<8x32xf32>
    %63 = vector.extract_strided_slice %58 {offsets = [0, 96], sizes = [8, 32], strides = [1, 1]} : vector<8x128xf32> to vector<8x32xf32>
    %64 = arith.mulf %61, %47 : vector<8x32xf32>
    %65 = arith.mulf %60, %62 : vector<8x32xf32>
    %66 = arith.addf %64, %65 : vector<8x32xf32>
    %67 = math.tanh %66 : vector<8x32xf32>
    %68 = arith.mulf %63, %67 : vector<8x32xf32>
    %69 = vector.extract_strided_slice %7 {offsets = [24, 0], sizes = [8, 128], strides = [1, 1]} : vector<64x128xf32> to vector<8x128xf32>
    %70 = arith.truncf %68 : vector<8x32xf32> to vector<8x32xbf16>
    %cst_15 = arith.constant dense<0.000000e+00> : vector<8x128xf32>
    %71 = tpu.matmul %70, %9, %cst_15 {dimension_numbers = #tpu.dot_dimension_numbers<[1], [0], [0], [1], [0, 0, 1, 1], [], []>} : vector<8x32xbf16>, vector<32x128xbf16>, vector<8x128xf32> -> vector<8x128xf32>
    %72 = arith.addf %69, %71 : vector<8x128xf32>
    %73 = arith.negf %72 : vector<8x128xf32>
    %74 = math.exp %73 : vector<8x128xf32>
    %cst_16 = arith.constant 1.000000e+00 : f32
    %75 = vector.broadcast %cst_16 : f32 to vector<8x128xf32>
    %76 = arith.addf %75, %74 : vector<8x128xf32>
    %77 = arith.divf %75, %76 : vector<8x128xf32>
    %78 = math.tanh %72 : vector<8x128xf32>
    %79 = vector.extract_strided_slice %77 {offsets = [0, 0], sizes = [8, 32], strides = [1, 1]} : vector<8x128xf32> to vector<8x32xf32>
    %80 = vector.extract_strided_slice %77 {offsets = [0, 32], sizes = [8, 32], strides = [1, 1]} : vector<8x128xf32> to vector<8x32xf32>
    %81 = vector.extract_strided_slice %78 {offsets = [0, 64], sizes = [8, 32], strides = [1, 1]} : vector<8x128xf32> to vector<8x32xf32>
    %82 = vector.extract_strided_slice %77 {offsets = [0, 96], sizes = [8, 32], strides = [1, 1]} : vector<8x128xf32> to vector<8x32xf32>
    %83 = arith.mulf %80, %66 : vector<8x32xf32>
    %84 = arith.mulf %79, %81 : vector<8x32xf32>
    %85 = arith.addf %83, %84 : vector<8x32xf32>
    %86 = math.tanh %85 : vector<8x32xf32>
    %87 = arith.mulf %82, %86 : vector<8x32xf32>
    %88 = vector.extract_strided_slice %7 {offsets = [32, 0], sizes = [8, 128], strides = [1, 1]} : vector<64x128xf32> to vector<8x128xf32>
    %89 = arith.truncf %87 : vector<8x32xf32> to vector<8x32xbf16>
    %cst_17 = arith.constant dense<0.000000e+00> : vector<8x128xf32>
    %90 = tpu.matmul %89, %9, %cst_17 {dimension_numbers = #tpu.dot_dimension_numbers<[1], [0], [0], [1], [0, 0, 1, 1], [], []>} : vector<8x32xbf16>, vector<32x128xbf16>, vector<8x128xf32> -> vector<8x128xf32>
    %91 = arith.addf %88, %90 : vector<8x128xf32>
    %92 = arith.negf %91 : vector<8x128xf32>
    %93 = math.exp %92 : vector<8x128xf32>
    %cst_18 = arith.constant 1.000000e+00 : f32
    %94 = vector.broadcast %cst_18 : f32 to vector<8x128xf32>
    %95 = arith.addf %94, %93 : vector<8x128xf32>
    %96 = arith.divf %94, %95 : vector<8x128xf32>
    %97 = math.tanh %91 : vector<8x128xf32>
    %98 = vector.extract_strided_slice %96 {offsets = [0, 0], sizes = [8, 32], strides = [1, 1]} : vector<8x128xf32> to vector<8x32xf32>
    %99 = vector.extract_strided_slice %96 {offsets = [0, 32], sizes = [8, 32], strides = [1, 1]} : vector<8x128xf32> to vector<8x32xf32>
    %100 = vector.extract_strided_slice %97 {offsets = [0, 64], sizes = [8, 32], strides = [1, 1]} : vector<8x128xf32> to vector<8x32xf32>
    %101 = vector.extract_strided_slice %96 {offsets = [0, 96], sizes = [8, 32], strides = [1, 1]} : vector<8x128xf32> to vector<8x32xf32>
    %102 = arith.mulf %99, %85 : vector<8x32xf32>
    %103 = arith.mulf %98, %100 : vector<8x32xf32>
    %104 = arith.addf %102, %103 : vector<8x32xf32>
    %105 = math.tanh %104 : vector<8x32xf32>
    %106 = arith.mulf %101, %105 : vector<8x32xf32>
    %107 = vector.extract_strided_slice %7 {offsets = [40, 0], sizes = [8, 128], strides = [1, 1]} : vector<64x128xf32> to vector<8x128xf32>
    %108 = arith.truncf %106 : vector<8x32xf32> to vector<8x32xbf16>
    %cst_19 = arith.constant dense<0.000000e+00> : vector<8x128xf32>
    %109 = tpu.matmul %108, %9, %cst_19 {dimension_numbers = #tpu.dot_dimension_numbers<[1], [0], [0], [1], [0, 0, 1, 1], [], []>} : vector<8x32xbf16>, vector<32x128xbf16>, vector<8x128xf32> -> vector<8x128xf32>
    %110 = arith.addf %107, %109 : vector<8x128xf32>
    %111 = arith.negf %110 : vector<8x128xf32>
    %112 = math.exp %111 : vector<8x128xf32>
    %cst_20 = arith.constant 1.000000e+00 : f32
    %113 = vector.broadcast %cst_20 : f32 to vector<8x128xf32>
    %114 = arith.addf %113, %112 : vector<8x128xf32>
    %115 = arith.divf %113, %114 : vector<8x128xf32>
    %116 = math.tanh %110 : vector<8x128xf32>
    %117 = vector.extract_strided_slice %115 {offsets = [0, 0], sizes = [8, 32], strides = [1, 1]} : vector<8x128xf32> to vector<8x32xf32>
    %118 = vector.extract_strided_slice %115 {offsets = [0, 32], sizes = [8, 32], strides = [1, 1]} : vector<8x128xf32> to vector<8x32xf32>
    %119 = vector.extract_strided_slice %116 {offsets = [0, 64], sizes = [8, 32], strides = [1, 1]} : vector<8x128xf32> to vector<8x32xf32>
    %120 = vector.extract_strided_slice %115 {offsets = [0, 96], sizes = [8, 32], strides = [1, 1]} : vector<8x128xf32> to vector<8x32xf32>
    %121 = arith.mulf %118, %104 : vector<8x32xf32>
    %122 = arith.mulf %117, %119 : vector<8x32xf32>
    %123 = arith.addf %121, %122 : vector<8x32xf32>
    %124 = math.tanh %123 : vector<8x32xf32>
    %125 = arith.mulf %120, %124 : vector<8x32xf32>
    %126 = vector.extract_strided_slice %7 {offsets = [48, 0], sizes = [8, 128], strides = [1, 1]} : vector<64x128xf32> to vector<8x128xf32>
    %127 = arith.truncf %125 : vector<8x32xf32> to vector<8x32xbf16>
    %cst_21 = arith.constant dense<0.000000e+00> : vector<8x128xf32>
    %128 = tpu.matmul %127, %9, %cst_21 {dimension_numbers = #tpu.dot_dimension_numbers<[1], [0], [0], [1], [0, 0, 1, 1], [], []>} : vector<8x32xbf16>, vector<32x128xbf16>, vector<8x128xf32> -> vector<8x128xf32>
    %129 = arith.addf %126, %128 : vector<8x128xf32>
    %130 = arith.negf %129 : vector<8x128xf32>
    %131 = math.exp %130 : vector<8x128xf32>
    %cst_22 = arith.constant 1.000000e+00 : f32
    %132 = vector.broadcast %cst_22 : f32 to vector<8x128xf32>
    %133 = arith.addf %132, %131 : vector<8x128xf32>
    %134 = arith.divf %132, %133 : vector<8x128xf32>
    %135 = math.tanh %129 : vector<8x128xf32>
    %136 = vector.extract_strided_slice %134 {offsets = [0, 0], sizes = [8, 32], strides = [1, 1]} : vector<8x128xf32> to vector<8x32xf32>
    %137 = vector.extract_strided_slice %134 {offsets = [0, 32], sizes = [8, 32], strides = [1, 1]} : vector<8x128xf32> to vector<8x32xf32>
    %138 = vector.extract_strided_slice %135 {offsets = [0, 64], sizes = [8, 32], strides = [1, 1]} : vector<8x128xf32> to vector<8x32xf32>
    %139 = vector.extract_strided_slice %134 {offsets = [0, 96], sizes = [8, 32], strides = [1, 1]} : vector<8x128xf32> to vector<8x32xf32>
    %140 = arith.mulf %137, %123 : vector<8x32xf32>
    %141 = arith.mulf %136, %138 : vector<8x32xf32>
    %142 = arith.addf %140, %141 : vector<8x32xf32>
    %143 = math.tanh %142 : vector<8x32xf32>
    %144 = arith.mulf %139, %143 : vector<8x32xf32>
    %145 = vector.extract_strided_slice %7 {offsets = [56, 0], sizes = [8, 128], strides = [1, 1]} : vector<64x128xf32> to vector<8x128xf32>
    %146 = arith.truncf %144 : vector<8x32xf32> to vector<8x32xbf16>
    %cst_23 = arith.constant dense<0.000000e+00> : vector<8x128xf32>
    %147 = tpu.matmul %146, %9, %cst_23 {dimension_numbers = #tpu.dot_dimension_numbers<[1], [0], [0], [1], [0, 0, 1, 1], [], []>} : vector<8x32xbf16>, vector<32x128xbf16>, vector<8x128xf32> -> vector<8x128xf32>
    %148 = arith.addf %145, %147 : vector<8x128xf32>
    %149 = arith.negf %148 : vector<8x128xf32>
    %150 = math.exp %149 : vector<8x128xf32>
    %cst_24 = arith.constant 1.000000e+00 : f32
    %151 = vector.broadcast %cst_24 : f32 to vector<8x128xf32>
    %152 = arith.addf %151, %150 : vector<8x128xf32>
    %153 = arith.divf %151, %152 : vector<8x128xf32>
    %154 = math.tanh %148 : vector<8x128xf32>
    %155 = vector.extract_strided_slice %153 {offsets = [0, 0], sizes = [8, 32], strides = [1, 1]} : vector<8x128xf32> to vector<8x32xf32>
    %156 = vector.extract_strided_slice %153 {offsets = [0, 32], sizes = [8, 32], strides = [1, 1]} : vector<8x128xf32> to vector<8x32xf32>
    %157 = vector.extract_strided_slice %154 {offsets = [0, 64], sizes = [8, 32], strides = [1, 1]} : vector<8x128xf32> to vector<8x32xf32>
    %158 = vector.extract_strided_slice %153 {offsets = [0, 96], sizes = [8, 32], strides = [1, 1]} : vector<8x128xf32> to vector<8x32xf32>
    %159 = arith.mulf %156, %142 : vector<8x32xf32>
    %160 = arith.mulf %155, %157 : vector<8x32xf32>
    %161 = arith.addf %159, %160 : vector<8x32xf32>
    %162 = math.tanh %161 : vector<8x32xf32>
    %163 = arith.mulf %158, %162 : vector<8x32xf32>
    %c0_25 = arith.constant 0 : index
    %c0_26 = arith.constant 0 : index
    %164 = vector.load %arg4[%c0_25, %c0_26] : memref<1x32xf32, #tpu.memory_space<vmem>>, vector<1x32xf32>
    %c0_27 = arith.constant 0 : index
    %c0_28 = arith.constant 0 : index
    %165 = vector.load %arg5[%c0_27, %c0_28] : memref<1x32xf32, #tpu.memory_space<vmem>>, vector<1x32xf32>
    %cst_29 = arith.constant dense<0.000000e+00> : vector<8xf32>
    %166 = vector.multi_reduction <add>, %163, %cst_29 [1] : vector<8x32xf32> to vector<8xf32>
    %167 = vector.shape_cast %166 : vector<8xf32> to vector<8x1xf32>
    %cst_30 = arith.constant 3.200000e+01 : f32
    %168 = vector.broadcast %cst_30 : f32 to vector<8x1xf32>
    %169 = arith.divf %167, %168 : vector<8x1xf32>
    %170 = vector.broadcast %169 : vector<8x1xf32> to vector<8x32xf32>
    %171 = arith.subf %163, %170 : vector<8x32xf32>
    %172 = arith.mulf %171, %171 : vector<8x32xf32>
    %cst_31 = arith.constant dense<0.000000e+00> : vector<8xf32>
    %173 = vector.multi_reduction <add>, %172, %cst_31 [1] : vector<8x32xf32> to vector<8xf32>
    %174 = vector.shape_cast %173 : vector<8xf32> to vector<8x1xf32>
    %cst_32 = arith.constant 3.200000e+01 : f32
    %175 = vector.broadcast %cst_32 : f32 to vector<8x1xf32>
    %176 = arith.divf %174, %175 : vector<8x1xf32>
    %177 = vector.broadcast %169 : vector<8x1xf32> to vector<8x32xf32>
    %178 = arith.subf %163, %177 : vector<8x32xf32>
    %cst_33 = arith.constant 9.99999974E-6 : f32
    %179 = vector.broadcast %cst_33 : f32 to vector<8x1xf32>
    %180 = arith.addf %176, %179 : vector<8x1xf32>
    %181 = math.rsqrt %180 : vector<8x1xf32>
    %182 = vector.broadcast %181 : vector<8x1xf32> to vector<8x32xf32>
    %183 = arith.mulf %178, %182 : vector<8x32xf32>
    %184 = vector.broadcast %164 : vector<1x32xf32> to vector<8x32xf32>
    %185 = arith.mulf %183, %184 : vector<8x32xf32>
    %186 = vector.broadcast %165 : vector<1x32xf32> to vector<8x32xf32>
    %187 = arith.addf %185, %186 : vector<8x32xf32>
    %188 = vector.extract_strided_slice %187 {offsets = [0, 0], sizes = [4, 32], strides = [1, 1]} : vector<8x32xf32> to vector<4x32xf32>
    %cst_34 = arith.constant dense<0.000000e+00> : vector<32xf32>
    %189 = vector.multi_reduction <add>, %188, %cst_34 [0] : vector<4x32xf32> to vector<32xf32>
    %190 = vector.shape_cast %189 : vector<32xf32> to vector<1x32xf32>
    %cst_35 = arith.constant 4.000000e+00 : f32
    %191 = vector.broadcast %cst_35 : f32 to vector<1x32xf32>
    %192 = arith.divf %190, %191 : vector<1x32xf32>
    %193 = vector.extract_strided_slice %187 {offsets = [4, 0], sizes = [4, 32], strides = [1, 1]} : vector<8x32xf32> to vector<4x32xf32>
    %cst_36 = arith.constant dense<0.000000e+00> : vector<32xf32>
    %194 = vector.multi_reduction <add>, %193, %cst_36 [0] : vector<4x32xf32> to vector<32xf32>
    %195 = vector.shape_cast %194 : vector<32xf32> to vector<1x32xf32>
    %cst_37 = arith.constant 4.000000e+00 : f32
    %196 = vector.broadcast %cst_37 : f32 to vector<1x32xf32>
    %197 = arith.divf %195, %196 : vector<1x32xf32>
    %198 = tpu.concatenate %192, %197 in 0 : vector<1x32xf32>, vector<1x32xf32> -> vector<2x32xf32>
    %c0_38 = arith.constant 0 : index
    %c0_39 = arith.constant 0 : index
    %199 = vector.load %arg6[%c0_38, %c0_39] : memref<32x32xf32, #tpu.memory_space<vmem>>, vector<32x32xf32>
    %cst_40 = arith.constant dense<0.000000e+00> : vector<2x32xf32>
    %200 = tpu.matmul %198, %199, %cst_40 {dimension_numbers = #tpu.dot_dimension_numbers<[1], [0], [0], [1], [0, 0, 1, 1], [], []>} : vector<2x32xf32>, vector<32x32xf32>, vector<2x32xf32> -> vector<2x32xf32>
    %c0_41 = arith.constant 0 : index
    %c0_42 = arith.constant 0 : index
    %201 = vector.load %arg7[%c0_41, %c0_42] : memref<1x32xf32, #tpu.memory_space<vmem>>, vector<1x32xf32>
    %202 = vector.broadcast %201 : vector<1x32xf32> to vector<2x32xf32>
    %203 = arith.addf %200, %202 : vector<2x32xf32>
    %c0_43 = arith.constant 0 : index
    %c0_44 = arith.constant 0 : index
    %204 = vector.load %arg8[%c0_43, %c0_44] : memref<32x32xf32, #tpu.memory_space<vmem>>, vector<32x32xf32>
    %cst_45 = arith.constant dense<0.000000e+00> : vector<2x32xf32>
    %205 = tpu.matmul %198, %204, %cst_45 {dimension_numbers = #tpu.dot_dimension_numbers<[1], [0], [0], [1], [0, 0, 1, 1], [], []>} : vector<2x32xf32>, vector<32x32xf32>, vector<2x32xf32> -> vector<2x32xf32>
    %c0_46 = arith.constant 0 : index
    %c0_47 = arith.constant 0 : index
    %206 = vector.load %arg9[%c0_46, %c0_47] : memref<1x32xf32, #tpu.memory_space<vmem>>, vector<1x32xf32>
    %207 = vector.broadcast %206 : vector<1x32xf32> to vector<2x32xf32>
    %208 = arith.addf %205, %207 : vector<2x32xf32>
    %c0_48 = arith.constant 0 : index
    %c0_49 = arith.constant 0 : index
    %209 = vector.load %arg10[%c0_48, %c0_49] : memref<2x32xf32, #tpu.memory_space<vmem>>, vector<2x32xf32>
    %cst_50 = arith.constant 5.000000e-01 : f32
    %210 = vector.broadcast %cst_50 : f32 to vector<2x32xf32>
    %211 = arith.mulf %210, %208 : vector<2x32xf32>
    %212 = math.exp %211 : vector<2x32xf32>
    %213 = arith.mulf %209, %212 : vector<2x32xf32>
    %214 = arith.addf %203, %213 : vector<2x32xf32>
    %c0_51 = arith.constant 0 : index
    %c0_52 = arith.constant 0 : index
    %215 = vector.load %arg11[%c0_51, %c0_52] : memref<16x32xf32, #tpu.memory_space<vmem>>, vector<16x32xf32>
    %216 = arith.truncf %215 : vector<16x32xf32> to vector<16x32xbf16>
    %c0_53 = arith.constant 0 : index
    %c0_54 = arith.constant 0 : index
    %217 = vector.load %arg12[%c0_53, %c0_54] : memref<32x256xf32, #tpu.memory_space<vmem>>, vector<32x256xf32>
    %218 = arith.truncf %217 : vector<32x256xf32> to vector<32x256xbf16>
    %cst_55 = arith.constant dense<0.000000e+00> : vector<16x256xf32>
    %219 = tpu.matmul %216, %218, %cst_55 {dimension_numbers = #tpu.dot_dimension_numbers<[1], [0], [0], [1], [0, 0, 1, 1], [], []>} : vector<16x32xbf16>, vector<32x256xbf16>, vector<16x256xf32> -> vector<16x256xf32>
    %c0_56 = arith.constant 0 : index
    %c0_57 = arith.constant 0 : index
    %220 = vector.load %arg14[%c0_56, %c0_57] : memref<1x256xf32, #tpu.memory_space<vmem>>, vector<1x256xf32>
    %221 = vector.broadcast %220 : vector<1x256xf32> to vector<16x256xf32>
    %222 = arith.addf %219, %221 : vector<16x256xf32>
    %c0_58 = arith.constant 0 : index
    %c0_59 = arith.constant 0 : index
    %223 = vector.load %arg13[%c0_58, %c0_59] : memref<64x256xf32, #tpu.memory_space<vmem>>, vector<64x256xf32>
    %224 = arith.truncf %223 : vector<64x256xf32> to vector<64x256xbf16>
    %cst_60 = arith.constant 0.000000e+00 : f32
    %225 = vector.broadcast %cst_60 : f32 to vector<2x64xf32>
    %cst_61 = arith.constant 0.000000e+00 : f32
    %226 = vector.broadcast %cst_61 : f32 to vector<2x64xf32>
    %227 = vector.extract_strided_slice %222 {offsets = [0, 0], sizes = [2, 256], strides = [1, 1]} : vector<16x256xf32> to vector<2x256xf32>
    %228 = arith.truncf %225 : vector<2x64xf32> to vector<2x64xbf16>
    %cst_62 = arith.constant dense<0.000000e+00> : vector<2x256xf32>
    %229 = tpu.matmul %228, %224, %cst_62 {dimension_numbers = #tpu.dot_dimension_numbers<[1], [0], [0], [1], [0, 0, 1, 1], [], []>} : vector<2x64xbf16>, vector<64x256xbf16>, vector<2x256xf32> -> vector<2x256xf32>
    %230 = arith.addf %227, %229 : vector<2x256xf32>
    %231 = arith.negf %230 : vector<2x256xf32>
    %232 = math.exp %231 : vector<2x256xf32>
    %cst_63 = arith.constant 1.000000e+00 : f32
    %233 = vector.broadcast %cst_63 : f32 to vector<2x256xf32>
    %234 = arith.addf %233, %232 : vector<2x256xf32>
    %235 = arith.divf %233, %234 : vector<2x256xf32>
    %236 = math.tanh %230 : vector<2x256xf32>
    %237 = vector.extract_strided_slice %235 {offsets = [0, 0], sizes = [2, 64], strides = [1, 1]} : vector<2x256xf32> to vector<2x64xf32>
    %238 = vector.extract_strided_slice %235 {offsets = [0, 64], sizes = [2, 64], strides = [1, 1]} : vector<2x256xf32> to vector<2x64xf32>
    %239 = vector.extract_strided_slice %236 {offsets = [0, 128], sizes = [2, 64], strides = [1, 1]} : vector<2x256xf32> to vector<2x64xf32>
    %240 = vector.extract_strided_slice %235 {offsets = [0, 192], sizes = [2, 64], strides = [1, 1]} : vector<2x256xf32> to vector<2x64xf32>
    %241 = arith.mulf %238, %226 : vector<2x64xf32>
    %242 = arith.mulf %237, %239 : vector<2x64xf32>
    %243 = arith.addf %241, %242 : vector<2x64xf32>
    %244 = math.tanh %243 : vector<2x64xf32>
    %245 = arith.mulf %240, %244 : vector<2x64xf32>
    %c0_64 = arith.constant 0 : index
    %c0_65 = arith.constant 0 : index
    %c0_66 = arith.constant 0 : index
    %246 = vector.load %arg40[%c0_64, %c0_65, %c0_66] : memref<2x8x64xf32, #tpu.memory_space<vmem>>, vector<2x1x64xf32>
    %247 = vector.shape_cast %246 : vector<2x1x64xf32> to vector<2x64xf32>
    %248 = vector.shape_cast %245 : vector<2x64xf32> to vector<2x1x64xf32>
    tpu.vector_store %arg40[%c0_64, %c0_65, %c0_66], %248 {strides = array<i32>} : memref<2x8x64xf32, #tpu.memory_space<vmem>>, vector<2x1x64xf32>,
    %249 = vector.extract_strided_slice %222 {offsets = [2, 0], sizes = [2, 256], strides = [1, 1]} : vector<16x256xf32> to vector<2x256xf32>
    %250 = arith.truncf %245 : vector<2x64xf32> to vector<2x64xbf16>
    %cst_67 = arith.constant dense<0.000000e+00> : vector<2x256xf32>
    %251 = tpu.matmul %250, %224, %cst_67 {dimension_numbers = #tpu.dot_dimension_numbers<[1], [0], [0], [1], [0, 0, 1, 1], [], []>} : vector<2x64xbf16>, vector<64x256xbf16>, vector<2x256xf32> -> vector<2x256xf32>
    %252 = arith.addf %249, %251 : vector<2x256xf32>
    %253 = arith.negf %252 : vector<2x256xf32>
    %254 = math.exp %253 : vector<2x256xf32>
    %cst_68 = arith.constant 1.000000e+00 : f32
    %255 = vector.broadcast %cst_68 : f32 to vector<2x256xf32>
    %256 = arith.addf %255, %254 : vector<2x256xf32>
    %257 = arith.divf %255, %256 : vector<2x256xf32>
    %258 = math.tanh %252 : vector<2x256xf32>
    %259 = vector.extract_strided_slice %257 {offsets = [0, 0], sizes = [2, 64], strides = [1, 1]} : vector<2x256xf32> to vector<2x64xf32>
    %260 = vector.extract_strided_slice %257 {offsets = [0, 64], sizes = [2, 64], strides = [1, 1]} : vector<2x256xf32> to vector<2x64xf32>
    %261 = vector.extract_strided_slice %258 {offsets = [0, 128], sizes = [2, 64], strides = [1, 1]} : vector<2x256xf32> to vector<2x64xf32>
    %262 = vector.extract_strided_slice %257 {offsets = [0, 192], sizes = [2, 64], strides = [1, 1]} : vector<2x256xf32> to vector<2x64xf32>
    %263 = arith.mulf %260, %243 : vector<2x64xf32>
    %264 = arith.mulf %259, %261 : vector<2x64xf32>
    %265 = arith.addf %263, %264 : vector<2x64xf32>
    %266 = math.tanh %265 : vector<2x64xf32>
    %267 = arith.mulf %262, %266 : vector<2x64xf32>
    %c0_69 = arith.constant 0 : index
    %c1 = arith.constant 1 : index
    %c0_70 = arith.constant 0 : index
    %268 = vector.load %arg40[%c0_69, %c1, %c0_70] : memref<2x8x64xf32, #tpu.memory_space<vmem>>, vector<2x1x64xf32>
    %269 = vector.shape_cast %268 : vector<2x1x64xf32> to vector<2x64xf32>
    %270 = vector.shape_cast %267 : vector<2x64xf32> to vector<2x1x64xf32>
    tpu.vector_store %arg40[%c0_69, %c1, %c0_70], %270 {strides = array<i32>} : memref<2x8x64xf32, #tpu.memory_space<vmem>>, vector<2x1x64xf32>,
    %271 = vector.extract_strided_slice %222 {offsets = [4, 0], sizes = [2, 256], strides = [1, 1]} : vector<16x256xf32> to vector<2x256xf32>
    %272 = arith.truncf %267 : vector<2x64xf32> to vector<2x64xbf16>
    %cst_71 = arith.constant dense<0.000000e+00> : vector<2x256xf32>
    %273 = tpu.matmul %272, %224, %cst_71 {dimension_numbers = #tpu.dot_dimension_numbers<[1], [0], [0], [1], [0, 0, 1, 1], [], []>} : vector<2x64xbf16>, vector<64x256xbf16>, vector<2x256xf32> -> vector<2x256xf32>
    %274 = arith.addf %271, %273 : vector<2x256xf32>
    %275 = arith.negf %274 : vector<2x256xf32>
    %276 = math.exp %275 : vector<2x256xf32>
    %cst_72 = arith.constant 1.000000e+00 : f32
    %277 = vector.broadcast %cst_72 : f32 to vector<2x256xf32>
    %278 = arith.addf %277, %276 : vector<2x256xf32>
    %279 = arith.divf %277, %278 : vector<2x256xf32>
    %280 = math.tanh %274 : vector<2x256xf32>
    %281 = vector.extract_strided_slice %279 {offsets = [0, 0], sizes = [2, 64], strides = [1, 1]} : vector<2x256xf32> to vector<2x64xf32>
    %282 = vector.extract_strided_slice %279 {offsets = [0, 64], sizes = [2, 64], strides = [1, 1]} : vector<2x256xf32> to vector<2x64xf32>
    %283 = vector.extract_strided_slice %280 {offsets = [0, 128], sizes = [2, 64], strides = [1, 1]} : vector<2x256xf32> to vector<2x64xf32>
    %284 = vector.extract_strided_slice %279 {offsets = [0, 192], sizes = [2, 64], strides = [1, 1]} : vector<2x256xf32> to vector<2x64xf32>
    %285 = arith.mulf %282, %265 : vector<2x64xf32>
    %286 = arith.mulf %281, %283 : vector<2x64xf32>
    %287 = arith.addf %285, %286 : vector<2x64xf32>
    %288 = math.tanh %287 : vector<2x64xf32>
    %289 = arith.mulf %284, %288 : vector<2x64xf32>
    %c0_73 = arith.constant 0 : index
    %c2 = arith.constant 2 : index
    %c0_74 = arith.constant 0 : index
    %290 = vector.load %arg40[%c0_73, %c2, %c0_74] : memref<2x8x64xf32, #tpu.memory_space<vmem>>, vector<2x1x64xf32>
    %291 = vector.shape_cast %290 : vector<2x1x64xf32> to vector<2x64xf32>
    %292 = vector.shape_cast %289 : vector<2x64xf32> to vector<2x1x64xf32>
    tpu.vector_store %arg40[%c0_73, %c2, %c0_74], %292 {strides = array<i32>} : memref<2x8x64xf32, #tpu.memory_space<vmem>>, vector<2x1x64xf32>,
    %293 = vector.extract_strided_slice %222 {offsets = [6, 0], sizes = [2, 256], strides = [1, 1]} : vector<16x256xf32> to vector<2x256xf32>
    %294 = arith.truncf %289 : vector<2x64xf32> to vector<2x64xbf16>
    %cst_75 = arith.constant dense<0.000000e+00> : vector<2x256xf32>
    %295 = tpu.matmul %294, %224, %cst_75 {dimension_numbers = #tpu.dot_dimension_numbers<[1], [0], [0], [1], [0, 0, 1, 1], [], []>} : vector<2x64xbf16>, vector<64x256xbf16>, vector<2x256xf32> -> vector<2x256xf32>
    %296 = arith.addf %293, %295 : vector<2x256xf32>
    %297 = arith.negf %296 : vector<2x256xf32>
    %298 = math.exp %297 : vector<2x256xf32>
    %cst_76 = arith.constant 1.000000e+00 : f32
    %299 = vector.broadcast %cst_76 : f32 to vector<2x256xf32>
    %300 = arith.addf %299, %298 : vector<2x256xf32>
    %301 = arith.divf %299, %300 : vector<2x256xf32>
    %302 = math.tanh %296 : vector<2x256xf32>
    %303 = vector.extract_strided_slice %301 {offsets = [0, 0], sizes = [2, 64], strides = [1, 1]} : vector<2x256xf32> to vector<2x64xf32>
    %304 = vector.extract_strided_slice %301 {offsets = [0, 64], sizes = [2, 64], strides = [1, 1]} : vector<2x256xf32> to vector<2x64xf32>
    %305 = vector.extract_strided_slice %302 {offsets = [0, 128], sizes = [2, 64], strides = [1, 1]} : vector<2x256xf32> to vector<2x64xf32>
    %306 = vector.extract_strided_slice %301 {offsets = [0, 192], sizes = [2, 64], strides = [1, 1]} : vector<2x256xf32> to vector<2x64xf32>
    %307 = arith.mulf %304, %287 : vector<2x64xf32>
    %308 = arith.mulf %303, %305 : vector<2x64xf32>
    %309 = arith.addf %307, %308 : vector<2x64xf32>
    %310 = math.tanh %309 : vector<2x64xf32>
    %311 = arith.mulf %306, %310 : vector<2x64xf32>
    %c0_77 = arith.constant 0 : index
    %c3 = arith.constant 3 : index
    %c0_78 = arith.constant 0 : index
    %312 = vector.load %arg40[%c0_77, %c3, %c0_78] : memref<2x8x64xf32, #tpu.memory_space<vmem>>, vector<2x1x64xf32>
    %313 = vector.shape_cast %312 : vector<2x1x64xf32> to vector<2x64xf32>
    %314 = vector.shape_cast %311 : vector<2x64xf32> to vector<2x1x64xf32>
    tpu.vector_store %arg40[%c0_77, %c3, %c0_78], %314 {strides = array<i32>} : memref<2x8x64xf32, #tpu.memory_space<vmem>>, vector<2x1x64xf32>,
    %315 = vector.extract_strided_slice %222 {offsets = [8, 0], sizes = [2, 256], strides = [1, 1]} : vector<16x256xf32> to vector<2x256xf32>
    %316 = arith.truncf %311 : vector<2x64xf32> to vector<2x64xbf16>
    %cst_79 = arith.constant dense<0.000000e+00> : vector<2x256xf32>
    %317 = tpu.matmul %316, %224, %cst_79 {dimension_numbers = #tpu.dot_dimension_numbers<[1], [0], [0], [1], [0, 0, 1, 1], [], []>} : vector<2x64xbf16>, vector<64x256xbf16>, vector<2x256xf32> -> vector<2x256xf32>
    %318 = arith.addf %315, %317 : vector<2x256xf32>
    %319 = arith.negf %318 : vector<2x256xf32>
    %320 = math.exp %319 : vector<2x256xf32>
    %cst_80 = arith.constant 1.000000e+00 : f32
    %321 = vector.broadcast %cst_80 : f32 to vector<2x256xf32>
    %322 = arith.addf %321, %320 : vector<2x256xf32>
    %323 = arith.divf %321, %322 : vector<2x256xf32>
    %324 = math.tanh %318 : vector<2x256xf32>
    %325 = vector.extract_strided_slice %323 {offsets = [0, 0], sizes = [2, 64], strides = [1, 1]} : vector<2x256xf32> to vector<2x64xf32>
    %326 = vector.extract_strided_slice %323 {offsets = [0, 64], sizes = [2, 64], strides = [1, 1]} : vector<2x256xf32> to vector<2x64xf32>
    %327 = vector.extract_strided_slice %324 {offsets = [0, 128], sizes = [2, 64], strides = [1, 1]} : vector<2x256xf32> to vector<2x64xf32>
    %328 = vector.extract_strided_slice %323 {offsets = [0, 192], sizes = [2, 64], strides = [1, 1]} : vector<2x256xf32> to vector<2x64xf32>
    %329 = arith.mulf %326, %309 : vector<2x64xf32>
    %330 = arith.mulf %325, %327 : vector<2x64xf32>
    %331 = arith.addf %329, %330 : vector<2x64xf32>
    %332 = math.tanh %331 : vector<2x64xf32>
    %333 = arith.mulf %328, %332 : vector<2x64xf32>
    %c0_81 = arith.constant 0 : index
    %c4 = arith.constant 4 : index
    %c0_82 = arith.constant 0 : index
    %334 = vector.load %arg40[%c0_81, %c4, %c0_82] : memref<2x8x64xf32, #tpu.memory_space<vmem>>, vector<2x1x64xf32>
    %335 = vector.shape_cast %334 : vector<2x1x64xf32> to vector<2x64xf32>
    %336 = vector.shape_cast %333 : vector<2x64xf32> to vector<2x1x64xf32>
    tpu.vector_store %arg40[%c0_81, %c4, %c0_82], %336 {strides = array<i32>} : memref<2x8x64xf32, #tpu.memory_space<vmem>>, vector<2x1x64xf32>,
    %337 = vector.extract_strided_slice %222 {offsets = [10, 0], sizes = [2, 256], strides = [1, 1]} : vector<16x256xf32> to vector<2x256xf32>
    %338 = arith.truncf %333 : vector<2x64xf32> to vector<2x64xbf16>
    %cst_83 = arith.constant dense<0.000000e+00> : vector<2x256xf32>
    %339 = tpu.matmul %338, %224, %cst_83 {dimension_numbers = #tpu.dot_dimension_numbers<[1], [0], [0], [1], [0, 0, 1, 1], [], []>} : vector<2x64xbf16>, vector<64x256xbf16>, vector<2x256xf32> -> vector<2x256xf32>
    %340 = arith.addf %337, %339 : vector<2x256xf32>
    %341 = arith.negf %340 : vector<2x256xf32>
    %342 = math.exp %341 : vector<2x256xf32>
    %cst_84 = arith.constant 1.000000e+00 : f32
    %343 = vector.broadcast %cst_84 : f32 to vector<2x256xf32>
    %344 = arith.addf %343, %342 : vector<2x256xf32>
    %345 = arith.divf %343, %344 : vector<2x256xf32>
    %346 = math.tanh %340 : vector<2x256xf32>
    %347 = vector.extract_strided_slice %345 {offsets = [0, 0], sizes = [2, 64], strides = [1, 1]} : vector<2x256xf32> to vector<2x64xf32>
    %348 = vector.extract_strided_slice %345 {offsets = [0, 64], sizes = [2, 64], strides = [1, 1]} : vector<2x256xf32> to vector<2x64xf32>
    %349 = vector.extract_strided_slice %346 {offsets = [0, 128], sizes = [2, 64], strides = [1, 1]} : vector<2x256xf32> to vector<2x64xf32>
    %350 = vector.extract_strided_slice %345 {offsets = [0, 192], sizes = [2, 64], strides = [1, 1]} : vector<2x256xf32> to vector<2x64xf32>
    %351 = arith.mulf %348, %331 : vector<2x64xf32>
    %352 = arith.mulf %347, %349 : vector<2x64xf32>
    %353 = arith.addf %351, %352 : vector<2x64xf32>
    %354 = math.tanh %353 : vector<2x64xf32>
    %355 = arith.mulf %350, %354 : vector<2x64xf32>
    %c0_85 = arith.constant 0 : index
    %c5 = arith.constant 5 : index
    %c0_86 = arith.constant 0 : index
    %356 = vector.load %arg40[%c0_85, %c5, %c0_86] : memref<2x8x64xf32, #tpu.memory_space<vmem>>, vector<2x1x64xf32>
    %357 = vector.shape_cast %356 : vector<2x1x64xf32> to vector<2x64xf32>
    %358 = vector.shape_cast %355 : vector<2x64xf32> to vector<2x1x64xf32>
    tpu.vector_store %arg40[%c0_85, %c5, %c0_86], %358 {strides = array<i32>} : memref<2x8x64xf32, #tpu.memory_space<vmem>>, vector<2x1x64xf32>,
    %359 = vector.extract_strided_slice %222 {offsets = [12, 0], sizes = [2, 256], strides = [1, 1]} : vector<16x256xf32> to vector<2x256xf32>
    %360 = arith.truncf %355 : vector<2x64xf32> to vector<2x64xbf16>
    %cst_87 = arith.constant dense<0.000000e+00> : vector<2x256xf32>
    %361 = tpu.matmul %360, %224, %cst_87 {dimension_numbers = #tpu.dot_dimension_numbers<[1], [0], [0], [1], [0, 0, 1, 1], [], []>} : vector<2x64xbf16>, vector<64x256xbf16>, vector<2x256xf32> -> vector<2x256xf32>
    %362 = arith.addf %359, %361 : vector<2x256xf32>
    %363 = arith.negf %362 : vector<2x256xf32>
    %364 = math.exp %363 : vector<2x256xf32>
    %cst_88 = arith.constant 1.000000e+00 : f32
    %365 = vector.broadcast %cst_88 : f32 to vector<2x256xf32>
    %366 = arith.addf %365, %364 : vector<2x256xf32>
    %367 = arith.divf %365, %366 : vector<2x256xf32>
    %368 = math.tanh %362 : vector<2x256xf32>
    %369 = vector.extract_strided_slice %367 {offsets = [0, 0], sizes = [2, 64], strides = [1, 1]} : vector<2x256xf32> to vector<2x64xf32>
    %370 = vector.extract_strided_slice %367 {offsets = [0, 64], sizes = [2, 64], strides = [1, 1]} : vector<2x256xf32> to vector<2x64xf32>
    %371 = vector.extract_strided_slice %368 {offsets = [0, 128], sizes = [2, 64], strides = [1, 1]} : vector<2x256xf32> to vector<2x64xf32>
    %372 = vector.extract_strided_slice %367 {offsets = [0, 192], sizes = [2, 64], strides = [1, 1]} : vector<2x256xf32> to vector<2x64xf32>
    %373 = arith.mulf %370, %353 : vector<2x64xf32>
    %374 = arith.mulf %369, %371 : vector<2x64xf32>
    %375 = arith.addf %373, %374 : vector<2x64xf32>
    %376 = math.tanh %375 : vector<2x64xf32>
    %377 = arith.mulf %372, %376 : vector<2x64xf32>
    %c0_89 = arith.constant 0 : index
    %c6 = arith.constant 6 : index
    %c0_90 = arith.constant 0 : index
    %378 = vector.load %arg40[%c0_89, %c6, %c0_90] : memref<2x8x64xf32, #tpu.memory_space<vmem>>, vector<2x1x64xf32>
    %379 = vector.shape_cast %378 : vector<2x1x64xf32> to vector<2x64xf32>
    %380 = vector.shape_cast %377 : vector<2x64xf32> to vector<2x1x64xf32>
    tpu.vector_store %arg40[%c0_89, %c6, %c0_90], %380 {strides = array<i32>} : memref<2x8x64xf32, #tpu.memory_space<vmem>>, vector<2x1x64xf32>,
    %381 = vector.extract_strided_slice %222 {offsets = [14, 0], sizes = [2, 256], strides = [1, 1]} : vector<16x256xf32> to vector<2x256xf32>
    %382 = arith.truncf %377 : vector<2x64xf32> to vector<2x64xbf16>
    %cst_91 = arith.constant dense<0.000000e+00> : vector<2x256xf32>
    %383 = tpu.matmul %382, %224, %cst_91 {dimension_numbers = #tpu.dot_dimension_numbers<[1], [0], [0], [1], [0, 0, 1, 1], [], []>} : vector<2x64xbf16>, vector<64x256xbf16>, vector<2x256xf32> -> vector<2x256xf32>
    %384 = arith.addf %381, %383 : vector<2x256xf32>
    %385 = arith.negf %384 : vector<2x256xf32>
    %386 = math.exp %385 : vector<2x256xf32>
    %cst_92 = arith.constant 1.000000e+00 : f32
    %387 = vector.broadcast %cst_92 : f32 to vector<2x256xf32>
    %388 = arith.addf %387, %386 : vector<2x256xf32>
    %389 = arith.divf %387, %388 : vector<2x256xf32>
    %390 = math.tanh %384 : vector<2x256xf32>
    %391 = vector.extract_strided_slice %389 {offsets = [0, 0], sizes = [2, 64], strides = [1, 1]} : vector<2x256xf32> to vector<2x64xf32>
    %392 = vector.extract_strided_slice %389 {offsets = [0, 64], sizes = [2, 64], strides = [1, 1]} : vector<2x256xf32> to vector<2x64xf32>
    %393 = vector.extract_strided_slice %390 {offsets = [0, 128], sizes = [2, 64], strides = [1, 1]} : vector<2x256xf32> to vector<2x64xf32>
    %394 = vector.extract_strided_slice %389 {offsets = [0, 192], sizes = [2, 64], strides = [1, 1]} : vector<2x256xf32> to vector<2x64xf32>
    %395 = arith.mulf %392, %375 : vector<2x64xf32>
    %396 = arith.mulf %391, %393 : vector<2x64xf32>
    %397 = arith.addf %395, %396 : vector<2x64xf32>
    %398 = math.tanh %397 : vector<2x64xf32>
    %399 = arith.mulf %394, %398 : vector<2x64xf32>
    %c0_93 = arith.constant 0 : index
    %c7 = arith.constant 7 : index
    %c0_94 = arith.constant 0 : index
    %400 = vector.load %arg40[%c0_93, %c7, %c0_94] : memref<2x8x64xf32, #tpu.memory_space<vmem>>, vector<2x1x64xf32>
    %401 = vector.shape_cast %400 : vector<2x1x64xf32> to vector<2x64xf32>
    %402 = vector.shape_cast %399 : vector<2x64xf32> to vector<2x1x64xf32>
    tpu.vector_store %arg40[%c0_93, %c7, %c0_94], %402 {strides = array<i32>} : memref<2x8x64xf32, #tpu.memory_space<vmem>>, vector<2x1x64xf32>,
    %c0_95 = arith.constant 0 : index
    %c0_96 = arith.constant 0 : index
    %c0_97 = arith.constant 0 : index
    %403 = vector.load %arg40[%c0_95, %c0_96, %c0_97] : memref<2x8x64xf32, #tpu.memory_space<vmem>>, vector<2x8x64xf32>
    %404 = vector.extract_strided_slice %403 {offsets = [0, 0, 0], sizes = [2, 8, 32], strides = [1, 1, 1]} : vector<2x8x64xf32> to vector<2x8x32xf32>
    %405 = vector.extract_strided_slice %403 {offsets = [0, 0, 32], sizes = [2, 8, 32], strides = [1, 1, 1]} : vector<2x8x64xf32> to vector<2x8x32xf32>
    %c0_98 = arith.constant 0 : index
    %c0_99 = arith.constant 0 : index
    %c0_100 = arith.constant 0 : index
    %406 = vector.load %arg15[%c0_98, %c0_99, %c0_100] : memref<2x8x8xf32, #tpu.memory_space<vmem>>, vector<2x8x8xf32>
    "tpu.trace_start"() <{level = 10 : i32, message = "bts,bsh->bth"}> : () -> ()
    %cst_101 = arith.constant dense<0.000000e+00> : vector<2x8x32xf32>
    %407 = tpu.matmul %406, %405, %cst_101 {dimension_numbers = #tpu.dot_dimension_numbers<[2], [1], [1], [2], [0, 0, 0, 1, 1, 2], [0], [0]>} : vector<2x8x8xf32>, vector<2x8x32xf32>, vector<2x8x32xf32> -> vector<2x8x32xf32>
    "tpu.trace_stop"() : () -> ()
    %408 = tpu.concatenate %404, %407 in 2 : vector<2x8x32xf32>, vector<2x8x32xf32> -> vector<2x8x64xf32>
    %c0_102 = arith.constant 0 : index
    %c0_103 = arith.constant 0 : index
    %409 = vector.load %arg17[%c0_102, %c0_103] : memref<1x64xf32, #tpu.memory_space<vmem>>, vector<1x64xf32>
    %c0_104 = arith.constant 0 : index
    %c0_105 = arith.constant 0 : index
    %410 = vector.load %arg18[%c0_104, %c0_105] : memref<1x64xf32, #tpu.memory_space<vmem>>, vector<1x64xf32>
    %cst_106 = arith.constant dense<0.000000e+00> : vector<2x8xf32>
    %411 = vector.multi_reduction <add>, %408, %cst_106 [2] : vector<2x8x64xf32> to vector<2x8xf32>
    %412 = vector.shape_cast %411 : vector<2x8xf32> to vector<2x8x1xf32>
    %cst_107 = arith.constant 6.400000e+01 : f32
    %413 = vector.broadcast %cst_107 : f32 to vector<2x8x1xf32>
    %414 = arith.divf %412, %413 : vector<2x8x1xf32>
    %415 = vector.broadcast %414 : vector<2x8x1xf32> to vector<2x8x64xf32>
    %416 = arith.subf %408, %415 : vector<2x8x64xf32>
    %417 = arith.mulf %416, %416 : vector<2x8x64xf32>
    %cst_108 = arith.constant dense<0.000000e+00> : vector<2x8xf32>
    %418 = vector.multi_reduction <add>, %417, %cst_108 [2] : vector<2x8x64xf32> to vector<2x8xf32>
    %419 = vector.shape_cast %418 : vector<2x8xf32> to vector<2x8x1xf32>
    %cst_109 = arith.constant 6.400000e+01 : f32
    %420 = vector.broadcast %cst_109 : f32 to vector<2x8x1xf32>
    %421 = arith.divf %419, %420 : vector<2x8x1xf32>
    %422 = vector.broadcast %414 : vector<2x8x1xf32> to vector<2x8x64xf32>
    %423 = arith.subf %408, %422 : vector<2x8x64xf32>
    %cst_110 = arith.constant 9.99999974E-6 : f32
    %424 = vector.broadcast %cst_110 : f32 to vector<2x8x1xf32>
    %425 = arith.addf %421, %424 : vector<2x8x1xf32>
    %426 = math.rsqrt %425 : vector<2x8x1xf32>
    %427 = vector.broadcast %426 : vector<2x8x1xf32> to vector<2x8x64xf32>
    %428 = arith.mulf %423, %427 : vector<2x8x64xf32>
    %429 = vector.shape_cast %409 : vector<1x64xf32> to vector<1x1x64xf32>
    %430 = vector.broadcast %429 : vector<1x1x64xf32> to vector<2x8x64xf32>
    %431 = arith.mulf %428, %430 : vector<2x8x64xf32>
    %432 = vector.shape_cast %410 : vector<1x64xf32> to vector<1x1x64xf32>
    %433 = vector.broadcast %432 : vector<1x1x64xf32> to vector<2x8x64xf32>
    %434 = arith.addf %431, %433 : vector<2x8x64xf32>
    %c0_111 = arith.constant 0 : index
    %c0_112 = arith.constant 0 : index
    %435 = vector.load %arg16[%c0_111, %c0_112] : memref<2x8xf32, #tpu.memory_space<vmem>>, vector<2x8xf32>
    %c0_113 = arith.constant 0 : index
    %c0_114 = arith.constant 0 : index
    %436 = vector.load %arg19[%c0_113, %c0_114] : memref<1x64xf32, #tpu.memory_space<vmem>>, vector<1x64xf32>
    %437 = vector.shape_cast %436 : vector<1x64xf32> to vector<1x1x64xf32>
    %438 = vector.broadcast %437 : vector<1x1x64xf32> to vector<2x8x64xf32>
    %439 = arith.mulf %434, %438 : vector<2x8x64xf32>
    %cst_115 = arith.constant dense<0.000000e+00> : vector<2x8xf32>
    %440 = vector.multi_reduction <add>, %439, %cst_115 [2] : vector<2x8x64xf32> to vector<2x8xf32>
    %c0_116 = arith.constant 0 : index
    %c0_117 = arith.constant 0 : index
    %441 = vector.load %arg20[%c0_116, %c0_117] : memref<1x1xf32, #tpu.memory_space<vmem>>, vector<1x1xf32>
    %442 = vector.broadcast %441 : vector<1x1xf32> to vector<2x8xf32>
    %443 = arith.addf %440, %442 : vector<2x8xf32>
    %cst_118 = arith.constant 0.000000e+00 : f32
    %444 = vector.broadcast %cst_118 : f32 to vector<2x8xf32>
    %445 = arith.cmpf ogt, %435, %444 : vector<2x8xf32>
    %cst_119 = arith.constant -1.000000e+30 : f32
    %446 = vector.broadcast %cst_119 : f32 to vector<2x8xf32>
    %447 = arith.select %445, %443, %446 : vector<2x8xi1>, vector<2x8xf32>
    %cst_120 = arith.constant dense<0xFF800000> : vector<2xf32>
    %448 = vector.multi_reduction <maximumf>, %447, %cst_120 [1] : vector<2x8xf32> to vector<2xf32>
    %449 = vector.shape_cast %448 : vector<2xf32> to vector<2x1xf32>
    %450 = vector.broadcast %449 : vector<2x1xf32> to vector<2x8xf32>
    %451 = arith.subf %447, %450 : vector<2x8xf32>
    %452 = math.exp %451 : vector<2x8xf32>
    %453 = arith.mulf %452, %435 : vector<2x8xf32>
    %cst_121 = arith.constant dense<0.000000e+00> : vector<2xf32>
    %454 = vector.multi_reduction <add>, %453, %cst_121 [1] : vector<2x8xf32> to vector<2xf32>
    %455 = vector.shape_cast %454 : vector<2xf32> to vector<2x1xf32>
    %cst_122 = arith.constant 9.99999968E-21 : f32
    %456 = vector.broadcast %cst_122 : f32 to vector<2x1xf32>
    %457 = arith.maximumf %455, %456 : vector<2x1xf32>
    %458 = vector.broadcast %457 : vector<2x1xf32> to vector<2x8xf32>
    %459 = arith.divf %453, %458 : vector<2x8xf32>
    %460 = vector.shape_cast %459 : vector<2x8xf32> to vector<2x8x1xf32>
    %461 = vector.broadcast %460 : vector<2x8x1xf32> to vector<2x8x64xf32>
    %462 = arith.mulf %461, %434 : vector<2x8x64xf32>
    %cst_123 = arith.constant dense<0.000000e+00> : vector<2x64xf32>
    %463 = vector.multi_reduction <add>, %462, %cst_123 [1] : vector<2x8x64xf32> to vector<2x64xf32>
    %c0_124 = arith.constant 0 : index
    %c0_125 = arith.constant 0 : index
    %464 = vector.load %arg21[%c0_124, %c0_125] : memref<64x32xf32, #tpu.memory_space<vmem>>, vector<64x32xf32>
    %cst_126 = arith.constant dense<0.000000e+00> : vector<2x32xf32>
    %465 = tpu.matmul %463, %464, %cst_126 {dimension_numbers = #tpu.dot_dimension_numbers<[1], [0], [0], [1], [0, 0, 1, 1], [], []>} : vector<2x64xf32>, vector<64x32xf32>, vector<2x32xf32> -> vector<2x32xf32>
    %c0_127 = arith.constant 0 : index
    %c0_128 = arith.constant 0 : index
    %466 = vector.load %arg22[%c0_127, %c0_128] : memref<1x32xf32, #tpu.memory_space<vmem>>, vector<1x32xf32>
    %467 = vector.broadcast %466 : vector<1x32xf32> to vector<2x32xf32>
    %468 = arith.addf %465, %467 : vector<2x32xf32>
    %c0_129 = arith.constant 0 : index
    %c0_130 = arith.constant 0 : index
    %469 = vector.load %arg23[%c0_129, %c0_130] : memref<64x32xf32, #tpu.memory_space<vmem>>, vector<64x32xf32>
    %cst_131 = arith.constant dense<0.000000e+00> : vector<2x32xf32>
    %470 = tpu.matmul %463, %469, %cst_131 {dimension_numbers = #tpu.dot_dimension_numbers<[1], [0], [0], [1], [0, 0, 1, 1], [], []>} : vector<2x64xf32>, vector<64x32xf32>, vector<2x32xf32> -> vector<2x32xf32>
    %c0_132 = arith.constant 0 : index
    %c0_133 = arith.constant 0 : index
    %471 = vector.load %arg24[%c0_132, %c0_133] : memref<1x32xf32, #tpu.memory_space<vmem>>, vector<1x32xf32>
    %472 = vector.broadcast %471 : vector<1x32xf32> to vector<2x32xf32>
    %473 = arith.addf %470, %472 : vector<2x32xf32>
    %c0_134 = arith.constant 0 : index
    %c0_135 = arith.constant 0 : index
    %474 = vector.load %arg25[%c0_134, %c0_135] : memref<2x32xf32, #tpu.memory_space<vmem>>, vector<2x32xf32>
    %cst_136 = arith.constant 5.000000e-01 : f32
    %475 = vector.broadcast %cst_136 : f32 to vector<2x32xf32>
    %476 = arith.mulf %475, %473 : vector<2x32xf32>
    %477 = math.exp %476 : vector<2x32xf32>
    %478 = arith.mulf %474, %477 : vector<2x32xf32>
    %479 = arith.addf %468, %478 : vector<2x32xf32>
    %c0_137 = arith.constant 0 : index
    %c0_138 = arith.constant 0 : index
    %480 = vector.load %arg26[%c0_137, %c0_138] : memref<2x16xf32, #tpu.memory_space<vmem>>, vector<2x16xf32>
    %481 = tpu.concatenate %214, %479, %480 in 1 : vector<2x32xf32>, vector<2x32xf32>, vector<2x16xf32> -> vector<2x80xf32>
    %c0_139 = arith.constant 0 : index
    %c0_140 = arith.constant 0 : index
    %482 = vector.load %arg27[%c0_139, %c0_140] : memref<80x128xf32, #tpu.memory_space<vmem>>, vector<80x128xf32>
    %cst_141 = arith.constant dense<0.000000e+00> : vector<2x128xf32>
    %483 = tpu.matmul %481, %482, %cst_141 {dimension_numbers = #tpu.dot_dimension_numbers<[1], [0], [0], [1], [0, 0, 1, 1], [], []>} : vector<2x80xf32>, vector<80x128xf32>, vector<2x128xf32> -> vector<2x128xf32>
    %c0_142 = arith.constant 0 : index
    %c0_143 = arith.constant 0 : index
    %484 = vector.load %arg28[%c0_142, %c0_143] : memref<1x128xf32, #tpu.memory_space<vmem>>, vector<1x128xf32>
    %485 = vector.broadcast %484 : vector<1x128xf32> to vector<2x128xf32>
    %486 = arith.addf %483, %485 : vector<2x128xf32>
    %c0_144 = arith.constant 0 : index
    %c0_145 = arith.constant 0 : index
    %487 = vector.load %arg29[%c0_144, %c0_145] : memref<1x128xf32, #tpu.memory_space<vmem>>, vector<1x128xf32>
    %c0_146 = arith.constant 0 : index
    %c0_147 = arith.constant 0 : index
    %488 = vector.load %arg30[%c0_146, %c0_147] : memref<1x128xf32, #tpu.memory_space<vmem>>, vector<1x128xf32>
    %cst_148 = arith.constant dense<0.000000e+00> : vector<2xf32>
    %489 = vector.multi_reduction <add>, %486, %cst_148 [1] : vector<2x128xf32> to vector<2xf32>
    %490 = vector.shape_cast %489 : vector<2xf32> to vector<2x1xf32>
    %cst_149 = arith.constant 1.280000e+02 : f32
    %491 = vector.broadcast %cst_149 : f32 to vector<2x1xf32>
    %492 = arith.divf %490, %491 : vector<2x1xf32>
    %493 = vector.broadcast %492 : vector<2x1xf32> to vector<2x128xf32>
    %494 = arith.subf %486, %493 : vector<2x128xf32>
    %495 = arith.mulf %494, %494 : vector<2x128xf32>
    %cst_150 = arith.constant dense<0.000000e+00> : vector<2xf32>
    %496 = vector.multi_reduction <add>, %495, %cst_150 [1] : vector<2x128xf32> to vector<2xf32>
    %497 = vector.shape_cast %496 : vector<2xf32> to vector<2x1xf32>
    %cst_151 = arith.constant 1.280000e+02 : f32
    %498 = vector.broadcast %cst_151 : f32 to vector<2x1xf32>
    %499 = arith.divf %497, %498 : vector<2x1xf32>
    %500 = vector.broadcast %492 : vector<2x1xf32> to vector<2x128xf32>
    %501 = arith.subf %486, %500 : vector<2x128xf32>
    %cst_152 = arith.constant 9.99999974E-6 : f32
    %502 = vector.broadcast %cst_152 : f32 to vector<2x1xf32>
    %503 = arith.addf %499, %502 : vector<2x1xf32>
    %504 = math.rsqrt %503 : vector<2x1xf32>
    %505 = vector.broadcast %504 : vector<2x1xf32> to vector<2x128xf32>
    %506 = arith.mulf %501, %505 : vector<2x128xf32>
    %507 = vector.broadcast %487 : vector<1x128xf32> to vector<2x128xf32>
    %508 = arith.mulf %506, %507 : vector<2x128xf32>
    %509 = vector.broadcast %488 : vector<1x128xf32> to vector<2x128xf32>
    %510 = arith.addf %508, %509 : vector<2x128xf32>
    %cst_153 = arith.constant 0.000000e+00 : f32
    %511 = vector.broadcast %cst_153 : f32 to vector<2x128xf32>
    %512 = arith.maximumf %510, %511 : vector<2x128xf32>
    %c0_154 = arith.constant 0 : index
    %c0_155 = arith.constant 0 : index
    %513 = vector.load %arg31[%c0_154, %c0_155] : memref<128x32xf32, #tpu.memory_space<vmem>>, vector<128x32xf32>
    %cst_156 = arith.constant dense<0.000000e+00> : vector<2x32xf32>
    %514 = tpu.matmul %512, %513, %cst_156 {dimension_numbers = #tpu.dot_dimension_numbers<[1], [0], [0], [1], [0, 0, 1, 1], [], []>} : vector<2x128xf32>, vector<128x32xf32>, vector<2x32xf32> -> vector<2x32xf32>
    %c0_157 = arith.constant 0 : index
    %c0_158 = arith.constant 0 : index
    %515 = vector.load %arg32[%c0_157, %c0_158] : memref<1x32xf32, #tpu.memory_space<vmem>>, vector<1x32xf32>
    %516 = vector.broadcast %515 : vector<1x32xf32> to vector<2x32xf32>
    %517 = arith.addf %514, %516 : vector<2x32xf32>
    %c0_159 = arith.constant 0 : index
    %c0_160 = arith.constant 0 : index
    %518 = vector.load %arg33[%c0_159, %c0_160] : memref<1x32xf32, #tpu.memory_space<vmem>>, vector<1x32xf32>
    %c0_161 = arith.constant 0 : index
    %c0_162 = arith.constant 0 : index
    %519 = vector.load %arg34[%c0_161, %c0_162] : memref<1x32xf32, #tpu.memory_space<vmem>>, vector<1x32xf32>
    %cst_163 = arith.constant dense<0.000000e+00> : vector<2xf32>
    %520 = vector.multi_reduction <add>, %517, %cst_163 [1] : vector<2x32xf32> to vector<2xf32>
    %521 = vector.shape_cast %520 : vector<2xf32> to vector<2x1xf32>
    %cst_164 = arith.constant 3.200000e+01 : f32
    %522 = vector.broadcast %cst_164 : f32 to vector<2x1xf32>
    %523 = arith.divf %521, %522 : vector<2x1xf32>
    %524 = vector.broadcast %523 : vector<2x1xf32> to vector<2x32xf32>
    %525 = arith.subf %517, %524 : vector<2x32xf32>
    %526 = arith.mulf %525, %525 : vector<2x32xf32>
    %cst_165 = arith.constant dense<0.000000e+00> : vector<2xf32>
    %527 = vector.multi_reduction <add>, %526, %cst_165 [1] : vector<2x32xf32> to vector<2xf32>
    %528 = vector.shape_cast %527 : vector<2xf32> to vector<2x1xf32>
    %cst_166 = arith.constant 3.200000e+01 : f32
    %529 = vector.broadcast %cst_166 : f32 to vector<2x1xf32>
    %530 = arith.divf %528, %529 : vector<2x1xf32>
    %531 = vector.broadcast %523 : vector<2x1xf32> to vector<2x32xf32>
    %532 = arith.subf %517, %531 : vector<2x32xf32>
    %cst_167 = arith.constant 9.99999974E-6 : f32
    %533 = vector.broadcast %cst_167 : f32 to vector<2x1xf32>
    %534 = arith.addf %530, %533 : vector<2x1xf32>
    %535 = math.rsqrt %534 : vector<2x1xf32>
    %536 = vector.broadcast %535 : vector<2x1xf32> to vector<2x32xf32>
    %537 = arith.mulf %532, %536 : vector<2x32xf32>
    %538 = vector.broadcast %518 : vector<1x32xf32> to vector<2x32xf32>
    %539 = arith.mulf %537, %538 : vector<2x32xf32>
    %540 = vector.broadcast %519 : vector<1x32xf32> to vector<2x32xf32>
    %541 = arith.addf %539, %540 : vector<2x32xf32>
    %cst_168 = arith.constant 0.000000e+00 : f32
    %542 = vector.broadcast %cst_168 : f32 to vector<2x32xf32>
    %543 = arith.maximumf %541, %542 : vector<2x32xf32>
    %c0_169 = arith.constant 0 : index
    %c0_170 = arith.constant 0 : index
    %544 = vector.load %arg35[%c0_169, %c0_170] : memref<32x32xf32, #tpu.memory_space<vmem>>, vector<32x32xf32>
    %cst_171 = arith.constant dense<0.000000e+00> : vector<2x32xf32>
    %545 = tpu.matmul %543, %544, %cst_171 {dimension_numbers = #tpu.dot_dimension_numbers<[1], [0], [0], [1], [0, 0, 1, 1], [], []>} : vector<2x32xf32>, vector<32x32xf32>, vector<2x32xf32> -> vector<2x32xf32>
    %c0_172 = arith.constant 0 : index
    %c0_173 = arith.constant 0 : index
    %546 = vector.load %arg36[%c0_172, %c0_173] : memref<1x32xf32, #tpu.memory_space<vmem>>, vector<1x32xf32>
    %547 = vector.broadcast %546 : vector<1x32xf32> to vector<2x32xf32>
    %548 = arith.addf %545, %547 : vector<2x32xf32>
    %c0_174 = arith.constant 0 : index
    %c0_175 = arith.constant 0 : index
    %549 = vector.load %arg37[%c0_174, %c0_175] : memref<32x8xf32, #tpu.memory_space<vmem>>, vector<32x8xf32>
    %cst_176 = arith.constant dense<0.000000e+00> : vector<2x8xf32>
    %550 = tpu.matmul %543, %549, %cst_176 {dimension_numbers = #tpu.dot_dimension_numbers<[1], [0], [0], [1], [0, 0, 1, 1], [], []>} : vector<2x32xf32>, vector<32x8xf32>, vector<2x8xf32> -> vector<2x8xf32>
    %c0_177 = arith.constant 0 : index
    %c0_178 = arith.constant 0 : index
    %551 = vector.load %arg38[%c0_177, %c0_178] : memref<1x8xf32, #tpu.memory_space<vmem>>, vector<1x8xf32>
    %552 = vector.broadcast %551 : vector<1x8xf32> to vector<2x8xf32>
    %553 = arith.addf %550, %552 : vector<2x8xf32>
    %cst_179 = arith.constant 0.000000e+00 : f32
    %554 = vector.broadcast %cst_179 : f32 to vector<2x88xf32>
    %555 = tpu.concatenate %203, %208, %468, %473, %548, %553, %554 in 1 : vector<2x32xf32>, vector<2x32xf32>, vector<2x32xf32>, vector<2x32xf32>, vector<2x32xf32>, vector<2x8xf32>, vector<2x88xf32> -> vector<2x256xf32>
    %c0_180 = arith.constant 0 : index
    %c0_181 = arith.constant 0 : index
    %556 = vector.load %arg39[%c0_180, %c0_181] : memref<2x256xf32, #tpu.memory_space<vmem>>, vector<2x256xf32>
    tpu.vector_store %arg39[%c0_180, %c0_181], %555 {strides = array<i32>} : memref<2x256xf32, #tpu.memory_space<vmem>>, vector<2x256xf32>,
    return
  }
}

</mosaic_0001>

<bundles_post_ra>
// kernel: tomnet_forward.1
= control target key start
LH: loop header
LB: loop body
LE: loop exit
PB: predicated region body
PF: predicated region fallthrough
CT: control target
= control target key end

     0   :  { %v3830_v0 = vmov 0.0   ;;  %s3831_s3 = smov 1   ;;  %s3832_s7 = smov 2   ;;  %vm3833_vm0 = vmmov 0   ;;  %v3834_v1 = vmov 0   ;;  %vm187_vm1 = vcmask 130048   ;;  %s4635_s0 = inlined_call_operand.smem [shape: u32[40], index: -1, kind: input, shape index: {}] }
   0x1   :  { %3304 = vmatprep.subr.bf16.mxu1 %v3830_v0  ;;  %s3084_s6 = sld [smem:[%s4635_s0 + %s3831_s3]]   ;;  %3308 = vmatprep.mubr.msk.bf16.mxu1 %vm3833_vm0, %v3830_v0  ;;  %s3835_s14 = smov 3   ;;  %vm271_vm2 = vcmask 261120   ;;  %vm886_vm3 = vcmask 1044224   ;;  %vm907_vm4 = vcmask 1040384   ;;  %vm1179_vm5 = vcmask 523264  }
   0x2   :  { %s3085_s10 = sld [smem:[%s4635_s0 + %s3832_s7]]   ;;  %3651 = vset.pattern.permute.xlu0 %v3834_v1  ;;  %s3836_s18 = smov 64   ;;  %vm1284_vm6 = vcmask 516096   ;;  %vm2146_vm7 = vcmask 64512   ;;  %vm2393_vm8 = vcmask 1041409   ;;  %vm2397_vm10 = vcmask 58368  }
   0x3   :  { %s3893_s13 = sld [smem:[%s4635_s0]]   ;;  %s3837_s19 = smov 32   ;;  %vm2650_vm11 = vcmask 654336   ;;  %vm2726_vm12 = vcmask 1041408   ;;  %vm2851_vm13 = vcmask 254976   ;;  %vm3066_vm14 = vcmask 326656  }
   0x4   :  { %s3086_s17 = sld [smem:[%s4635_s0 + %s3835_s14]]   ;;  %s3838_s20 = smov 4   ;;  %vm3063_vm15 = vcmask 785408  }
   0x5   :  { %s3087_s23 = sld [smem:[%s4635_s0 + %s3838_s20]]   ;;  %s3839_s24 = smov 96  }
   0x6   :  { %s3840_s25 = smov 5   ;;  %s3842_s29 = smov 8  }
   0x7   :  { %v177_v2 = vld [vmem:[%s3084_s6] sm:$0xff]  ;;  %v178_v3 = vld [vmem:[%s3084_s6 + $0x8] sm:$0xff]  ;;  %s3088_s28 = sld [smem:[%s4635_s0 + %s3840_s25]]   ;;  %s3843_s3 = smov 6  }
   0x8   :  { %v265_v4 = vld [vmem:[%s3085_s10] sm:$0xff]  ;;  %v179_v5 = vpack.c.bf16 %v178_v3, %v177_v2  ;;  %v266_v6 = vld [vmem:[%s3085_s10 + $0x8] sm:$0xff]  ;;  %v267_v13 = vld [vmem:[%s3085_s10 + $0x10] sm:$0xff]  ;;  %s3091_s2 = sld [smem:[%s4635_s0 + %s3842_s29]]   ;;  %s3844_s7 = smov 13  }
   0x9   :  { %v165_v7 = vld [vmem:[%s3893_s13] sm:$0xff]  ;;  %v166_v8 = vld [vmem:[%s3893_s13 + $0x8] sm:$0xff]  ;;  %v3898_v9 = vpack.c.bf16 %v266_v6, %v265_v4  ;;  %v167_v11 = vld [vmem:[%s3893_s13 + $0x10] sm:$0xff]  ;;  %s3089_s6 = sld [smem:[%s4635_s0 + %s3843_s3]]   ;;  %s3845_s11 = smov 12  }
   0xa   :  { %v173_v10 = vpack.c.bf16 %v166_v8, %v165_v7  ;;  %v168_v12 = vld [vmem:[%s3893_s13 + $0x18] sm:$0xff]  ;;  %3294 = vmatprep.subr.bf16.mxu0 %v179_v5  ;;  %v3925_v17 = vld [vmem:[%s3086_s17] ss:$0 sm:$0xff]  ;;  %v170_v60 = vld [vmem:[%s3893_s13 + $0x28] sm:$0xff]  ;;  %s4066_s14 = sld [smem:[%s4635_s0 + %s3845_s11]]   ;;  %s3846_s15 = smov 11  }
   0xb   :  { %v174_v14 = vpack.c.bf16 %v168_v12, %v167_v11  ;;  %v268_v15 = vld [vmem:[%s3085_s10 + $0x18] sm:$0xff]  ;;  %3305 = vmatpush3.bf16.msra.mxu1 %v3898_v9  ;;  %3295 = vmatpush3.bf16.msra.mxu0 %v179_v5  ;;  %v169_v59 = vld [vmem:[%s3893_s13 + $0x20] sm:$0xff]  ;;  %v171_v61 = vld [vmem:[%s3893_s13 + $0x30] sm:$0xff]  ;;  %s4054_s10 = sld [smem:[%s4635_s0 + %s3844_s7]]   ;;  %s3847_s21 = smov 14  }
   0xc   :  { %v3903_v16 = vpack.c.bf16 %v268_v15, %v267_v13  ;;  %3296 = vmatprep.mubr.msk.bf16.mxu0 %vm187_vm1, %v173_v10  ;;  %3306 = vmatprep.subr.bf16.mxu1 %v3830_v0  ;;  %v175_v62 = vpack.c.bf16 %v170_v60, %v169_v59  ;;  %v172_v63 = vld [vmem:[%s3893_s13 + $0x38] sm:$0xff]  ;;  %s3094_s20 = sld [smem:[%s4635_s0 + %s3846_s15]]   ;;  %s3849_s26 = smov 15  }
   0xd   :  { %3320 = vmatprep.subr.bf16.mxu0 %v3830_v0  ;;  %v176_v2 = vpack.c.bf16 %v172_v63, %v171_v61  ;;  %s3097_s25 = sld [smem:[%s4635_s0 + %s3847_s21]]   ;;  %s3850_s30 = smov 20  }
   0xe   :  { %3297 = vmatmul.mubr.msk.bf16.vlgmr.msra.gmra.mrb[0].mxu0 %vm187_vm1, %v174_v14  ;;  %s3098_s29 = sld [smem:[%s4635_s0 + %s3849_s26]]   ;;  %s3851_s4 = smov 17  }
   0xf   :  { %3307 = vmatpush3.bf16.msra.mxu1 %v3903_v16  ;;  %3321 = vmatpush3.bf16.msra.mxu0 %v3898_v9  ;;  %s3103_s3 = sld [smem:[%s4635_s0 + %s3850_s30]]   ;;  %s3852_s8 = smov 18  }
  0x10   :  { %3312 = vmatprep.subr.bf16.mxu1 %v3830_v0  ;;  %3322 = vmatprep.subr.bf16.mxu0 %v3830_v0  ;;  %s3100_s7 = sld [smem:[%s4635_s0 + %s3851_s4]]   ;;  %s3853_s12 = smov 19  }
  0x11   :  { %3300 = vmatprep.mubr.msk.bf16.mxu0 %vm187_vm1, %v175_v62  ;;  %s3101_s11 = sld [smem:[%s4635_s0 + %s3852_s8]]   ;;  %s3854_s16 = smov 16  }
  0x12   :  { %3309 = vmatmul.mubr.bf16.vlgmr.msra.gmra.mrb[0].mxu1 %v3834_v1  ;;  %s3102_s15 = sld [smem:[%s4635_s0 + %s3853_s12]]   ;;  %s3855_s22 = smov 21  }
  0x13   :  { %3313 = vmatpush3.bf16.msra.mxu1 %v3898_v9  ;;  %3316 = vmatprep.mubr.msk.bf16.mxu1 %vm3833_vm0, %v3830_v0  ;;  %s3099_s21 = sld [smem:[%s4635_s0 + %s3854_s16]]   ;;  %s3856_s27 = smov 23  }
  0x14   :  { %3314 = vmatprep.subr.bf16.mxu1 %v3830_v0  ;;  %3323 = vmatpush3.bf16.msra.mxu0 %v3903_v16  ;;  %s4447_s26 = sld [smem:[%s4635_s0 + %s3855_s22]]   ;;  %s3857_s1 = smov 27  }
  0x15   :  { %3336 = vmatprep.subr.bf16.mxu0 %v3830_v0  ;;  %s4452_s30 = sld [smem:[%s4635_s0 + %s3856_s27]]   ;;  %s3858_s5 = smov 24  }
  0x16   :  { %3301 = vmatmul.mubr.msk.bf16.gmra.mrb[4].mxu0 %vm187_vm1, %v176_v2  ;;  %s4495_s4 = sld [smem:[%s4635_s0 + %s3857_s1]]   ;;  %s3859_s9 = smov 22  }
  0x17   :  { %3315 = vmatpush3.bf16.msra.mxu1 %v3903_v16  ;;  %3324 = vmatprep.mubr.msk.bf16.mxu0 %vm3833_vm0, %v3830_v0  ;;  %s3107_s8 = sld [smem:[%s4635_s0 + %s3858_s5]]   ;;  %s3860_s13 = smov 25  }
  0x18   :  { %3328 = vmatprep.subr.bf16.mxu1 %v3830_v0  ;;  %s3105_s12 = sld [smem:[%s4635_s0 + %s3859_s9]]   ;;  %s3861_s17 = smov 26  }
  0x19   :  { %s3108_s16 = sld [smem:[%s4635_s0 + %s3860_s13]]  }
  0x1a   :  { %s3109_s22 = sld [smem:[%s4635_s0 + %s3861_s17]]  }
  0xe1   :  { %v3927_v18 = vpop.f32.mrb[0].mxu0 }
  0xe2   :  { %v234_v19 = vpop.f32.mrb[1].mxu0  ;;  %v243_v13 = vadd.f32 %v3927_v18, %v3925_v17 }
  0xe3   :  { %v235_v20 = vadd.f32 %v3925_v17, %v234_v19  ;;  %v3930_v21 = vpop.f32.mrb[2].mxu0 }
  0xe4   :  { %v237_v22 = vpop.f32.mrb[3].mxu0 }
  0xe5   :  { %v309_v23 = vpop.f32.mrb[0].mxu1  ;;  %v238_v43 = vadd.f32 %v3925_v17, %v237_v22 }
  0xe6   :  { %v315_v24 = vadd.f32 %v309_v23, %v235_v20  ;;  %v3310_v25 = vpop.f32.mrb[1].mxu1 }
  0xe7   :  { %v312_v26 = vpop.f32.mrb[2].mxu1 }
  0xe8   :  { %3652 = vtanh.f32 %v315_v24  ;;  %v3311_v27 = vpop.f32.mrb[3].mxu1  ;;  %v3128_v29 = vmul.f32 -1.442695, %v315_v24 }
  0xe9   :  { %v3956_v7 = vpop.f32.mrb[4].mxu0 }
  0xea   :  { %3654 = vpow2.f32 %v3128_v29  ;;  %v3958_v8 = vpop.f32.mrb[5].mxu0 }
  0xeb   :  { %v3960_v10 = vpop.f32.mrb[6].mxu0 }
  0xec   :  { %v3962_v11 = vpop.f32.mrb[7].mxu0 }
  0xf2   :  { %v3653_v28 = vpop.eup %3652 }
  0xf3   :  { %325 = vrot.lane.b32.xlu0 %v3653_v28, %s3836_s18 }
  0xf4   :  { %v3655_v30 = vpop.eup %3654 }
  0xf5   :  { %v319_v31 = vadd.f32 1.0, %v3655_v30 }
  0xf7   :  { %3656 = vrcp.f32 %v319_v31 }
 0x101   :  { %v3657_v32 = vpop.eup %3656 }
 0x102   :  { %v323_v35 = vmul.f32 0.0, %v3657_v32 }
 0x165   :  { %v326_v33 = vpop.permute.xlu0 %325 }
 0x166   :  { %v328_v34 = vmul.f32 %v3657_v32, %v326_v33 }
 0x168   :  { %330 = vrot.lane.b32.xlu0 %v328_v34, %s3837_s19 }
 0x1da   :  { %v331_v36 = vpop.permute.xlu0 %330 }
 0x1db   :  { %v333_v37 = vadd.f32 %v331_v36, %v323_v35 }
 0x1dd   :  { %3658 = vtanh.f32 %v333_v37 }
 0x1e7   :  { %v3659_v38 = vpop.eup %3658 }
 0x1e8   :  { %336 = vrot.lane.b32.xlu1 %v3659_v38, %s3836_s18 }
 0x25a   :  { %v337_v39 = vpop.permute.xlu1 %336 }
 0x25b   :  { %v339_v40 = vmul.f32 %v3657_v32, %v337_v39 }
 0x25d   :  { %v340_v41 = vpack.c.bf16 %v339_v40, %v339_v40 }
 0x25f   :  { %342 = vrot.lane.b32.xlu1 %v340_v41, %s3837_s19 }
 0x2d1   :  { %v343_v42 = vpop.permute.xlu1 %342 }
 0x2d2   :  { %3317 = vmatmul.mubr.msk.bf16.vlgmr.msra.gmra.mrb[4].mxu1 %vm271_vm2, %v343_v42 }
 0x2d3   :  { %3329 = vmatpush3.bf16.msra.mxu1 %v3898_v9  ;;  %3332 = vmatprep.mubr.msk.bf16.mxu1 %vm3833_vm0, %v3830_v0 }
 0x2d4   :  { %3330 = vmatprep.subr.bf16.mxu1 %v3830_v0 }
 0x2d7   :  { %3331 = vmatpush3.bf16.msra.mxu1 %v3903_v16 }
 0x2d8   :  { %3344 = vmatprep.subr.bf16.mxu1 %v3830_v0 }
 0x3a5   :  { %v381_v44 = vpop.f32.mrb[4].mxu1 }
 0x3a6   :  { %v387_v45 = vadd.f32 %v381_v44, %v238_v43  ;;  %v3318_v46 = vpop.f32.mrb[5].mxu1 }
 0x3a7   :  { %v384_v47 = vpop.f32.mrb[6].mxu1 }
 0x3a8   :  { %3660 = vtanh.f32 %v387_v45  ;;  %v3319_v48 = vpop.f32.mrb[7].mxu1  ;;  %v3130_v50 = vmul.f32 -1.442695, %v387_v45 }
 0x3aa   :  { %3662 = vpow2.f32 %v3130_v50 }
 0x3b2   :  { %v3661_v49 = vpop.eup %3660 }
 0x3b3   :  { %397 = vrot.lane.b32.xlu0 %v3661_v49, %s3836_s18 }
 0x3b4   :  { %v3663_v51 = vpop.eup %3662 }
 0x3b5   :  { %v391_v52 = vadd.f32 1.0, %v3663_v51 }
 0x3b7   :  { %3664 = vrcp.f32 %v391_v52 }
 0x3c1   :  { %v3665_v53 = vpop.eup %3664 }
 0x3c2   :  { %v395_v56 = vmul.f32 %v3665_v53, %v333_v37  ;;  %v246_v37 = vadd.f32 %v3930_v21, %v3925_v17 }
 0x425   :  { %v398_v54 = vpop.permute.xlu0 %397 }
 0x426   :  { %v400_v55 = vmul.f32 %v3665_v53, %v398_v54 }
 0x428   :  { %402 = vrot.lane.b32.xlu1 %v400_v55, %s3837_s19 }
 0x49a   :  { %v403_v57 = vpop.permute.xlu1 %402 }
 0x49b   :  { %v405_v58 = vadd.f32 %v403_v57, %v395_v56  ;;  %v251_v57 = vadd.f32 %v3925_v17, %v3958_v8 }
 0x49d   :  { %3666 = vtanh.f32 %v405_v58 }
 0x4a7   :  { %v3667_v3 = vpop.eup %3666 }
 0x4a8   :  { %408 = vrot.lane.b32.xlu0 %v3667_v3, %s3836_s18 }
 0x51a   :  { %v409_v4 = vpop.permute.xlu0 %408 }
 0x51b   :  { %v411_v5 = vmul.f32 %v3665_v53, %v409_v4 }
 0x51d   :  { %v412_v6 = vpack.c.bf16 %v411_v5, %v411_v5 }
 0x51f   :  { %414 = vrot.lane.b32.xlu1 %v412_v6, %s3837_s19 }
 0x591   :  { %v415_v12 = vpop.permute.xlu1 %414 }
 0x592   :  { %3325 = vmatmul.mubr.msk.bf16.vlgmr.msra.gmra.mrb[8].mxu0 %vm271_vm2, %v415_v12 }
 0x593   :  { %3337 = vmatpush3.bf16.msra.mxu0 %v3898_v9  ;;  %3340 = vmatprep.mubr.msk.bf16.mxu0 %vm3833_vm0, %v3830_v0 }
 0x594   :  { %3338 = vmatprep.subr.bf16.mxu0 %v3830_v0 }
 0x597   :  { %3339 = vmatpush3.bf16.msra.mxu0 %v3903_v16 }
 0x598   :  { %3352 = vmatprep.subr.bf16.mxu0 %v3830_v0 }
 0x665   :  { %v453_v14 = vpop.f32.mrb[8].mxu0 }
 0x666   :  { %v459_v15 = vadd.f32 %v453_v14, %v243_v13  ;;  %v3326_v19 = vpop.f32.mrb[9].mxu0 }
 0x667   :  { %v456_v20 = vpop.f32.mrb[10].mxu0 }
 0x668   :  { %3668 = vtanh.f32 %v459_v15  ;;  %v3327_v22 = vpop.f32.mrb[11].mxu0  ;;  %v3132_v24 = vmul.f32 -1.442695, %v459_v15 }
 0x66a   :  { %3670 = vpow2.f32 %v3132_v24  ;;  %v254_v24 = vadd.f32 %v3925_v17, %v3962_v11 }
 0x672   :  { %v3669_v23 = vpop.eup %3668 }
 0x673   :  { %469 = vrot.lane.b32.xlu0 %v3669_v23, %s3836_s18 }
 0x674   :  { %v3671_v25 = vpop.eup %3670 }
 0x675   :  { %v463_v26 = vadd.f32 1.0, %v3671_v25 }
 0x677   :  { %3672 = vrcp.f32 %v463_v26 }
 0x681   :  { %v3673_v27 = vpop.eup %3672 }
 0x682   :  { %v467_v18 = vmul.f32 %v3673_v27, %v405_v58 }
 0x6e5   :  { %v470_v28 = vpop.permute.xlu0 %469 }
 0x6e6   :  { %v472_v29 = vmul.f32 %v3673_v27, %v470_v28 }
 0x6e8   :  { %474 = vrot.lane.b32.xlu1 %v472_v29, %s3837_s19 }
 0x75a   :  { %v475_v30 = vpop.permute.xlu1 %474 }
 0x75b   :  { %v477_v31 = vadd.f32 %v475_v30, %v467_v18 }
 0x75d   :  { %3674 = vtanh.f32 %v477_v31 }
 0x767   :  { %v3675_v32 = vpop.eup %3674 }
 0x768   :  { %480 = vrot.lane.b32.xlu0 %v3675_v32, %s3836_s18 }
 0x7da   :  { %v481_v33 = vpop.permute.xlu0 %480 }
 0x7db   :  { %v483_v34 = vmul.f32 %v3673_v27, %v481_v33 }
 0x7dd   :  { %v484_v35 = vpack.c.bf16 %v483_v34, %v483_v34 }
 0x7df   :  { %486 = vrot.lane.b32.xlu1 %v484_v35, %s3837_s19 }
 0x851   :  { %v487_v36 = vpop.permute.xlu1 %486 }
 0x852   :  { %3333 = vmatmul.mubr.msk.bf16.vlgmr.msra.gmra.mrb[8].mxu1 %vm271_vm2, %v487_v36 }
 0x853   :  { %3345 = vmatpush3.bf16.msra.mxu1 %v3898_v9  ;;  %3348 = vmatprep.mubr.msk.bf16.mxu1 %vm3833_vm0, %v3830_v0 }
 0x854   :  { %3346 = vmatprep.subr.bf16.mxu1 %v3830_v0 }
 0x857   :  { %3347 = vmatpush3.bf16.msra.mxu1 %v3903_v16 }
 0x858   :  { %3360 = vmatprep.subr.bf16.mxu1 %v3830_v0 }
 0x925   :  { %v525_v38 = vpop.f32.mrb[8].mxu1 }
 0x926   :  { %v531_v39 = vadd.f32 %v525_v38, %v246_v37  ;;  %v3334_v40 = vpop.f32.mrb[9].mxu1 }
 0x927   :  { %v528_v41 = vpop.f32.mrb[10].mxu1 }
 0x928   :  { %3676 = vtanh.f32 %v531_v39  ;;  %v3335_v42 = vpop.f32.mrb[11].mxu1  ;;  %v3134_v44 = vmul.f32 -1.442695, %v531_v39  ;;  %v259_v41 = vadd.f32 %v3956_v7, %v3925_v17 }
 0x92a   :  { %3678 = vpow2.f32 %v3134_v44 }
 0x932   :  { %v3677_v43 = vpop.eup %3676 }
 0x933   :  { %541 = vrot.lane.b32.xlu0 %v3677_v43, %s3836_s18 }
 0x934   :  { %v3679_v45 = vpop.eup %3678 }
 0x935   :  { %v535_v46 = vadd.f32 1.0, %v3679_v45 }
 0x937   :  { %3680 = vrcp.f32 %v535_v46 }
 0x941   :  { %v3681_v47 = vpop.eup %3680 }
 0x942   :  { %v539_v21 = vmul.f32 %v3681_v47, %v477_v31 }
 0x9a5   :  { %v542_v48 = vpop.permute.xlu0 %541 }
 0x9a6   :  { %v544_v49 = vmul.f32 %v3681_v47, %v542_v48 }
 0x9a8   :  { %546 = vrot.lane.b32.xlu1 %v544_v49, %s3837_s19 }
 0xa1a   :  { %v547_v50 = vpop.permute.xlu1 %546 }
 0xa1b   :  { %v549_v51 = vadd.f32 %v547_v50, %v539_v21 }
 0xa1d   :  { %3682 = vtanh.f32 %v549_v51 }
 0xa27   :  { %v3683_v52 = vpop.eup %3682 }
 0xa28   :  { %552 = vrot.lane.b32.xlu0 %v3683_v52, %s3836_s18 }
 0xa9a   :  { %v553_v53 = vpop.permute.xlu0 %552 }
 0xa9b   :  { %v555_v54 = vmul.f32 %v3681_v47, %v553_v53 }
 0xa9d   :  { %v556_v55 = vpack.c.bf16 %v555_v54, %v555_v54 }
 0xa9f   :  { %558 = vrot.lane.b32.xlu1 %v556_v55, %s3837_s19 }
 0xb11   :  { %v559_v56 = vpop.permute.xlu1 %558 }
 0xb12   :  { %3341 = vmatmul.mubr.msk.bf16.vlgmr.msra.gmra.mrb[12].mxu0 %vm271_vm2, %v559_v56 }
 0xb13   :  { %3353 = vmatpush3.bf16.msra.mxu0 %v3898_v9  ;;  %3356 = vmatprep.mubr.msk.bf16.mxu0 %vm3833_vm0, %v3830_v0 }
 0xb14   :  { %3354 = vmatprep.subr.bf16.mxu0 %v3830_v0 }
 0xb17   :  { %3355 = vmatpush3.bf16.msra.mxu0 %v3903_v16 }
 0xbe5   :  { %v597_v58 = vpop.f32.mrb[12].mxu0 }
 0xbe6   :  { %v603_v59 = vadd.f32 %v597_v58, %v251_v57  ;;  %v3342_v60 = vpop.f32.mrb[13].mxu0 }
 0xbe7   :  { %v600_v61 = vpop.f32.mrb[14].mxu0  ;;  %v262_v60 = vadd.f32 %v3960_v10, %v3925_v17 }
 0xbe8   :  { %3684 = vtanh.f32 %v603_v59  ;;  %v3343_v62 = vpop.f32.mrb[15].mxu0  ;;  %v3136_v2 = vmul.f32 -1.442695, %v603_v59 }
 0xbea   :  { %3686 = vpow2.f32 %v3136_v2 }
 0xbf2   :  { %v3685_v63 = vpop.eup %3684 }
 0xbf3   :  { %613 = vrot.lane.b32.xlu0 %v3685_v63, %s3836_s18 }
 0xbf4   :  { %v3687_v3 = vpop.eup %3686 }
 0xbf5   :  { %v607_v4 = vadd.f32 1.0, %v3687_v3 }
 0xbf7   :  { %3688 = vrcp.f32 %v607_v4 }
 0xc01   :  { %v3689_v5 = vpop.eup %3688 }
 0xc02   :  { %v611_v8 = vmul.f32 %v3689_v5, %v549_v51 }
 0xc65   :  { %v614_v6 = vpop.permute.xlu0 %613 }
 0xc66   :  { %v616_v12 = vmul.f32 %v3689_v5, %v614_v6 }
 0xc68   :  { %618 = vrot.lane.b32.xlu1 %v616_v12, %s3837_s19 }
 0xcda   :  { %v619_v13 = vpop.permute.xlu1 %618 }
 0xcdb   :  { %v621_v14 = vadd.f32 %v619_v13, %v611_v8 }
 0xcdd   :  { %3690 = vtanh.f32 %v621_v14 }
 0xce7   :  { %v3691_v15 = vpop.eup %3690 }
 0xce8   :  { %624 = vrot.lane.b32.xlu0 %v3691_v15, %s3836_s18 }
 0xd5a   :  { %v625_v19 = vpop.permute.xlu0 %624 }
 0xd5b   :  { %v627_v20 = vmul.f32 %v3689_v5, %v625_v19 }
 0xd5d   :  { %v628_v22 = vpack.c.bf16 %v627_v20, %v627_v20 }
 0xd5f   :  { %630 = vrot.lane.b32.xlu1 %v628_v22, %s3837_s19 }
 0xdd1   :  { %v631_v23 = vpop.permute.xlu1 %630 }
 0xdd2   :  { %3349 = vmatmul.mubr.msk.bf16.vlgmr.msra.gmra.mrb[12].mxu1 %vm271_vm2, %v631_v23 }
 0xdd3   :  { %3361 = vmatpush3.bf16.msra.mxu1 %v3898_v9  ;;  %3364 = vmatprep.mubr.msk.bf16.mxu1 %vm3833_vm0, %v3830_v0 }
 0xdd4   :  { %3362 = vmatprep.subr.bf16.mxu1 %v3830_v0 }
 0xdd7   :  { %3363 = vmatpush3.bf16.msra.mxu1 %v3903_v16 }
 0xea5   :  { %v669_v25 = vpop.f32.mrb[12].mxu1 }
 0xea6   :  { %v675_v26 = vadd.f32 %v669_v25, %v254_v24  ;;  %v3350_v27 = vpop.f32.mrb[13].mxu1 }
 0xea7   :  { %v672_v28 = vpop.f32.mrb[14].mxu1  ;;  %v3143_v27 = vld [vmem:[%s3087_s23] ss:$0 sm:$0xff]  ;;  %s3862_s23 = smov 9  }
 0xea8   :  { %3692 = vtanh.f32 %v675_v26  ;;  %v3351_v29 = vpop.f32.mrb[15].mxu1  ;;  %v3138_v9 = vmul.f32 -1.442695, %v675_v26  ;;  %s3092_s27 = sld [smem:[%s4635_s0 + %s3862_s23]]  }
 0xeaa   :  { %3694 = vpow2.f32 %v3138_v9 }
 0xeb2   :  { %v3693_v18 = vpop.eup %3692 }
 0xeb3   :  { %685 = vrot.lane.b32.xlu0 %v3693_v18, %s3836_s18 }
 0xeb4   :  { %v3695_v30 = vpop.eup %3694 }
 0xeb5   :  { %v679_v31 = vadd.f32 1.0, %v3695_v30  ;;  %v3144_v30 = vld [vmem:[%s3088_s28] ss:$0 sm:$0xff]  ;;  %s3863_s28 = smov 10  }
 0xeb6   :  { %s3093_s1 = sld [smem:[%s4635_s0 + %s3863_s28]]   ;;  %s3869_s28 = smov 35  }
 0xeb7   :  { %3696 = vrcp.f32 %v679_v31  ;;  %v3841_v31 = vmov 0.0|0.0  }
 0xeb8   :  { %3524 = vmatprep.subr.bf16.mxu1 %v3841_v31  ;;  %3518 = vmatprep.subr.bf16.mxu0 %v3841_v31 }
 0xec1   :  { %v3697_v32 = vpop.eup %3696 }
 0xec2   :  { %v683_v11 = vmul.f32 %v3697_v32, %v621_v14 }
 0xf25   :  { %v686_v33 = vpop.permute.xlu0 %685 }
 0xf26   :  { %v688_v16 = vmul.f32 %v3697_v32, %v686_v33  ;;  %v996_v33 = vld [vmem:[%s3091_s2 + $0x8] sm:$0xff] }
 0xf28   :  { %690 = vrot.lane.b32.xlu1 %v688_v16, %s3837_s19  ;;  %v909_v16 = vld [vmem:[%s3089_s6] sm:$0xff] }
 0xf9a   :  { %v691_v34 = vpop.permute.xlu1 %690 }
 0xf9b   :  { %v693_v35 = vadd.f32 %v691_v34, %v683_v11  ;;  %v910_v34 = vld [vmem:[%s3089_s6 + $0x8] sm:$0xff] }
 0xf9d   :  { %3698 = vtanh.f32 %v693_v35 }
 0xfa7   :  { %v3699_v36 = vpop.eup %3698 }
 0xfa8   :  { %696 = vrot.lane.b32.xlu0 %v3699_v36, %s3836_s18  ;;  %v998_v36 = vld [vmem:[%s3091_s2 + $0x18] sm:$0xff] }
0x101a   :  { %v697_v37 = vpop.permute.xlu0 %696 }
0x101b   :  { %v699_v38 = vmul.f32 %v3697_v32, %v697_v37  ;;  %v995_v32 = vld [vmem:[%s3091_s2] sm:$0xff]  ;;  %v3519_v37 = vpack.c.bf16 %v910_v34, %v909_v16  ;;  %v1166_v16 = vld [vmem:[%s4054_s10 + $0x58] sm:$0xff] }
0x101c   :  { %v3525_v11 = vpack.c.bf16 %v996_v33, %v995_v32  ;;  %v1164_v33 = vld [vmem:[%s4054_s10 + $0x48] sm:$0xff] }
0x101d   :  { %v700_v39 = vpack.c.bf16 %v699_v38, %v699_v38  ;;  %v911_v38 = vld [vmem:[%s3089_s6 + $0x10] sm:$0xff] }
0x101f   :  { %702 = vrot.lane.b32.xlu1 %v700_v39, %s3837_s19  ;;  %v912_v39 = vld [vmem:[%s3089_s6 + $0x18] sm:$0xff]  ;;  %s3865_s6 = smov 28  }
0x1020   :  { %s3111_s9 = sld [smem:[%s4635_s0 + %s3865_s6]]  }
0x1091   :  { %v703_v40 = vpop.permute.xlu1 %702 }
0x1092   :  { %3357 = vmatmul.mubr.msk.bf16.vlgmr.msra.gmra.mrb[16].mxu0 %vm271_vm2, %v703_v40  ;;  %v1156_v40 = vld [vmem:[%s4054_s10 + $0x8] sm:$0xff] }
0x1093   :  { %3376 = vmatprep.mubr.msk.f32.mxu0 %vm3833_vm0, %v3830_v0  ;;  %3520 = vmatpush3.bf16.msra.mxu0 %v3519_v37  ;;  %v4098_v37 = vpack.c.bf16 %v1166_v16, %v1164_v33 }
0x1094   :  { %3521 = vmatprep.subr.bf16.mxu0 %v3841_v31 }
0x1165   :  { %v741_v42 = vpop.f32.mrb[16].mxu0 }
0x1166   :  { %v747_v43 = vadd.f32 %v741_v42, %v259_v41  ;;  %v3358_v44 = vpop.f32.mrb[17].mxu0  ;;  %v1158_v42 = vld [vmem:[%s4054_s10 + $0x18] sm:$0xff] }
0x1167   :  { %v744_v45 = vpop.f32.mrb[18].mxu0  ;;  %v4059_v44 = vpack.c.bf16 %v1158_v42, %v1156_v40  ;;  %v1168_v40 = vld [vmem:[%s4054_s10 + $0x68] sm:$0xff] }
0x1168   :  { %3700 = vtanh.f32 %v747_v43  ;;  %v3359_v46 = vpop.f32.mrb[19].mxu0  ;;  %v3140_v48 = vmul.f32 -1.442695, %v747_v43  ;;  %v3522_v43 = vpack.c.bf16 %v912_v39, %v911_v38  ;;  %v1163_v38 = vld [vmem:[%s4054_s10 + $0x40] sm:$0xff]  ;;  %v1165_v39 = vld [vmem:[%s4054_s10 + $0x50] sm:$0xff] }
0x116a   :  { %3702 = vpow2.f32 %v3140_v48  ;;  %3523 = vmatpush3.bf16.msra.mxu0 %v3522_v43  ;;  %v4107_v43 = vpack.c.bf16 %v1165_v39, %v1163_v38 }
0x1172   :  { %v3701_v47 = vpop.eup %3700 }
0x1173   :  { %757 = vrot.lane.b32.xlu0 %v3701_v47, %s3836_s18 }
0x1174   :  { %v3703_v49 = vpop.eup %3702 }
0x1175   :  { %v751_v21 = vadd.f32 1.0, %v3703_v49 }
0x1177   :  { %3704 = vrcp.f32 %v751_v21 }
0x1181   :  { %v3705_v50 = vpop.eup %3704 }
0x1182   :  { %v755_v7 = vmul.f32 %v3705_v50, %v693_v35  ;;  %v997_v35 = vld [vmem:[%s3091_s2 + $0x10] sm:$0xff]  ;;  %s3864_s2 = smov 7  }
0x1183   :  { %v3528_v41 = vpack.c.bf16 %v998_v36, %v997_v35  ;;  %v1082_v35 = vld [vmem:[%s3094_s20] sm:$0xff]  ;;  %v1083_v36 = vld [vmem:[%s3094_s20 + $0x8] sm:$0xff]  ;;  %s3090_s5 = sld [smem:[%s4635_s0 + %s3864_s2]]   ;;  %s3868_s20 = smov 30  }
0x1184   :  { %v1084_v42 = vpack.c.bf16 %v1083_v36, %v1082_v35  ;;  %s3113_s23 = sld [smem:[%s4635_s0 + %s3868_s20]]   ;;  %s3870_s2 = smov 33  }
0x11e5   :  { %v758_v51 = vpop.permute.xlu0 %757 }
0x11e6   :  { %v760_v52 = vmul.f32 %v3705_v50, %v758_v51 }
0x11e8   :  { %762 = vrot.lane.b32.xlu1 %v760_v52, %s3837_s19 }
0x125a   :  { %v763_v53 = vpop.permute.xlu1 %762 }
0x125b   :  { %v765_v54 = vadd.f32 %v763_v53, %v755_v7 }
0x125d   :  { %3706 = vtanh.f32 %v765_v54 }
0x1267   :  { %v3707_v55 = vpop.eup %3706 }
0x1268   :  { %768 = vrot.lane.b32.xlu0 %v3707_v55, %s3836_s18 }
0x12da   :  { %v769_v56 = vpop.permute.xlu0 %768 }
0x12db   :  { %v771_v57 = vmul.f32 %v3705_v50, %v769_v56 }
0x12dd   :  { %v772_v58 = vpack.c.bf16 %v771_v57, %v771_v57 }
0x12df   :  { %774 = vrot.lane.b32.xlu1 %v772_v58, %s3837_s19 }
0x1351   :  { %v775_v59 = vpop.permute.xlu1 %774 }
0x1352   :  { %3365 = vmatmul.mubr.msk.bf16.vlgmr.msra.gmra.mrb[16].mxu1 %vm271_vm2, %v775_v59 }
0x1353   :  { %3387 = vmatprep.mubr.msk.f32.mxu1 %vm3833_vm0, %v3830_v0  ;;  %3526 = vmatpush3.bf16.msra.mxu1 %v3525_v11 }
0x1354   :  { %3527 = vmatprep.subr.bf16.mxu1 %v3841_v31 }
0x1357   :  { %3529 = vmatpush3.bf16.msra.mxu1 %v3528_v41  ;;  %v1170_v41 = vld [vmem:[%s4054_s10 + $0x78] sm:$0xff] }
0x1358   :  { %1182 = vmatprep.subr.bf16.mxu1 %v4059_v44 }
0x1425   :  { %v813_v61 = vpop.f32.mrb[16].mxu1 }
0x1426   :  { %v819_v62 = vadd.f32 %v813_v61, %v262_v60  ;;  %v3366_v63 = vpop.f32.mrb[17].mxu1  ;;  %v1086_v60 = vld [vmem:[%s4066_s14 + $0x8] sm:$0xff]  ;;  %v1088_v61 = vld [vmem:[%s4066_s14 + $0x18] sm:$0xff] }
0x1427   :  { %v816_v2 = vpop.f32.mrb[18].mxu1 }
0x1428   :  { %3708 = vtanh.f32 %v819_v62  ;;  %v3367_v3 = vpop.f32.mrb[19].mxu1  ;;  %v3142_v5 = vmul.f32 -1.442695, %v819_v62  ;;  %v1094_v62 = vpack.c.bf16 %v1088_v61, %v1086_v60 }
0x142a   :  { %3710 = vpow2.f32 %v3142_v5  ;;  %1112 = vmatprep.subr.bf16.mxu0 %v1094_v62 }
0x1432   :  { %v3709_v4 = vpop.eup %3708 }
0x1433   :  { %829 = vrot.lane.b32.xlu0 %v3709_v4, %s3836_s18 }
0x1434   :  { %v3711_v6 = vpop.eup %3710 }
0x1435   :  { %v823_v12 = vadd.f32 1.0, %v3711_v6 }
0x1437   :  { %3712 = vrcp.f32 %v823_v12 }
0x1441   :  { %v3713_v8 = vpop.eup %3712 }
0x1442   :  { %v827_v17 = vmul.f32 %v3713_v8, %v765_v54 }
0x14a5   :  { %v830_v13 = vpop.permute.xlu0 %829 }
0x14a6   :  { %v832_v14 = vmul.f32 %v3713_v8, %v830_v13 }
0x14a8   :  { %834 = vrot.lane.b32.xlu1 %v832_v14, %s3837_s19 }
0x151a   :  { %v835_v10 = vpop.permute.xlu1 %834 }
0x151b   :  { %v837_v15 = vadd.f32 %v835_v10, %v827_v17  ;;  %v1155_v17 = vld [vmem:[%s4054_s10] sm:$0xff]  ;;  %v1157_v10 = vld [vmem:[%s4054_s10 + $0x10] sm:$0xff] }
0x151d   :  { %3714 = vtanh.f32 %v837_v15  ;;  %v1085_v15 = vld [vmem:[%s4066_s14] sm:$0xff] }
0x1527   :  { %v3715_v19 = vpop.eup %3714 }
0x1528   :  { %840 = vrot.lane.b32.xlu0 %v3715_v19, %s3836_s18  ;;  %v1087_v19 = vld [vmem:[%s4066_s14 + $0x10] sm:$0xff] }
0x159a   :  { %v841_v20 = vpop.permute.xlu0 %840 }
0x159b   :  { %v843_v22 = vmul.f32 %v3713_v8, %v841_v20  ;;  %v1160_v20 = vld [vmem:[%s4054_s10 + $0x28] sm:$0xff] }
0x159d   :  { %847 = vrot.lane.b32.xlu1 %v843_v22, %s3837_s19 }
0x160f   :  { %v848_v23 = vpop.permute.xlu1 %847 }
0x1610   :  { %v850_v24 = vsel %vm271_vm2, %v848_v23, 0.0  ;;  %v1090_v23 = vld [vmem:[%s4066_s14 + $0x28] sm:$0xff] }
0x1611   :  { %851 = vadd.xlane.f32.xlu0 %v850_v24  ;;  %v1092_v24 = vld [vmem:[%s4066_s14 + $0x38] sm:$0xff] }
0x1627   :  { %873 = vrot.lane.b32.xlu0 %v3143_v27, %s3839_s24  ;;  %v1159_v27 = vld [vmem:[%s4054_s10 + $0x20] sm:$0xff] }
0x169e   :  { %v852_v25 = vpop.xlane.xlu0 %851 }
0x169f   :  { %v854_v26 = vmul.f32 0.03125, %v852_v25  ;;  %v4082_v25 = vpack.c.bf16 %v1157_v10, %v1155_v17 }
0x16a1   :  { %v855_v28 = vsub.f32 %v843_v22, %v854_v26  ;;  %v1162_v22 = vld [vmem:[%s4054_s10 + $0x38] sm:$0xff]  ;;  %v1093_v26 = vpack.c.bf16 %v1087_v19, %v1085_v15 }
0x16a2   :  { %v874_v49 = vpop.permute.xlu0 %873 }
0x16a3   :  { %v856_v29 = vmul.f32 %v855_v28, %v855_v28 }
0x16a5   :  { %858 = vrot.lane.b32.xlu1 %v856_v29, %s3837_s19  ;;  %v1161_v29 = vld [vmem:[%s4054_s10 + $0x30] sm:$0xff] }
0x16a6   :  { %v4095_v11 = vpack.c.bf16 %v1161_v29, %v1159_v27 }
0x1717   :  { %v859_v18 = vpop.permute.xlu1 %858 }
0x1718   :  { %v861_v9 = vsel %vm271_vm2, %v859_v18, 0.0  ;;  %v1096_v18 = vpack.c.bf16 %v1092_v24, %v1090_v23 }
0x1719   :  { %862 = vadd.xlane.f32.xlu1 %v861_v9  ;;  %v1089_v9 = vld [vmem:[%s4066_s14 + $0x20] sm:$0xff] }
0x172a   :  { %882 = vrot.lane.b32.xlu1 %v3144_v30, %s3839_s24  ;;  %v1091_v30 = vld [vmem:[%s4066_s14 + $0x30] sm:$0xff]  ;;  %s3867_s14 = smov 29  }
0x172b   :  { %v1095_v34 = vpack.c.bf16 %v1091_v30, %v1089_v9  ;;  %s3112_s17 = sld [smem:[%s4635_s0 + %s3867_s14]]  }
0x17a6   :  { %v863_v45 = vpop.xlane.xlu1 %862 }
0x17a7   :  { %v864_v46 = vmul.f32 0.03125, %v863_v45  ;;  %v4110_v45 = vpack.c.bf16 %v1170_v41, %v1168_v40 }
0x17a9   :  { %v865_v47 = vadd.f32 1e-05, %v864_v46  ;;  %v1167_v46 = vld [vmem:[%s4054_s10 + $0x60] sm:$0xff] }
0x17aa   :  { %v883_v50 = vpop.permute.xlu1 %882 }
0x17ab   :  { %3716 = vrsqrt.f32 %v865_v47  ;;  %v1169_v47 = vld [vmem:[%s4054_s10 + $0x70] sm:$0xff]  ;;  %s3866_s10 = smov 31  }
0x17ac   :  { %s4560_s13 = sld [smem:[%s4635_s0 + %s3866_s10]]  }
0x17b5   :  { %v3717_v48 = vpop.eup %3716 }
0x17b6   :  { %v867_v21 = vmul.f32 %v3717_v48, %v855_v28  ;;  %v4085_v28 = vpack.c.bf16 %v1162_v22, %v1160_v20  ;;  %v4117_v48 = vpack.c.bf16 %v1169_v47, %v1167_v46 }
0x17b8   :  { %v876_v51 = vmul.f32 %v874_v49, %v867_v21  ;;  %v1099_v49 = vlaneseq }
0x17ba   :  { %v885_v52 = vadd.f32 %v883_v50, %v876_v51  ;;  %v4145_v21 = vshrl.u32 %v1099_v49, 7 }
0x17bc   :  { %v887_v7 = vsel %vm886_vm3, %v885_v52, 0.0  ;;  %v897_v53 = vrot.slane %v885_v52, 4 }
0x17bd   :  { %v888_v54 = vrot.slane %v887_v7, 4 }
0x17be   :  { %v899_v55 = vsel %vm886_vm3, %v897_v53, 0.0  ;;  %v4152_v53 = vsub.s32 0, %v4145_v21 }
0x17bf   :  { %v889_v56 = vadd.f32 %v888_v54, %v887_v7  ;;  %v900_v57 = vrot.slane %v899_v55, 4  ;;  %v1097_v54 = vld [vmem:[%s3097_s25] sm:$0x3] }
0x17c1   :  { %v890_v58 = vrot.slane %v889_v56, 2  ;;  %v901_v59 = vadd.f32 %v900_v57, %v899_v55  ;;  %v1105_v55 = vsub.s32 1, %v4145_v21 }
0x17c3   :  { %v891_v63 = vadd.f32 %v890_v58, %v889_v56  ;;  %v902_v2 = vrot.slane %v901_v59, 2  ;;  %v1102_v56 = vrot.slane %v1097_v54, %v4152_v53  ;;  %v1106_v58 = vrot.slane %v1097_v54, %v1105_v55 }
0x17c5   :  { %v892_v3 = vrot.slane %v891_v63, 1  ;;  %v903_v4 = vadd.f32 %v902_v2, %v901_v59 }
0x17c7   :  { %v893_v5 = vadd.f32 %v892_v3, %v891_v63  ;;  %v904_v6 = vrot.slane %v903_v4, 1 }
0x17c9   :  { %v905_v12 = vadd.f32 %v904_v6, %v903_v4  ;;  %v895_v8 = vmul.f32 0.25, %v893_v5 }
0x17cb   :  { %v906_v13 = vmul.f32 0.25, %v905_v12 }
0x17cd   :  { %v908_v14 = vsel %vm907_vm4, %v895_v8, %v906_v13 }
0x17ce   :  { %921 = vrot.lane.b32.xlu0 %v908_v14, %s3837_s19 }
0x1840   :  { %v922_v32 = vpop.permute.xlu0 %921 }
0x1841   :  { %3377 = vmatmul.mubr.msk.f32.vlgmr.msra.gmra.mrb[20].mxu0 %vm271_vm2, %v922_v32  ;;  %3388 = vmatmul.mubr.msk.f32.vlgmr.msra.gmra.mrb[20].mxu1 %vm271_vm2, %v922_v32 }
0x1842   :  { %1183 = vmatpush1.bf16.msra.mxu1 %v4082_v25  ;;  %1113 = vmatpush1.bf16.msra.mxu0 %v1093_v26 }
0x1843   :  { %1184 = vmatprep.subr.bf16.mxu1 %v4085_v28  ;;  %1114 = vmatprep.subr.bf16.mxu0 %v1096_v18 }
0x1844   :  { %1144 = vmatprep.mubr.bf16.mxu0 %v3834_v1  ;;  %1214 = vmatprep.mubr.bf16.mxu1 %v3834_v1 }
0x1846   :  { %1185 = vmatpush1.bf16.msra.mxu1 %v4095_v11  ;;  %1115 = vmatpush1.bf16.msra.mxu0 %v1095_v34 }
0x1847   :  { %1186 = vmatprep.subr.bf16.mxu1 %v4098_v37  ;;  %1294 = vmatprep.subr.bf16.mxu0 %v4059_v44 }
0x1849   :  { %3149 = vmatmul.mubr.msk.bf16.vlgmr.msra.gmra.mrb[24].mxu0 %vm271_vm2, %v1084_v42 }
0x184a   :  { %1187 = vmatpush1.bf16.msra.mxu1 %v4107_v43  ;;  %1295 = vmatpush1.bf16.msra.mxu0 %v4082_v25 }
0x184b   :  { %1188 = vmatprep.subr.bf16.mxu1 %v4110_v45  ;;  %1296 = vmatprep.subr.bf16.mxu0 %v4085_v28 }
0x184c   :  { %1326 = vmatprep.mubr.bf16.mxu0 %v3834_v1 }
0x184e   :  { %1189 = vmatpush1.bf16.msra.mxu1 %v4117_v48  ;;  %1297 = vmatpush1.bf16.msra.mxu0 %v4095_v11 }
0x184f   :  { %1298 = vmatprep.subr.bf16.mxu0 %v4098_v37  ;;  %1417 = vmatprep.subr.bf16.mxu1 %v4059_v44 }
0x1851   :  { %1215 = vmatmul.mubr.bf16.vlgmr.msra.gmra.mrb[24].mxu1 %v3834_v1 }
0x1852   :  { %1299 = vmatpush1.bf16.msra.mxu0 %v4107_v43  ;;  %1418 = vmatpush1.bf16.msra.mxu1 %v4082_v25 }
0x1853   :  { %1300 = vmatprep.subr.bf16.mxu0 %v4110_v45  ;;  %1419 = vmatprep.subr.bf16.mxu1 %v4085_v28 }
0x1854   :  { %1449 = vmatprep.mubr.bf16.mxu1 %v3834_v1 }
0x1856   :  { %1301 = vmatpush1.bf16.msra.mxu0 %v4117_v48  ;;  %1420 = vmatpush1.bf16.msra.mxu1 %v4095_v11 }
0x1857   :  { %1421 = vmatprep.subr.bf16.mxu1 %v4098_v37  ;;  %1539 = vmatprep.subr.bf16.mxu0 %v4059_v44 }
0x185a   :  { %1422 = vmatpush1.bf16.msra.mxu1 %v4107_v43 }
0x185b   :  { %1423 = vmatprep.subr.bf16.mxu1 %v4110_v45 }
0x185e   :  { %1424 = vmatpush1.bf16.msra.mxu1 %v4117_v48 }
0x185f   :  { %1663 = vmatprep.subr.bf16.mxu1 %v4059_v44 }
0x1914   :  { %v4147_v50 = vpop.f32.mrb[20].mxu0  ;;  %v4149_v51 = vpop.f32.mrb[20].mxu1 }
0x1915   :  { %v3378_v52 = vpop.f32.mrb[21].mxu0  ;;  %v3389_v7 = vpop.f32.mrb[21].mxu1 }
0x191c   :  { %v1146_v57 = vpop.f32.mrb[24].mxu0 }
0x191d   :  { %v1148_v59 = vpop.f32.mrb[25].mxu0  ;;  %v4162_v2 = vadd.f32 %v1146_v57, %v1102_v56 }
0x191e   :  { %v1150_v60 = vpop.f32.mrb[26].mxu0  ;;  %v4165_v13 = vadd.f32 %v1148_v59, %v1106_v58 }
0x191f   :  { %v4158_v61 = vadd.f32 %v1150_v60, %v1102_v56  ;;  %v1152_v62 = vpop.f32.mrb[27].mxu0 }
0x1920   :  { %v4160_v63 = vadd.f32 %v1152_v62, %v1106_v58 }
0x1924   :  { %v1216_v3 = vpop.f32.mrb[24].mxu1 }
0x1925   :  { %v1223_v4 = vadd.f32 %v1216_v3, %v4162_v2  ;;  %v1218_v5 = vpop.f32.mrb[25].mxu1 }
0x1926   :  { %v1220_v6 = vpop.f32.mrb[26].mxu1  ;;  %v1224_v14 = vadd.f32 %v1218_v5, %v4165_v13 }
0x1927   :  { %v3150_v12 = vmul.f32 -1.442695, %v1223_v4  ;;  %v1221_v8 = vpop.f32.mrb[27].mxu1 }
0x1928   :  { %v3151_v22 = vmul.f32 -1.442695, %v1224_v14 }
0x1929   :  { %3718 = vpow2.f32 %v3150_v12 }
0x192a   :  { %3720 = vtanh.f32 %v1224_v14 }
0x1933   :  { %v3719_v17 = vpop.eup %3718 }
0x1934   :  { %v1231_v10 = vadd.f32 1.0, %v3719_v17  ;;  %v3721_v15 = vpop.eup %3720 }
0x1936   :  { %3722 = vrcp.f32 %v1231_v10 }
0x1937   :  { %3724 = vpow2.f32 %v3151_v22 }
0x1940   :  { %v3723_v19 = vpop.eup %3722 }
0x1941   :  { %v1239_v20 = vmul.f32 %v3723_v19, %v3721_v15  ;;  %v3725_v23 = vpop.eup %3724  ;;  %v1238_v26 = vmul.f32 0.0, %v3723_v19 }
0x1942   :  { %v1232_v24 = vadd.f32 1.0, %v3725_v23 }
0x1943   :  { %1241 = vrot.lane.b32.xlu0 %v1239_v20, %s3836_s18 }
0x1944   :  { %3726 = vrcp.f32 %v1232_v24 }
0x194e   :  { %v3727_v18 = vpop.eup %3726 }
0x19b5   :  { %v1242_v27 = vpop.permute.xlu0 %1241 }
0x19b6   :  { %v1244_v29 = vadd.f32 %v1242_v27, %v1238_v26 }
0x19b8   :  { %3728 = vtanh.f32 %v1244_v29  ;;  %v1357_v7 = vrot.slane %v1244_v29, 6 }
0x19c2   :  { %v3729_v9 = vpop.eup %3728 }
0x19c3   :  { %v4169_v30 = vmul.f32 %v3729_v9, %v3727_v18 }
0x19c5   :  { %v1287_v32 = vpack.c.bf16 %v4169_v30, %v4169_v30 }
0x19c7   :  { %1289 = vrot.lane.b32.xlu1 %v1287_v32, %s3836_s18 }
0x1a39   :  { %v1290_v33 = vpop.permute.xlu1 %1289 }
0x1a3a   :  { %3152 = vmatmul.mubr.msk.bf16.vlgmr.msra.gmra.mrb[28].mxu0 %vm1179_vm5, %v1290_v33 }
0x1a3b   :  { %1540 = vmatpush1.bf16.msra.mxu0 %v4082_v25  ;;  %1571 = vmatprep.mubr.bf16.mxu0 %v3834_v1 }
0x1a3c   :  { %1541 = vmatprep.subr.bf16.mxu0 %v4085_v28 }
0x1a3f   :  { %1542 = vmatpush1.bf16.msra.mxu0 %v4095_v11 }
0x1a40   :  { %1543 = vmatprep.subr.bf16.mxu0 %v4098_v37 }
0x1a43   :  { %1544 = vmatpush1.bf16.msra.mxu0 %v4107_v43 }
0x1a44   :  { %1545 = vmatprep.subr.bf16.mxu0 %v4110_v45 }
0x1a47   :  { %1546 = vmatpush1.bf16.msra.mxu0 %v4117_v48 }
0x1a48   :  { %1777 = vmatprep.subr.bf16.mxu0 %v4059_v44 }
0x1b0d   :  { %v1328_v16 = vpop.f32.mrb[28].mxu0 }
0x1b0e   :  { %v1337_v34 = vrot.slane %v1328_v16, 6  ;;  %v1330_v35 = vpop.f32.mrb[29].mxu0 }
0x1b0f   :  { %v1332_v36 = vpop.f32.mrb[30].mxu0  ;;  %v1338_v41 = vrot.slane %v1330_v35, 6 }
0x1b10   :  { %v1341_v38 = vadd.f32 %v1337_v34, %v4162_v2  ;;  %v1333_v39 = vpop.f32.mrb[31].mxu0 }
0x1b11   :  { %v1342_v42 = vadd.f32 %v1338_v41, %v4165_v13 }
0x1b12   :  { %v3153_v40 = vmul.f32 -1.442695, %v1341_v38 }
0x1b13   :  { %v3154_v58 = vmul.f32 -1.442695, %v1342_v42 }
0x1b14   :  { %3730 = vpow2.f32 %v3153_v40 }
0x1b15   :  { %3732 = vtanh.f32 %v1342_v42 }
0x1b1e   :  { %v3731_v46 = vpop.eup %3730 }
0x1b1f   :  { %v1349_v47 = vadd.f32 1.0, %v3731_v46  ;;  %v3733_v52 = vpop.eup %3732 }
0x1b21   :  { %3734 = vrcp.f32 %v1349_v47 }
0x1b22   :  { %3736 = vpow2.f32 %v3154_v58 }
0x1b2b   :  { %v3735_v54 = vpop.eup %3734 }
0x1b2c   :  { %v1360_v56 = vmul.f32 %v3735_v54, %v3733_v52  ;;  %v1359_v57 = vmul.f32 %v3735_v54, %v1357_v7  ;;  %v3737_v59 = vpop.eup %3736 }
0x1b2d   :  { %v1350_v60 = vadd.f32 1.0, %v3737_v59 }
0x1b2e   :  { %1362 = vrot.lane.b32.xlu0 %v1360_v56, %s3836_s18 }
0x1b2f   :  { %3738 = vrcp.f32 %v1350_v60 }
0x1b39   :  { %v3739_v4 = vpop.eup %3738 }
0x1ba0   :  { %v1363_v62 = vpop.permute.xlu0 %1362 }
0x1ba1   :  { %v1365_v3 = vadd.f32 %v1363_v62, %v1359_v57 }
0x1ba3   :  { %3740 = vtanh.f32 %v1365_v3  ;;  %v1480_v9 = vrot.slane %v1365_v3, 6 }
0x1bad   :  { %v3741_v5 = vpop.eup %3740 }
0x1bae   :  { %v4187_v6 = vmul.f32 %v3741_v5, %v3739_v4 }
0x1bb0   :  { %v1409_v12 = vpack.c.bf16 %v4187_v6, %v4187_v6 }
0x1bb2   :  { %v1411_v8 = vrot.slane %v1409_v12, 1 }
0x1bb4   :  { %1412 = vrot.lane.b32.xlu1 %v1411_v8, %s3836_s18 }
0x1c26   :  { %v1413_v14 = vpop.permute.xlu1 %1412 }
0x1c27   :  { %3155 = vmatmul.mubr.msk.bf16.vlgmr.msra.gmra.mrb[28].mxu1 %vm1179_vm5, %v1413_v14 }
0x1c28   :  { %1664 = vmatpush1.bf16.msra.mxu1 %v4082_v25  ;;  %1695 = vmatprep.mubr.bf16.mxu1 %v3834_v1 }
0x1c29   :  { %1665 = vmatprep.subr.bf16.mxu1 %v4085_v28 }
0x1c2c   :  { %1666 = vmatpush1.bf16.msra.mxu1 %v4095_v11 }
0x1c2d   :  { %1667 = vmatprep.subr.bf16.mxu1 %v4098_v37 }
0x1c30   :  { %1668 = vmatpush1.bf16.msra.mxu1 %v4107_v43 }
0x1c31   :  { %1669 = vmatprep.subr.bf16.mxu1 %v4110_v45 }
0x1c34   :  { %1670 = vmatpush1.bf16.msra.mxu1 %v4117_v48 }
0x1c35   :  { %1900 = vmatprep.subr.bf16.mxu1 %v4059_v44 }
0x1cfa   :  { %v1451_v17 = vpop.f32.mrb[28].mxu1 }
0x1cfb   :  { %v1460_v10 = vrot.slane %v1451_v17, 4  ;;  %v1453_v15 = vpop.f32.mrb[29].mxu1 }
0x1cfc   :  { %v1455_v19 = vpop.f32.mrb[30].mxu1  ;;  %v1461_v24 = vrot.slane %v1453_v15, 4 }
0x1cfd   :  { %v1464_v20 = vadd.f32 %v1460_v10, %v4162_v2  ;;  %v1456_v22 = vpop.f32.mrb[31].mxu1 }
0x1cfe   :  { %v1465_v26 = vadd.f32 %v1461_v24, %v4165_v13 }
0x1cff   :  { %v3156_v23 = vmul.f32 -1.442695, %v1464_v20 }
0x1d00   :  { %v3157_v34 = vmul.f32 -1.442695, %v1465_v26 }
0x1d01   :  { %3742 = vpow2.f32 %v3156_v23 }
0x1d02   :  { %3744 = vtanh.f32 %v1465_v26 }
0x1d0b   :  { %v3743_v27 = vpop.eup %3742 }
0x1d0c   :  { %v1472_v29 = vadd.f32 1.0, %v3743_v27  ;;  %v3745_v18 = vpop.eup %3744 }
0x1d0e   :  { %3746 = vrcp.f32 %v1472_v29 }
0x1d0f   :  { %3748 = vpow2.f32 %v3157_v34 }
0x1d18   :  { %v3747_v32 = vpop.eup %3746 }
0x1d19   :  { %v1483_v33 = vmul.f32 %v3747_v32, %v3745_v18  ;;  %v1482_v16 = vmul.f32 %v3747_v32, %v1480_v9  ;;  %v3749_v35 = vpop.eup %3748 }
0x1d1a   :  { %v1473_v36 = vadd.f32 1.0, %v3749_v35 }
0x1d1b   :  { %1485 = vrot.lane.b32.xlu0 %v1483_v33, %s3836_s18 }
0x1d1c   :  { %3750 = vrcp.f32 %v1473_v36 }
0x1d26   :  { %v3751_v40 = vpop.eup %3750 }
0x1d8d   :  { %v1486_v38 = vpop.permute.xlu0 %1485 }
0x1d8e   :  { %v1488_v39 = vadd.f32 %v1486_v38, %v1482_v16 }
0x1d90   :  { %3752 = vtanh.f32 %v1488_v39  ;;  %v1602_v8 = vrot.slane %v1488_v39, 6 }
0x1d9a   :  { %v3753_v41 = vpop.eup %3752 }
0x1d9b   :  { %v4205_v42 = vmul.f32 %v3753_v41, %v3751_v40 }
0x1d9d   :  { %v1531_v46 = vpack.c.bf16 %v4205_v42, %v4205_v42 }
0x1d9f   :  { %v1533_v47 = vrot.slane %v1531_v46, 2 }
0x1da1   :  { %1534 = vrot.lane.b32.xlu1 %v1533_v47, %s3836_s18 }
0x1e13   :  { %v1535_v52 = vpop.permute.xlu1 %1534 }
0x1e14   :  { %3158 = vmatmul.mubr.msk.bf16.vlgmr.msra.gmra.mrb[32].mxu0 %vm1179_vm5, %v1535_v52 }
0x1e15   :  { %1778 = vmatpush1.bf16.msra.mxu0 %v4082_v25  ;;  %1809 = vmatprep.mubr.bf16.mxu0 %v3834_v1 }
0x1e16   :  { %1779 = vmatprep.subr.bf16.mxu0 %v4085_v28 }
0x1e19   :  { %1780 = vmatpush1.bf16.msra.mxu0 %v4095_v11 }
0x1e1a   :  { %1781 = vmatprep.subr.bf16.mxu0 %v4098_v37 }
0x1e1d   :  { %1782 = vmatpush1.bf16.msra.mxu0 %v4107_v43 }
0x1e1e   :  { %1783 = vmatprep.subr.bf16.mxu0 %v4110_v45 }
0x1e21   :  { %1784 = vmatpush1.bf16.msra.mxu0 %v4117_v48 }
0x1e22   :  { %2022 = vmatprep.subr.bf16.mxu0 %v4059_v44 }
0x1ee7   :  { %v1573_v7 = vpop.f32.mrb[32].mxu0 }
0x1ee8   :  { %v1582_v54 = vrot.slane %v1573_v7, 2  ;;  %v1575_v56 = vpop.f32.mrb[33].mxu0 }
0x1ee9   :  { %v1577_v57 = vpop.f32.mrb[34].mxu0  ;;  %v1583_v62 = vrot.slane %v1575_v56, 2 }
0x1eea   :  { %v1586_v58 = vadd.f32 %v1582_v54, %v4162_v2  ;;  %v1578_v59 = vpop.f32.mrb[35].mxu0 }
0x1eeb   :  { %v1587_v3 = vadd.f32 %v1583_v62, %v4165_v13 }
0x1eec   :  { %v3159_v60 = vmul.f32 -1.442695, %v1586_v58 }
0x1eed   :  { %v3160_v10 = vmul.f32 -1.442695, %v1587_v3 }
0x1eee   :  { %3754 = vpow2.f32 %v3159_v60 }
0x1eef   :  { %3756 = vtanh.f32 %v1587_v3 }
0x1ef8   :  { %v3755_v4 = vpop.eup %3754 }
0x1ef9   :  { %v1594_v5 = vadd.f32 1.0, %v3755_v4  ;;  %v3757_v12 = vpop.eup %3756 }
0x1efb   :  { %3758 = vrcp.f32 %v1594_v5 }
0x1efc   :  { %3760 = vpow2.f32 %v3160_v10 }
0x1f05   :  { %v3759_v14 = vpop.eup %3758 }
0x1f06   :  { %v1605_v44 = vmul.f32 %v3759_v14, %v3757_v12  ;;  %v1604_v17 = vmul.f32 %v3759_v14, %v1602_v8  ;;  %v3761_v2 = vpop.eup %3760 }
0x1f07   :  { %v1595_v15 = vadd.f32 1.0, %v3761_v2 }
0x1f08   :  { %1607 = vrot.lane.b32.xlu0 %v1605_v44, %s3836_s18 }
0x1f09   :  { %3762 = vrcp.f32 %v1595_v15 }
0x1f13   :  { %v3763_v13 = vpop.eup %3762 }
0x1f7a   :  { %v1608_v19 = vpop.permute.xlu0 %1607 }
0x1f7b   :  { %v1610_v20 = vadd.f32 %v1608_v19, %v1604_v17 }
0x1f7d   :  { %3764 = vtanh.f32 %v1610_v20  ;;  %v1720_v39 = vrot.slane %v1610_v20, 6 }
0x1f87   :  { %v3765_v22 = vpop.eup %3764 }
0x1f88   :  { %v4223_v23 = vmul.f32 %v3765_v22, %v3763_v13 }
0x1f8a   :  { %v1655_v24 = vpack.c.bf16 %v4223_v23, %v4223_v23 }
0x1f8c   :  { %v1657_v26 = vrot.slane %v1655_v24, 3 }
0x1f8e   :  { %1658 = vrot.lane.b32.xlu1 %v1657_v26, %s3836_s18 }
0x2000   :  { %v1659_v27 = vpop.permute.xlu1 %1658 }
0x2001   :  { %3161 = vmatmul.mubr.msk.bf16.vlgmr.msra.gmra.mrb[32].mxu1 %vm1179_vm5, %v1659_v27 }
0x2002   :  { %1901 = vmatpush1.bf16.msra.mxu1 %v4082_v25  ;;  %1932 = vmatprep.mubr.bf16.mxu1 %v3834_v1 }
0x2003   :  { %1902 = vmatprep.subr.bf16.mxu1 %v4085_v28 }
0x2006   :  { %1903 = vmatpush1.bf16.msra.mxu1 %v4095_v11 }
0x2007   :  { %1904 = vmatprep.subr.bf16.mxu1 %v4098_v37 }
0x200a   :  { %1905 = vmatpush1.bf16.msra.mxu1 %v4107_v43 }
0x200b   :  { %1906 = vmatprep.subr.bf16.mxu1 %v4110_v45 }
0x200e   :  { %1907 = vmatpush1.bf16.msra.mxu1 %v4117_v48 }
0x200f   :  { %3390 = vmatprep.subr.mxu1 %v3830_v0 }
0x20d4   :  { %v1697_v29 = vpop.f32.mrb[32].mxu1 }
0x20d5   :  { %v1704_v18 = vadd.f32 %v1697_v29, %v4158_v61  ;;  %v1699_v9 = vpop.f32.mrb[33].mxu1 }
0x20d6   :  { %v1701_v32 = vpop.f32.mrb[34].mxu1  ;;  %v1705_v34 = vadd.f32 %v1699_v9, %v4160_v63 }
0x20d7   :  { %v3162_v33 = vmul.f32 -1.442695, %v1704_v18  ;;  %v1702_v16 = vpop.f32.mrb[35].mxu1 }
0x20d8   :  { %v3163_v47 = vmul.f32 -1.442695, %v1705_v34 }
0x20d9   :  { %3766 = vpow2.f32 %v3162_v33 }
0x20da   :  { %3768 = vtanh.f32 %v1705_v34 }
0x20e3   :  { %v3767_v35 = vpop.eup %3766 }
0x20e4   :  { %v1712_v36 = vadd.f32 1.0, %v3767_v35  ;;  %v3769_v38 = vpop.eup %3768 }
0x20e6   :  { %3770 = vrcp.f32 %v1712_v36 }
0x20e7   :  { %3772 = vpow2.f32 %v3163_v47 }
0x20f0   :  { %v3771_v40 = vpop.eup %3770 }
0x20f1   :  { %v1723_v41 = vmul.f32 %v3771_v40, %v3769_v38  ;;  %v1722_v46 = vmul.f32 %v3771_v40, %v1720_v39  ;;  %v3773_v52 = vpop.eup %3772 }
0x20f2   :  { %v1713_v7 = vadd.f32 1.0, %v3773_v52 }
0x20f3   :  { %1725 = vrot.lane.b32.xlu0 %v1723_v41, %s3836_s18 }
0x20f4   :  { %3774 = vrcp.f32 %v1713_v7 }
0x20fe   :  { %v3775_v57 = vpop.eup %3774 }
0x2165   :  { %v1726_v54 = vpop.permute.xlu0 %1725 }
0x2166   :  { %v1728_v56 = vadd.f32 %v1726_v54, %v1722_v46 }
0x2168   :  { %3776 = vtanh.f32 %v1728_v56 }
0x2172   :  { %v3777_v58 = vpop.eup %3776 }
0x2173   :  { %v4241_v59 = vmul.f32 %v3777_v58, %v3775_v57 }
0x2175   :  { %v1770_v60 = vpack.c.bf16 %v4241_v59, %v4241_v59 }
0x2177   :  { %1772 = vrot.lane.b32.xlu1 %v1770_v60, %s3836_s18  ;;  %v3848_v60 = vmov 1966171168  }
0x21e9   :  { %v1773_v62 = vpop.permute.xlu1 %1772 }
0x21ea   :  { %3164 = vmatmul.mubr.msk.bf16.vlgmr.msra.gmra.mrb[36].mxu0 %vm1179_vm5, %v1773_v62  ;;  %v1249_v62 = vunpack.c.l.s4 %v3848_v60 }
0x21eb   :  { %2023 = vmatpush1.bf16.msra.mxu0 %v4082_v25  ;;  %2054 = vmatprep.mubr.bf16.mxu0 %v3834_v1 }
0x21ec   :  { %2024 = vmatprep.subr.bf16.mxu0 %v4085_v28 }
0x21ef   :  { %2025 = vmatpush1.bf16.msra.mxu0 %v4095_v11 }
0x21f0   :  { %2026 = vmatprep.subr.bf16.mxu0 %v4098_v37 }
0x21f3   :  { %2027 = vmatpush1.bf16.msra.mxu0 %v4107_v43 }
0x21f4   :  { %2028 = vmatprep.subr.bf16.mxu0 %v4110_v45 }
0x21f7   :  { %2029 = vmatpush1.bf16.msra.mxu0 %v4117_v48  ;;  %v1840_v48 = vrot.slane %v1728_v56, 6 }
0x21f8   :  { %3395 = vmatprep.subr.mxu0 %v3830_v0 }
0x22bd   :  { %v1811_v3 = vpop.f32.mrb[36].mxu0 }
0x22be   :  { %v1820_v4 = vrot.slane %v1811_v3, 6  ;;  %v1813_v5 = vpop.f32.mrb[37].mxu0 }
0x22bf   :  { %v1815_v25 = vpop.f32.mrb[38].mxu0  ;;  %v1821_v11 = vrot.slane %v1813_v5, 6 }
0x22c0   :  { %v1824_v1 = vadd.f32 %v1820_v4, %v4158_v61  ;;  %v1816_v12 = vpop.f32.mrb[39].mxu0  ;;  %v1250_v4 = vunpack.c.0.s8 %v1249_v62 }
0x22c1   :  { %v1825_v37 = vadd.f32 %v1821_v11, %v4160_v63 }
0x22c2   :  { %v3165_v28 = vmul.f32 -1.442695, %v1824_v1  ;;  %v4274_v5 = vsub.s32 %v1250_v4, %v4145_v21 }
0x22c3   :  { %v3166_v10 = vmul.f32 -1.442695, %v1825_v37 }
0x22c4   :  { %3778 = vpow2.f32 %v3165_v28  ;;  %v4278_v12 = vrot.slane %v4169_v30, %v4274_v5  ;;  %v4282_v11 = vrot.slane %v4187_v6, %v4274_v5 }
0x22c5   :  { %3780 = vtanh.f32 %v1825_v37 }
0x22c6   :  { %v1383_v30 = vrot.slane %v4282_v11, %v4274_v5  ;;  %v1255_v4 = vcombine.high %v4278_v12, %v4278_v12 }
0x22c8   :  { %v1391_v6 = vcombine.high %v1383_v30, %v1383_v30 }
0x22ce   :  { %v3779_v8 = vpop.eup %3778 }
0x22cf   :  { %v1832_v43 = vadd.f32 1.0, %v3779_v8  ;;  %v3781_v45 = vpop.eup %3780  ;;  %v1262_v8 = vrot.slane %v4278_v12, %v4274_v5 }
0x22d1   :  { %3782 = vrcp.f32 %v1832_v43  ;;  %v1492_v43 = vcombine.high %v4205_v42, %v4205_v42  ;;  %v1396_v42 = vrot.slane %v1391_v6, %v4152_v53 }
0x22d2   :  { %3784 = vpow2.f32 %v3166_v10 }
0x22db   :  { %v3783_v14 = vpop.eup %3782 }
0x22dc   :  { %v1843_v44 = vmul.f32 %v3783_v14, %v3781_v45  ;;  %v1842_v17 = vmul.f32 %v3783_v14, %v1840_v48  ;;  %v3785_v2 = vpop.eup %3784  ;;  %v1614_v45 = vcombine.high %v4223_v23, %v4223_v23  ;;  %v1273_v14 = vrot.slane %v1262_v8, %v4152_v53 }
0x22dd   :  { %v1833_v15 = vadd.f32 1.0, %v3785_v2  ;;  %v1269_v8 = vrot.slane %v1255_v4, %v4274_v5 }
0x22de   :  { %1845 = vrot.lane.b32.xlu0 %v1843_v44, %s3836_s18  ;;  %v4295_v44 = vrot.slane %v1492_v43, %v4274_v5 }
0x22df   :  { %3786 = vrcp.f32 %v1833_v15 }
0x22e0   :  { %v1507_v23 = vrot.slane %v4295_v44, %v4274_v5  ;;  %v1500_v12 = vcombine.high %v4295_v44, %v4295_v44 }
0x22e2   :  { %v1518_v2 = vrot.slane %v1507_v23, %v4152_v53  ;;  %v1514_v30 = vrot.slane %v1500_v12, %v4274_v5 }
0x22e4   :  { %v1522_v6 = vrot.slane %v1514_v30, %v4152_v53 }
0x22e9   :  { %v3787_v13 = vpop.eup %3786 }
0x2350   :  { %v1846_v19 = vpop.permute.xlu0 %1845 }
0x2351   :  { %v1848_v20 = vadd.f32 %v1846_v19, %v1842_v17  ;;  %v4298_v17 = vrot.slane %v1614_v45, %v4274_v5  ;;  %v4310_v19 = vrot.slane %v4241_v59, %v4274_v5  ;;  %v1277_v45 = vrot.slane %v1269_v8, %v4152_v53 }
0x2353   :  { %3788 = vtanh.f32 %v1848_v20  ;;  %v1963_v46 = vrot.slane %v1848_v20, 6  ;;  %v1629_v10 = vrot.slane %v4298_v17, %v4274_v5  ;;  %v1739_v23 = vcombine.high %v4310_v19, %v4310_v19 }
0x2355   :  { %v1637_v15 = vcombine.high %v1629_v10, %v1629_v10  ;;  %v1753_v10 = vrot.slane %v1739_v23, %v4274_v5 }
0x235d   :  { %v3789_v22 = vpop.eup %3788 }
0x235e   :  { %v4259_v24 = vmul.f32 %v3789_v22, %v3787_v13  ;;  %v1642_v22 = vrot.slane %v1637_v15, %v4152_v53  ;;  %v1761_v15 = vrot.slane %v1753_v10, %v4152_v53 }
0x2360   :  { %v1892_v26 = vpack.c.bf16 %v4259_v24, %v4259_v24  ;;  %v4314_v20 = vrot.slane %v4259_v24, %v4274_v5 }
0x2362   :  { %v1894_v27 = vrot.slane %v1892_v26, 1  ;;  %v1746_v26 = vrot.slane %v4310_v19, %v4274_v5  ;;  %v1859_v44 = vcombine.high %v4314_v20, %v4314_v20 }
0x2364   :  { %1895 = vrot.lane.b32.xlu1 %v1894_v27, %s3836_s18  ;;  %v1866_v27 = vrot.slane %v4314_v20, %v4274_v5  ;;  %v1757_v59 = vrot.slane %v1746_v26, %v4152_v53 }
0x23d6   :  { %v1896_v29 = vpop.permute.xlu1 %1895 }
0x23d7   :  { %3167 = vmatmul.mubr.msk.bf16.vlgmr.msra.gmra.mrb[36].mxu1 %vm1179_vm5, %v1896_v29  ;;  %v1874_v29 = vcombine.high %v1866_v27, %v1866_v27 }
0x23d8   :  { %3392 = vmatprep.mubr.msk.f32.mxu1 %vm3833_vm0, %v3830_v0 }
0x23d9   :  { %v1879_v24 = vrot.slane %v1874_v29, %v4152_v53 }
0x24aa   :  { %v1934_v18 = vpop.f32.mrb[36].mxu1 }
0x24ab   :  { %v1943_v9 = vrot.slane %v1934_v18, 4  ;;  %v1936_v32 = vpop.f32.mrb[37].mxu1 }
0x24ac   :  { %v1938_v33 = vpop.f32.mrb[38].mxu1  ;;  %v1944_v36 = vrot.slane %v1936_v32, 4 }
0x24ad   :  { %v1947_v16 = vadd.f32 %v1943_v9, %v4158_v61  ;;  %v1939_v34 = vpop.f32.mrb[39].mxu1 }
0x24ae   :  { %v1948_v38 = vadd.f32 %v1944_v36, %v4160_v63 }
0x24af   :  { %v3168_v35 = vmul.f32 -1.442695, %v1947_v16 }
0x24b0   :  { %v3169_v54 = vmul.f32 -1.442695, %v1948_v38 }
0x24b1   :  { %3790 = vpow2.f32 %v3168_v35 }
0x24b2   :  { %3792 = vtanh.f32 %v1948_v38 }
0x24bb   :  { %v3791_v39 = vpop.eup %3790 }
0x24bc   :  { %v1955_v40 = vadd.f32 1.0, %v3791_v39  ;;  %v3793_v41 = vpop.eup %3792 }
0x24be   :  { %3794 = vrcp.f32 %v1955_v40 }
0x24bf   :  { %3796 = vpow2.f32 %v3169_v54 }
0x24c8   :  { %v3795_v47 = vpop.eup %3794 }
0x24c9   :  { %v1966_v52 = vmul.f32 %v3795_v47, %v3793_v41  ;;  %v1965_v7 = vmul.f32 %v3795_v47, %v1963_v46  ;;  %v3797_v56 = vpop.eup %3796 }
0x24ca   :  { %v1956_v57 = vadd.f32 1.0, %v3797_v56 }
0x24cb   :  { %1968 = vrot.lane.b32.xlu0 %v1966_v52, %s3836_s18 }
0x24cc   :  { %3798 = vrcp.f32 %v1956_v57 }
0x24d6   :  { %v3799_v25 = vpop.eup %3798 }
0x253d   :  { %v1969_v58 = vpop.permute.xlu0 %1968 }
0x253e   :  { %v4270_v3 = vadd.f32 %v1969_v58, %v1965_v7 }
0x2540   :  { %3800 = vtanh.f32 %v4270_v3 }
0x254a   :  { %v3801_v1 = vpop.eup %3800 }
0x254b   :  { %v1973_v28 = vmul.f32 %v3801_v1, %v3799_v25  ;;  %v1376_v25 = vcombine.high %v4282_v11, %v4282_v11  ;;  %v1622_v11 = vcombine.high %v4298_v17, %v4298_v17 }
0x254d   :  { %v2014_v37 = vpack.c.bf16 %v1973_v28, %v1973_v28  ;;  %v1975_v13 = vcombine.high %v1973_v28, %v1973_v28  ;;  %v2085_v28 = vrot.slane %v4270_v3, 6  ;;  %v1390_v43 = vrot.slane %v1376_v25, %v4274_v5  ;;  %v2140_v25 = vld [vmem:[%s3098_s29] sm:$0xff] }
0x254f   :  { %v2016_v48 = vrot.slane %v2014_v37, 2  ;;  %v4325_v18 = vrot.slane %v1975_v13, %v4274_v5 }
0x2551   :  { %2017 = vrot.lane.b32.xlu1 %v2016_v48, %s3836_s18  ;;  %v1990_v9 = vrot.slane %v4325_v18, %v4274_v5  ;;  %v1392_v48 = vcombine.high %v1390_v43, %v1390_v43 }
0x2553   :  { %v2001_v32 = vrot.slane %v1990_v9, %v4152_v53  ;;  %v1400_v3 = vrot.slane %v1392_v48, %v4152_v53 }
0x2555   :  { %1278 = vrot.lane.b32.xlu1 %v1273_v14, %s3836_s18  ;;  %v1636_v14 = vrot.slane %v1622_v11, %v4274_v5 }
0x2559   :  { %1401 = vrot.lane.b32.xlu1 %v1396_v42, %s3836_s18  ;;  %v1638_v42 = vcombine.high %v1636_v14, %v1636_v14 }
0x255b   :  { %v1646_v17 = vrot.slane %v1638_v42, %v4152_v53 }
0x255d   :  { %1523 = vrot.lane.b32.xlu1 %v1518_v2, %s3836_s18  ;;  %v1873_v2 = vrot.slane %v1859_v44, %v4274_v5 }
0x255f   :  { %v1875_v13 = vcombine.high %v1873_v2, %v1873_v2 }
0x2561   :  { %1647 = vrot.lane.b32.xlu1 %v1642_v22, %s3836_s18  ;;  %v1983_v22 = vcombine.high %v4325_v18, %v4325_v18  ;;  %v1883_v19 = vrot.slane %v1875_v13, %v4152_v53 }
0x2563   :  { %v1997_v20 = vrot.slane %v1983_v22, %v4274_v5  ;;  %v84_v22 = vstv %s3103_s3 }
0x2564   :  { %85 = vst [vmem:[#allocation3] sm:$0x1] %v84_v22 }
0x2565   :  { %1762 = vrot.lane.b32.xlu1 %v1757_v59, %s3836_s18  ;;  %v2005_v26 = vrot.slane %v1997_v20, %v4152_v53 }
0x2569   :  { %1884 = vrot.lane.b32.xlu1 %v1879_v24, %s3836_s18 }
0x256d   :  { %2006 = vrot.lane.b32.xlu1 %v2001_v32, %s3836_s18 }
0x25c3   :  { %v2018_v33 = vpop.permute.xlu1 %2017 }
0x25c4   :  { %3170 = vmatmul.mubr.msk.bf16.vlgmr.msra.gmra.mrb[40].mxu0 %vm1179_vm5, %v2018_v33 }
0x25c5   :  { %3397 = vmatprep.mubr.msk.f32.mxu0 %vm3833_vm0, %v3830_v0 }
0x25c7   :  { %v1279_v16 = vpop.permute.xlu1 %1278 }
0x25c8   :  { %1285 = vst.msk [vmem:[#allocation2] sm:$0x1] %vm1284_vm6, %v1279_v16 }
0x25cb   :  { %v1402_v34 = vpop.permute.xlu1 %1401 }
0x25cc   :  { %1407 = vst.msk [vmem:[#allocation2 + $0x1] sm:$0x1] %vm1284_vm6, %v1402_v34 }
0x25cf   :  { %v1524_v35 = vpop.permute.xlu1 %1523 }
0x25d0   :  { %1529 = vst.msk [vmem:[#allocation2 + $0x2] sm:$0x1] %vm1284_vm6, %v1524_v35 }
0x25d3   :  { %v1648_v36 = vpop.permute.xlu1 %1647 }
0x25d4   :  { %1653 = vst.msk [vmem:[#allocation2 + $0x3] sm:$0x1] %vm1284_vm6, %v1648_v36 }
0x25d7   :  { %v1763_v38 = vpop.permute.xlu1 %1762 }
0x25d8   :  { %1768 = vst.msk [vmem:[#allocation2 + $0x4] sm:$0x1] %vm1284_vm6, %v1763_v38 }
0x25db   :  { %v1885_v39 = vpop.permute.xlu1 %1884 }
0x25dc   :  { %1890 = vst.msk [vmem:[#allocation2 + $0x5] sm:$0x1] %vm1284_vm6, %v1885_v39 }
0x25df   :  { %v2007_v40 = vpop.permute.xlu1 %2006 }
0x25e0   :  { %2012 = vst.msk [vmem:[#allocation2 + $0x6] sm:$0x1] %vm1284_vm6, %v2007_v40 }
0x2697   :  { %v2056_v41 = vpop.f32.mrb[40].mxu0 }
0x2698   :  { %v2065_v46 = vrot.slane %v2056_v41, 2  ;;  %v2058_v47 = vpop.f32.mrb[41].mxu0 }
0x2699   :  { %v2060_v52 = vpop.f32.mrb[42].mxu0  ;;  %v2066_v57 = vrot.slane %v2058_v47, 2 }
0x269a   :  { %v2069_v7 = vadd.f32 %v2065_v46, %v4158_v61  ;;  %v2061_v54 = vpop.f32.mrb[43].mxu0 }
0x269b   :  { %v2070_v58 = vadd.f32 %v2066_v57, %v4160_v63 }
0x269c   :  { %v3171_v56 = vmul.f32 -1.442695, %v2069_v7 }
0x269d   :  { %v3172_v27 = vmul.f32 -1.442695, %v2070_v58 }
0x269e   :  { %3802 = vpow2.f32 %v3171_v56 }
0x269f   :  { %3804 = vtanh.f32 %v2070_v58 }
0x26a8   :  { %v3803_v60 = vpop.eup %3802 }
0x26a9   :  { %v2077_v62 = vadd.f32 1.0, %v3803_v60  ;;  %v3805_v1 = vpop.eup %3804 }
0x26ab   :  { %3806 = vrcp.f32 %v2077_v62 }
0x26ac   :  { %3808 = vpow2.f32 %v3172_v27 }
0x26b5   :  { %v3807_v61 = vpop.eup %3806 }
0x26b6   :  { %v2088_v37 = vmul.f32 %v3807_v61, %v3805_v1  ;;  %v2087_v63 = vmul.f32 %v3807_v61, %v2085_v28  ;;  %v3809_v59 = vpop.eup %3808  ;;  %v2141_v28 = vld [vmem:[%s3098_s29 + $0x8] sm:$0xff] }
0x26b7   :  { %v2078_v29 = vadd.f32 1.0, %v3809_v59 }
0x26b8   :  { %2090 = vrot.lane.b32.xlu0 %v2088_v37, %s3836_s18 }
0x26b9   :  { %3810 = vrcp.f32 %v2078_v29 }
0x26bc   :  { %1280 = vrot.lane.b32.xlu0 %v1277_v45, %s3836_s18 }
0x26c0   :  { %1403 = vrot.lane.b32.xlu0 %v1400_v3, %s3836_s18 }
0x26c3   :  { %v3811_v33 = vpop.eup %3810 }
0x26c4   :  { %1525 = vrot.lane.b32.xlu0 %v1522_v6, %s3836_s18 }
0x26c8   :  { %1649 = vrot.lane.b32.xlu0 %v1646_v17, %s3836_s18 }
0x26cc   :  { %1764 = vrot.lane.b32.xlu0 %v1761_v15, %s3836_s18 }
0x26d0   :  { %1886 = vrot.lane.b32.xlu0 %v1883_v19, %s3836_s18 }
0x26d4   :  { %2008 = vrot.lane.b32.xlu0 %v2005_v26, %s3836_s18 }
0x272a   :  { %v2091_v24 = vpop.permute.xlu0 %2090 }
0x272b   :  { %v2093_v9 = vadd.f32 %v2091_v24, %v2087_v63 }
0x272d   :  { %3812 = vtanh.f32 %v2093_v9  ;;  %v3175_v9 = vld [vmem:[%s3100_s7] ss:$0 sm:$0xff] }
0x272e   :  { %v1281_v18 = vpop.permute.xlu0 %1280 }
0x272f   :  { %1286 = vst.msk [vmem:[#allocation2 + $0x8] sm:$0x1] %vm1284_vm6, %v1281_v18 }
0x2732   :  { %v1404_v32 = vpop.permute.xlu0 %1403 }
0x2733   :  { %1408 = vst.msk [vmem:[#allocation2 + $0x9] sm:$0x1] %vm1284_vm6, %v1404_v32 }
0x2736   :  { %v1526_v16 = vpop.permute.xlu0 %1525 }
0x2737   :  { %v3813_v34 = vpop.eup %3812  ;;  %1530 = vst.msk [vmem:[#allocation2 + $0xa] sm:$0x1] %vm1284_vm6, %v1526_v16 }
0x2738   :  { %v2095_v35 = vmul.f32 %v3813_v34, %v3811_v33  ;;  %v3176_v33 = vld [vmem:[%s3101_s11] ss:$0 sm:$0xff] }
0x273a   :  { %v1650_v36 = vpop.permute.xlu0 %1649  ;;  %v2097_v38 = vcombine.high %v2095_v35, %v2095_v35  ;;  %v3177_v35 = vld [vmem:[%s3102_s15] ss:$0 sm:$0xff] }
0x273b   :  { %1654 = vst.msk [vmem:[#allocation2 + $0xb] sm:$0x1] %vm1284_vm6, %v1650_v36 }
0x273c   :  { %v2104_v39 = vrot.slane %v2097_v38, %v4274_v5 }
0x273e   :  { %v1765_v40 = vpop.permute.xlu0 %1764  ;;  %v2112_v41 = vrot.slane %v2104_v39, %v4274_v5  ;;  %v2105_v46 = vcombine.high %v2104_v39, %v2104_v39 }
0x273f   :  { %1769 = vst.msk [vmem:[#allocation2 + $0xc] sm:$0x1] %vm1284_vm6, %v1765_v40 }
0x2740   :  { %v2120_v47 = vcombine.high %v2112_v41, %v2112_v41  ;;  %v2119_v52 = vrot.slane %v2105_v46, %v4274_v5 }
0x2742   :  { %v1887_v7 = vpop.permute.xlu0 %1886  ;;  %v2125_v54 = vrot.slane %v2120_v47, %v4152_v53  ;;  %v2121_v56 = vcombine.high %v2119_v52, %v2119_v52  ;;  %v3178_v52 = vld [vmem:[#allocation3] ss:$0 sm:$0xff] }
0x2743   :  { %1891 = vst.msk [vmem:[#allocation2 + $0xd] sm:$0x1] %vm1284_vm6, %v1887_v7  ;;  %v2384_v7 = vand.u32 127, %v1099_v49 }
0x2744   :  { %2130 = vrot.lane.b32.xlu1 %v2125_v54, %s3836_s18  ;;  %v2129_v57 = vrot.slane %v2121_v56, %v4152_v53 }
0x2745   :  { %v2387_v56 = vsub.s32 %v2384_v7, %v4145_v21 }
0x2746   :  { %2132 = vrot.lane.b32.xlu0 %v2129_v57, %s3836_s18  ;;  %v2009_v58 = vpop.permute.xlu0 %2008 }
0x2747   :  { %2013 = vst.msk [vmem:[#allocation2 + $0xe] sm:$0x1] %vm1284_vm6, %v2009_v58 }
0x27b6   :  { %v2131_v60 = vpop.permute.xlu1 %2130 }
0x27b7   :  { %2136 = vst.msk [vmem:[#allocation2 + $0x7] sm:$0x1] %vm1284_vm6, %v2131_v60  ;;  %v2352_v60 = vld [vmem:[%s3099_s21] sm:$0x3] }
0x27b8   :  { %v2133_v62 = vpop.permute.xlu0 %2132  ;;  %vm2380_vm9 = vcmp.gt.f32.partialorder %v2352_v60, 0.0 }
0x27b9   :  { %2137 = vst.msk [vmem:[#allocation2 + $0xf] sm:$0x1] %vm1284_vm6, %v2133_v62 }
0x27be   :  { %v2138_v5 = vld [vmem:[#allocation2] sm:$0xff] }
0x27bf   :  { %2143 = vrot.lane.b32.xlu1 %v2138_v5, %s3839_s24 }
0x27c0   :  { %v2139_v4 = vld [vmem:[#allocation2 + $0x8] sm:$0xff] }
0x27c1   :  { %2221 = vrot.lane.b32.xlu0 %v2139_v4, %s3839_s24 }
0x2831   :  { %v2144_v1 = vpop.permute.xlu1 %2143 }
0x2832   :  { %3391 = vmatpush3.msra.mxu1 %v2144_v1 }
0x2833   :  { %3393 = vmatmul.mubr.msk.f32.vlgmr.msra.gmra.mrb[22].mxu1 %vm2146_vm7, %v2140_v25  ;;  %v2222_v61 = vpop.permute.xlu0 %2221  ;;  %3530 = vmatprep.subr.bf16.mxu1 %v3841_v31 }
0x2834   :  { %3396 = vmatpush3.msra.mxu0 %v2222_v61  ;;  %3416 = vmatprep.mubr.msk.f32.mxu1 %vm3833_vm0, %v3830_v0 }
0x2835   :  { %3398 = vmatmul.mubr.msk.f32.vlgmr.msra.gmra.mrb[22].mxu0 %vm2146_vm7, %v2141_v28  ;;  %3542 = vmatprep.subr.bf16.mxu0 %v3841_v31 }
0x2836   :  { %3435 = vmatprep.mubr.msk.f32.mxu0 %vm3833_vm0, %v3830_v0 }
0x2906   :  { %v2216_v37 = vpop.f32.mrb[22].mxu1 }
0x2907   :  { %2299 = vrot.lane.b32.xlu1 %v2216_v37, %s3837_s19  ;;  %v3394_v8 = vpop.f32.mrb[23].mxu1 }
0x2908   :  { %v2293_v43 = vpop.f32.mrb[22].mxu0 }
0x2909   :  { %2301 = vrot.lane.b32.xlu0 %v2293_v43, %s3837_s19  ;;  %v3399_v63 = vpop.f32.mrb[23].mxu0 }
0x2979   :  { %v2300_v45 = vpop.permute.xlu1 %2299 }
0x297a   :  { %v2305_v48 = vsel %vm271_vm2, %v2138_v5, %v2300_v45 }
0x297b   :  { %v2302_v12 = vpop.permute.xlu0 %2301  ;;  %v2309_v11 = vsel %vm1179_vm5, %v2305_v48, 0.0 }
0x297c   :  { %2310 = vadd.xlane.f32.xlu1 %v2309_v11  ;;  %v2306_v3 = vsel %vm271_vm2, %v2139_v4, %v2302_v12  ;;  %v2441_v11 = vld [vmem:[%s4447_s26] sm:$0xff] }
0x297d   :  { %v2312_v30 = vsel %vm1179_vm5, %v2306_v3, 0.0 }
0x297e   :  { %2313 = vadd.xlane.f32.xlu0 %v2312_v30  ;;  %v2531_v30 = vld [vmem:[%s4452_s30] sm:$0xff] }
0x2a09   :  { %v2311_v14 = vpop.xlane.xlu1 %2310 }
0x2a0a   :  { %v2316_v6 = vmul.f32 0.015625, %v2311_v14 }
0x2a0b   :  { %v2314_v42 = vpop.xlane.xlu0 %2313 }
0x2a0c   :  { %v2318_v23 = vsub.f32 %v2305_v48, %v2316_v6  ;;  %v2317_v44 = vmul.f32 0.015625, %v2314_v42  ;;  %v2532_v6 = vld [vmem:[%s4452_s30 + $0x8] sm:$0xff] }
0x2a0d   :  { %v3543_v42 = vpack.c.bf16 %v2532_v6, %v2531_v30 }
0x2a0e   :  { %v2319_v17 = vsub.f32 %v2306_v3, %v2317_v44  ;;  %v2320_v10 = vmul.f32 %v2318_v23, %v2318_v23  ;;  %v2442_v3 = vld [vmem:[%s4447_s26 + $0x8] sm:$0xff]  ;;  %v2444_v44 = vld [vmem:[%s4447_s26 + $0x18] sm:$0xff] }
0x2a0f   :  { %v3531_v14 = vpack.c.bf16 %v2442_v3, %v2441_v11  ;;  %3544 = vmatpush3.bf16.msra.mxu0 %v3543_v42 }
0x2a10   :  { %v2322_v2 = vsel %vm1179_vm5, %v2320_v10, 0.0  ;;  %v2321_v15 = vmul.f32 %v2319_v17, %v2319_v17  ;;  %3545 = vmatprep.subr.bf16.mxu0 %v3841_v31 }
0x2a11   :  { %2323 = vadd.xlane.f32.xlu0 %v2322_v2  ;;  %3532 = vmatpush3.bf16.msra.mxu1 %v3531_v14  ;;  %v2534_v2 = vld [vmem:[%s4452_s30 + $0x18] sm:$0xff] }
0x2a12   :  { %v2325_v13 = vsel %vm1179_vm5, %v2321_v15, 0.0  ;;  %3533 = vmatprep.subr.bf16.mxu1 %v3841_v31 }
0x2a13   :  { %2326 = vadd.xlane.f32.xlu1 %v2325_v13 }
0x2a9e   :  { %v2324_v19 = vpop.xlane.xlu0 %2323 }
0x2a9f   :  { %v2328_v20 = vmul.f32 0.015625, %v2324_v19  ;;  %v2445_v19 = vld [vmem:[%s4447_s26 + $0x20] sm:$0xff] }
0x2aa0   :  { %v2327_v26 = vpop.xlane.xlu1 %2326 }
0x2aa1   :  { %v2330_v27 = vadd.f32 1e-05, %v2328_v20  ;;  %v2329_v59 = vmul.f32 0.015625, %v2327_v26  ;;  %v2446_v20 = vld [vmem:[%s4447_s26 + $0x28] sm:$0xff]  ;;  %v2535_v26 = vld [vmem:[%s4452_s30 + $0x20] sm:$0xff] }
0x2aa3   :  { %3814 = vrsqrt.f32 %v2330_v27  ;;  %v2331_v29 = vadd.f32 1e-05, %v2329_v59  ;;  %v3537_v59 = vpack.c.bf16 %v2446_v20, %v2445_v19 }
0x2aa5   :  { %3816 = vrsqrt.f32 %v2331_v29  ;;  %v2536_v29 = vld [vmem:[%s4452_s30 + $0x28] sm:$0xff] }
0x2aad   :  { %v3815_v24 = vpop.eup %3814 }
0x2aae   :  { %v2334_v18 = vmul.f32 %v3815_v24, %v2318_v23  ;;  %v2443_v23 = vld [vmem:[%s4447_s26 + $0x10] sm:$0xff]  ;;  %v3549_v24 = vpack.c.bf16 %v2536_v29, %v2535_v26  ;;  %v2622_v26 = vld [vmem:[%s3109_s22] sm:$0x3] }
0x2aaf   :  { %v3817_v32 = vpop.eup %3816  ;;  %v3534_v10 = vpack.c.bf16 %v2444_v44, %v2443_v23  ;;  %v2641_v44 = vld [vmem:[%s4495_s4 + $0x40] sm:$0xff] }
0x2ab0   :  { %v2342_v16 = vmul.f32 %v3175_v9, %v2334_v18  ;;  %v2335_v34 = vmul.f32 %v3817_v32, %v2319_v17  ;;  %v2533_v17 = vld [vmem:[%s4452_s30 + $0x10] sm:$0xff]  ;;  %v2448_v18 = vld [vmem:[%s4447_s26 + $0x38] sm:$0xff] }
0x2ab1   :  { %v3546_v13 = vpack.c.bf16 %v2534_v2, %v2533_v17  ;;  %3535 = vmatpush3.bf16.msra.mxu1 %v3534_v10  ;;  %v2537_v32 = vld [vmem:[%s4452_s30 + $0x30] sm:$0xff]  ;;  %v2642_v17 = vld [vmem:[%s4495_s4 + $0x48] sm:$0xff]  ;;  %v3179_v2 = vld [vmem:[%s3105_s12] ss:$0 sm:$0xff] }
0x2ab2   :  { %v4430_v36 = vadd.f32 %v3176_v33, %v2342_v16  ;;  %v2343_v38 = vmul.f32 %v3175_v9, %v2335_v34  ;;  %3536 = vmatprep.subr.bf16.mxu1 %v3841_v31  ;;  %v2447_v9 = vld [vmem:[%s4447_s26 + $0x30] sm:$0xff]  ;;  %v3567_v10 = vpack.c.bf16 %v2642_v17, %v2641_v44  ;;  %v3185_v17 = vld [vmem:[%s3112_s17] ss:$0 sm:$0xff]  ;;  %s3874_s17 = smov 36  }
0x2ab3   :  { %3547 = vmatpush3.bf16.msra.mxu0 %v3546_v13  ;;  %v3540_v16 = vpack.c.bf16 %v2448_v18, %v2447_v9  ;;  %v1076_v18 = vld [vmem:[%s3093_s1] sm:$0x3]  ;;  %s3118_s1 = sld [smem:[%s4635_s0 + %s3869_s28]]  }
0x2ab4   :  { %v2360_v39 = vmul.f32 %v3177_v35, %v4430_v36  ;;  %v4433_v40 = vadd.f32 %v3176_v33, %v2343_v38  ;;  %3548 = vmatprep.subr.bf16.mxu0 %v3841_v31  ;;  %s3119_s22 = sld [smem:[%s4635_s0 + %s3874_s17]]  }
0x2ab5   :  { %3538 = vmatpush3.bf16.msra.mxu1 %v3537_v59 }
0x2ab6   :  { %v2362_v41 = vsel %vm1179_vm5, %v2360_v39, 0.0  ;;  %v2361_v46 = vmul.f32 %v3177_v35, %v4433_v40  ;;  %3539 = vmatprep.subr.bf16.mxu1 %v3841_v31 }
0x2ab7   :  { %2363 = vadd.xlane.f32.xlu0 %v2362_v41  ;;  %3550 = vmatpush3.bf16.msra.mxu0 %v3549_v24 }
0x2ab8   :  { %v2365_v47 = vsel %vm1179_vm5, %v2361_v46, 0.0  ;;  %3551 = vmatprep.subr.bf16.mxu0 %v3841_v31 }
0x2ab9   :  { %2366 = vadd.xlane.f32.xlu1 %v2365_v47  ;;  %3541 = vmatpush3.bf16.msra.mxu1 %v3540_v16 }
0x2aba   :  { %3554 = vmatprep.subr.bf16.mxu1 %v3841_v31 }
0x2acd   :  { %2375 = vperm.xlu0 %3651, %v3178_v52  }
0x2b44   :  { %v2364_v54 = vpop.xlane.xlu0 %2363 }
0x2b46   :  { %v2367_v57 = vpop.xlane.xlu1 %2366 }
0x2b4c   :  { %v2376_v58 = vpop.permute.xlu0 %2375 }
0x2b4d   :  { %v2378_v62 = vadd.f32 %v2376_v58, %v2364_v54  ;;  %v2379_v5 = vadd.f32 %v2376_v58, %v2367_v57 }
0x2b4f   :  { %v2388_v4 = vrot.slane %v2378_v62, %v2387_v56  ;;  %v2392_v25 = vrot.slane %v2379_v5, %v2387_v56 }
0x2b51   :  { %v2394_v1 = vsel %vm2393_vm8, %v2392_v25, %v2388_v4  ;;  %v2634_v25 = vld [vmem:[%s4495_s4 + $0x8] sm:$0xff] }
0x2b52   :  { %v2396_v28 = vsel %vm2380_vm9, %v2394_v1, -1e+30  ;;  %v2635_v1 = vld [vmem:[%s4495_s4 + $0x10] sm:$0xff] }
0x2b53   :  { %v2398_v61 = vsel %vm2397_vm10, %v2396_v28, -inf }
0x2b54   :  { %2399 = vmax.xlane.f32.xlu1 %v2398_v61  ;;  %v2636_v61 = vld [vmem:[%s4495_s4 + $0x18] sm:$0xff] }
0x2be1   :  { %v2400_v37 = vpop.xlane.xlu1 %2399 }
0x2be2   :  { %v2401_v49 = vsub.f32 %v2396_v28, %v2400_v37  ;;  %v3558_v37 = vpack.c.bf16 %v2636_v61, %v2635_v1  ;;  %v2763_v1 = vld [vmem:[%s4560_s13 + $0x38] sm:$0xff]  ;;  %v2764_v61 = vld [vmem:[%s4560_s13 + $0x40] sm:$0xff] }
0x2be4   :  { %v2402_v8 = vmul.f32 1.442695, %v2401_v49  ;;  %v2637_v49 = vld [vmem:[%s4495_s4 + $0x20] sm:$0xff] }
0x2be6   :  { %3818 = vpow2.f32 %v2402_v8  ;;  %v2638_v8 = vld [vmem:[%s4495_s4 + $0x28] sm:$0xff] }
0x2bf0   :  { %v3819_v43 = vpop.eup %3818 }
0x2bf1   :  { %v2404_v63 = vmul.f32 %v3819_v43, %v2352_v60  ;;  %v3561_v43 = vpack.c.bf16 %v2638_v8, %v2637_v49  ;;  %v2766_v8 = vld [vmem:[%s4560_s13 + $0x50] sm:$0xff] }
0x2bf3   :  { %v2405_v45 = vsel %vm2397_vm10, %v2404_v63, 0.0 }
0x2bf4   :  { %2406 = vadd.xlane.f32.xlu1 %v2405_v45  ;;  %v2640_v45 = vld [vmem:[%s4495_s4 + $0x38] sm:$0xff] }
0x2c81   :  { %v2407_v48 = vpop.xlane.xlu1 %2406 }
0x2c82   :  { %v2408_v12 = vmax.f32 %v2407_v48, 1e-20 }
0x2c84   :  { %3820 = vrcp.f32 %v2408_v12  ;;  %v3181_v12 = vld [vmem:[%s3107_s8] ss:$0 sm:$0xff] }
0x2c8e   :  { %v3821_v15 = vpop.eup %3820 }
0x2c8f   :  { %v2410_v22 = vmul.f32 %v3821_v15, %v2404_v63  ;;  %v2639_v63 = vld [vmem:[%s4495_s4 + $0x30] sm:$0xff]  ;;  %v2616_v15 = vld [vmem:[%s3108_s16] sm:$0x3] }
0x2c90   :  { %v3564_v48 = vpack.c.bf16 %v2640_v45, %v2639_v63  ;;  %v2768_v45 = vld [vmem:[%s4560_s13 + $0x60] sm:$0xff] }
0x2c91   :  { %v2414_v27 = vrot.slane %v2410_v22, %v4152_v53  ;;  %v2421_v33 = vrot.slane %v2410_v22, %v1105_v55  ;;  %v2538_v53 = vld [vmem:[%s4452_s30 + $0x38] sm:$0xff] }
0x2c92   :  { %v3552_v34 = vpack.c.bf16 %v2538_v53, %v2537_v32  ;;  %v3145_v32 = vld [vmem:[%s3090_s5] ss:$0 sm:$0xff]  ;;  %s3871_s5 = smov 34  }
0x2c93   :  { %2416 = vbcast.lane.b32.xlu1 %v2414_v27, 256  ;;  %v3147_v27 = vld [vmem:[%s3092_s27] ss:$0 sm:$0xff]  ;;  %s3115_s27 = sld [smem:[%s4635_s0 + %s3837_s19]]  }
0x2c94   :  { %3553 = vmatpush3.bf16.msra.mxu0 %v3552_v34  ;;  %v4536_v59 = vadd.f32 %v3147_v27, %v4149_v51  ;;  %v4546_v51 = vadd.f32 %v3145_v32, %v4147_v50  ;;  %v3183_v50 = vld [vmem:[%s3111_s9] ss:$0 sm:$0xff]  ;;  %s3117_s8 = sld [smem:[%s4635_s0 + %s3871_s5]]   ;;  %s3872_s9 = smov 37  }
0x2c95   :  { %3569 = vmatprep.subr.bf16.mxu0 %v3841_v31  ;;  %s3120_s12 = sld [smem:[%s4635_s0 + %s3872_s9]]  }
0x2c96   :  { %v1077_v29 = vmul.f32 0.5, %v4536_v59 }
0x2c97   :  { %2423 = vbcast.lane.b32.xlu1 %v2421_v33, 256 }
0x2c98   :  { %v1078_v24 = vmul.f32 1.442695, %v1077_v29 }
0x2d05   :  { %v2417_v35 = vpop.permute.xlu1 %2416 }
0x2d06   :  { %v2425_v38 = vmul.f32 %v2417_v35, %v4430_v36 }
0x2d08   :  { %v2427_v39 = vsel %vm1179_vm5, %v2425_v38, 0.0 }
0x2d09   :  { %v2428_v41 = vrot.slane %v2427_v39, 4  ;;  %v2424_v21 = vpop.permute.xlu1 %2423 }
0x2d0a   :  { %v2426_v55 = vmul.f32 %v2424_v21, %v4433_v40  ;;  %v2633_v40 = vld [vmem:[%s4495_s4] sm:$0xff] }
0x2d0b   :  { %v2429_v46 = vadd.f32 %v2428_v41, %v2427_v39  ;;  %v3555_v28 = vpack.c.bf16 %v2634_v25, %v2633_v40  ;;  %v2762_v25 = vld [vmem:[%s4560_s13 + $0x30] sm:$0xff] }
0x2d0c   :  { %v2434_v47 = vsel %vm1179_vm5, %v2426_v55, 0.0 }
0x2d0d   :  { %v2430_v52 = vrot.slane %v2429_v46, 2  ;;  %v2435_v7 = vrot.slane %v2434_v47, 4 }
0x2d0f   :  { %v2431_v54 = vadd.f32 %v2430_v52, %v2429_v46  ;;  %v2436_v56 = vadd.f32 %v2435_v7, %v2434_v47  ;;  %v2756_v46 = vld [vmem:[%s4560_s13] sm:$0xff]  ;;  %v2757_v47 = vld [vmem:[%s4560_s13 + $0x8] sm:$0xff]  ;;  %v2758_v52 = vld [vmem:[%s4560_s13 + $0x10] sm:$0xff] }
0x2d10   :  { %v3570_v7 = vpack.c.bf16 %v2757_v47, %v2756_v46  ;;  %v3189_v47 = vld [vmem:[%s3117_s8] ss:$0 sm:$0xff] }
0x2d11   :  { %v2437_v57 = vrot.slane %v2436_v56, 2  ;;  %v2432_v58 = vrot.slane %v2431_v54, 1 }
0x2d13   :  { %v2438_v60 = vadd.f32 %v2437_v57, %v2436_v56  ;;  %v2433_v5 = vadd.f32 %v2432_v58, %v2431_v54  ;;  %v2759_v54 = vld [vmem:[%s4560_s13 + $0x18] sm:$0xff] }
0x2d14   :  { %v3573_v56 = vpack.c.bf16 %v2759_v54, %v2758_v52  ;;  %v2965_v54 = vld [vmem:[%s3120_s12 + $0x8] sm:$0xff] }
0x2d15   :  { %v2439_v62 = vrot.slane %v2438_v60, 1 }
0x2d17   :  { %v2440_v4 = vadd.f32 %v2439_v62, %v2438_v60 }
0x2d19   :  { %v2458_v36 = vsel %vm2393_vm8, %v2440_v4, %v2433_v5  ;;  %v2760_v4 = vld [vmem:[%s4560_s13 + $0x20] sm:$0xff] }
0x2d1a   :  { %3417 = vmatmul.mubr.msk.f32.vlgmr.msra.gmra.mrb[40].mxu1 %vm1179_vm5, %v2458_v36  ;;  %3436 = vmatmul.mubr.msk.f32.vlgmr.msra.gmra.mrb[44].mxu0 %vm1179_vm5, %v2458_v36  ;;  %v2761_v36 = vld [vmem:[%s4560_s13 + $0x28] sm:$0xff] }
0x2d1b   :  { %3458 = vmatprep.mubr.msk.f32.mxu1 %vm3833_vm0, %v3830_v0  ;;  %3493 = vmatprep.mubr.msk.f32.mxu0 %vm3833_vm0, %v3830_v0  ;;  %v3576_v40 = vpack.c.bf16 %v2761_v36, %v2760_v4 }
0x2d1c   :  { %3556 = vmatpush3.bf16.msra.mxu1 %v3555_v28  ;;  %3571 = vmatpush3.bf16.msra.mxu0 %v3570_v7  ;;  %v3579_v28 = vpack.c.bf16 %v2763_v1, %v2762_v25  ;;  %v2964_v7 = vld [vmem:[%s3120_s12] sm:$0xff] }
0x2d1d   :  { %3557 = vmatprep.subr.bf16.mxu1 %v3841_v31  ;;  %3572 = vmatprep.subr.bf16.mxu0 %v3841_v31 }
0x2d20   :  { %3559 = vmatpush3.bf16.msra.mxu1 %v3558_v37  ;;  %3574 = vmatpush3.bf16.msra.mxu0 %v3573_v56  ;;  %v2765_v37 = vld [vmem:[%s4560_s13 + $0x48] sm:$0xff] }
0x2d21   :  { %3560 = vmatprep.subr.bf16.mxu1 %v3841_v31  ;;  %3575 = vmatprep.subr.bf16.mxu0 %v3841_v31  ;;  %v3582_v49 = vpack.c.bf16 %v2765_v37, %v2764_v61 }
0x2d24   :  { %3562 = vmatpush3.bf16.msra.mxu1 %v3561_v43  ;;  %3577 = vmatpush3.bf16.msra.mxu0 %v3576_v40  ;;  %v2767_v43 = vld [vmem:[%s4560_s13 + $0x58] sm:$0xff] }
0x2d25   :  { %3563 = vmatprep.subr.bf16.mxu1 %v3841_v31  ;;  %3578 = vmatprep.subr.bf16.mxu0 %v3841_v31  ;;  %v3585_v63 = vpack.c.bf16 %v2767_v43, %v2766_v8 }
0x2d28   :  { %3565 = vmatpush3.bf16.msra.mxu1 %v3564_v48  ;;  %3580 = vmatpush3.bf16.msra.mxu0 %v3579_v28  ;;  %v2769_v48 = vld [vmem:[%s4560_s13 + $0x68] sm:$0xff] }
0x2d29   :  { %3566 = vmatprep.subr.bf16.mxu1 %v3841_v31  ;;  %3581 = vmatprep.subr.bf16.mxu0 %v3841_v31 }
0x2d2c   :  { %3568 = vmatpush3.bf16.msra.mxu1 %v3567_v10  ;;  %3583 = vmatpush3.bf16.msra.mxu0 %v3582_v49 }
0x2d2d   :  { %3593 = vmatprep.subr.bf16.mxu1 %v3841_v31  ;;  %3584 = vmatprep.subr.bf16.mxu0 %v3841_v31 }
0x2d30   :  { %3586 = vmatpush3.bf16.msra.mxu0 %v3585_v63 }
0x2d31   :  { %3587 = vmatprep.subr.bf16.mxu0 %v3841_v31 }
0x2ded   :  { %v2527_v11 = vpop.f32.mrb[40].mxu1  ;;  %v2612_v3 = vpop.f32.mrb[44].mxu0 }
0x2dee   :  { %v4512_v30 = vadd.f32 %v3181_v12, %v2612_v3  ;;  %v3418_v14 = vpop.f32.mrb[41].mxu1  ;;  %v3437_v6 = vpop.f32.mrb[45].mxu0  ;;  %v4527_v22 = vadd.f32 %v3179_v2, %v2527_v11  ;;  %v3588_v12 = vpack.c.bf16 %v2769_v48, %v2768_v45  ;;  %v2770_v11 = vld [vmem:[%s4560_s13 + $0x70] sm:$0xff]  ;;  %v2771_v3 = vld [vmem:[%s4560_s13 + $0x78] sm:$0xff]  ;;  %v3186_v2 = vld [vmem:[%s3113_s23] ss:$0 sm:$0xff] }
0x2def   :  { %v3591_v14 = vpack.c.bf16 %v2771_v3, %v2770_v11  ;;  %s3873_s13 = smov 38   ;;  %s3875_s23 = smov 39  }
0x2df0   :  { %v2617_v42 = vmul.f32 0.5, %v4512_v30  ;;  %3589 = vmatpush3.bf16.msra.mxu0 %v3588_v12  ;;  %s3121_s16 = sld [smem:[%s4635_s0 + %s3873_s13]]  }
0x2df1   :  { %3590 = vmatprep.subr.bf16.mxu0 %v3841_v31 }
0x2df2   :  { %v2618_v23 = vmul.f32 1.442695, %v2617_v42 }
0x2df4   :  { %3822 = vpow2.f32 %v2618_v23  ;;  %3592 = vmatpush3.bf16.msra.mxu0 %v3591_v14 }
0x2df5   :  { %3824 = vpow2.f32 %v1078_v24 }
0x2df6   :  { %v3192_v40 = vld [vmem:[%s3121_s16] ss:$0 sm:$0xff] }
0x2dfe   :  { %v3823_v13 = vpop.eup %3822 }
0x2dff   :  { %v2620_v19 = vmul.f32 %v3823_v13, %v2616_v15  ;;  %v3825_v9 = vpop.eup %3824 }
0x2e00   :  { %v1080_v33 = vmul.f32 %v3825_v9, %v1076_v18 }
0x2e01   :  { %v2621_v20 = vadd.f32 %v2620_v19, %v4527_v22 }
0x2e02   :  { %v1081_v53 = vadd.f32 %v1080_v33, %v4546_v51 }
0x2e03   :  { %2624 = vrot.lane.b32.xlu1 %v2621_v20, %s3837_s19  ;;  %v3187_v20 = vld [vmem:[%s3115_s27] ss:$0 sm:$0xff]  ;;  %s3122_s27 = sld [smem:[%s4635_s0 + %s3875_s23]]  }
0x2e07   :  { %2628 = vrot.lane.b32.xlu1 %v2622_v26, %s3836_s18 }
0x2e75   :  { %v2625_v16 = vpop.permute.xlu1 %2624 }
0x2e76   :  { %v2631_v34 = vsel %vm271_vm2, %v1081_v53, %v2625_v16  ;;  %v2880_v53 = vld [vmem:[%s3118_s1] sm:$0xff] }
0x2e79   :  { %v2629_v35 = vpop.permute.xlu1 %2628 }
0x2e7a   :  { %v2632_v38 = vsel %vm1179_vm5, %v2631_v34, %v2629_v35  ;;  %v2881_v34 = vld [vmem:[%s3118_s1 + $0x8] sm:$0xff] }
0x2e7b   :  { %3459 = vmatmul.mubr.msk.f32.vlgmr.msra.gmra.mrb[42].mxu1 %vm2650_vm11, %v2632_v38  ;;  %v3594_v35 = vpack.c.bf16 %v2881_v34, %v2880_v53  ;;  %v2882_v38 = vld [vmem:[%s3118_s1 + $0x10] sm:$0xff] }
0x2e7c   :  { %3504 = vmatprep.mubr.msk.f32.mxu1 %vm3833_vm0, %v3830_v0 }
0x2e7d   :  { %3595 = vmatpush3.bf16.msra.mxu1 %v3594_v35 }
0x2e7e   :  { %3596 = vmatprep.subr.bf16.mxu1 %v3841_v31 }
0x2f4e   :  { %v2720_v39 = vpop.f32.mrb[42].mxu1 }
0x2f4f   :  { %v2721_v41 = vadd.f32 %v3183_v50, %v2720_v39  ;;  %v3460_v21 = vpop.f32.mrb[43].mxu1 }
0x2f51   :  { %v2727_v55 = vsel %vm2726_vm12, %v2721_v41, 0.0 }
0x2f52   :  { %2728 = vadd.xlane.f32.xlu1 %v2727_v55 }
0x2fdf   :  { %v2729_v57 = vpop.xlane.xlu1 %2728 }
0x2fe0   :  { %v2731_v58 = vmul.f32 0.0078125, %v2729_v57  ;;  %v3600_v57 = vpack.c.bf16 %v2965_v54, %v2964_v7 }
0x2fe2   :  { %v2732_v60 = vsub.f32 %v2721_v41, %v2731_v58 }
0x2fe4   :  { %v2733_v62 = vmul.f32 %v2732_v60, %v2732_v60 }
0x2fe6   :  { %v2734_v5 = vsel %vm2726_vm12, %v2733_v62, 0.0  ;;  %v2967_v62 = vld [vmem:[%s3120_s12 + $0x18] sm:$0xff] }
0x2fe7   :  { %2735 = vadd.xlane.f32.xlu0 %v2734_v5 }
0x3074   :  { %v2736_v6 = vpop.xlane.xlu0 %2735 }
0x3075   :  { %v2737_v42 = vmul.f32 0.0078125, %v2736_v6 }
0x3077   :  { %v2738_v23 = vadd.f32 1e-05, %v2737_v42 }
0x3079   :  { %3826 = vrsqrt.f32 %v2738_v23 }
0x3083   :  { %v3827_v44 = vpop.eup %3826 }
0x3084   :  { %v2740_v10 = vmul.f32 %v3827_v44, %v2732_v60  ;;  %v2966_v60 = vld [vmem:[%s3120_s12 + $0x10] sm:$0xff] }
0x3085   :  { %v3603_v5 = vpack.c.bf16 %v2967_v62, %v2966_v60 }
0x3086   :  { %v2747_v15 = vmul.f32 %v3185_v17, %v2740_v10 }
0x3088   :  { %v2754_v13 = vadd.f32 %v3186_v2, %v2747_v15 }
0x308a   :  { %v2755_v19 = vmax.f32 %v2754_v13, 0.0 }
0x308c   :  { %3494 = vmatmul.mubr.f32.vlgmr.msra.gmra.mrb[46].mxu0 %v2755_v19 }
0x315f   :  { %v2845_v26 = vpop.f32.mrb[46].mxu0 }
0x3160   :  { %v2846_v27 = vadd.f32 %v3187_v20, %v2845_v26  ;;  %v3495_v29 = vpop.f32.mrb[47].mxu0 }
0x3162   :  { %v2852_v24 = vsel %vm2851_vm13, %v2846_v27, 0.0 }
0x3163   :  { %2853 = vadd.xlane.f32.xlu1 %v2852_v24 }
0x3174   :  { %3046 = vrot.lane.b32.xlu1 %v4536_v59, %s3837_s19  ;;  %v2883_v59 = vld [vmem:[%s3118_s1 + $0x18] sm:$0xff] }
0x3175   :  { %v3597_v50 = vpack.c.bf16 %v2883_v59, %v2882_v38 }
0x3177   :  { %3598 = vmatpush3.bf16.msra.mxu1 %v3597_v50 }
0x3178   :  { %3599 = vmatprep.subr.bf16.mxu1 %v3841_v31 }
0x31f0   :  { %v2854_v9 = vpop.xlane.xlu1 %2853 }
0x31f1   :  { %v2855_v18 = vmul.f32 0.03125, %v2854_v9 }
0x31f3   :  { %v2856_v32 = vsub.f32 %v2846_v27, %v2855_v18 }
0x31f5   :  { %v2857_v33 = vmul.f32 %v2856_v32, %v2856_v32 }
0x31f7   :  { %v2858_v16 = vsel %vm2851_vm13, %v2857_v33, 0.0 }
0x31f8   :  { %2859 = vadd.xlane.f32.xlu0 %v2858_v16 }
0x320e   :  { %3050 = vrot.lane.b32.xlu0 %v4527_v22, %s3836_s18  ;;  %s3116_s18 = sld [smem:[%s4635_s0 + %s3870_s2]]  }
0x3214   :  { %v3188_v55 = vld [vmem:[%s3116_s18] ss:$0 sm:$0xff] }
0x3285   :  { %v2860_v39 = vpop.xlane.xlu0 %2859 }
0x3286   :  { %v2861_v41 = vmul.f32 0.03125, %v2860_v39 }
0x3288   :  { %v2862_v21 = vadd.f32 1e-05, %v2861_v41 }
0x3289   :  { %v3051_v49 = vpop.permute.xlu0 %3050 }
0x328a   :  { %3828 = vrsqrt.f32 %v2862_v21 }
0x3294   :  { %v3829_v22 = vpop.eup %3828 }
0x3295   :  { %v2864_v46 = vmul.f32 %v3829_v22, %v2856_v32 }
0x3297   :  { %v2871_v52 = vmul.f32 %v3188_v55, %v2864_v46 }
0x3299   :  { %v2878_v56 = vadd.f32 %v3189_v47, %v2871_v52 }
0x329b   :  { %v2879_v58 = vmax.f32 %v2878_v56, 0.0 }
0x329d   :  { %3505 = vmatmul.mubr.msk.f32.vlgmr.msra.gmra.mrb[44].mxu1 %vm271_vm2, %v2879_v58 }
0x329e   :  { %3601 = vmatpush3.bf16.msra.mxu1 %v3600_v57  ;;  %3515 = vmatprep.mubr.msk.f32.mxu1 %vm3833_vm0, %v3830_v0  ;;  %v3047_v0 = vpop.permute.xlu1 %3046 }
0x329f   :  { %3602 = vmatprep.subr.bf16.mxu1 %v3841_v31  ;;  %v3190_v31 = vld [vmem:[%s3119_s22] ss:$0 sm:$0xff] }
0x32a2   :  { %3604 = vmatpush3.bf16.msra.mxu1 %v3603_v5 }
0x32a5   :  { %3516 = vmatmul.mubr.msk.f32.vlgmr.msra.gmra.mrb[46].mxu1 %vm271_vm2, %v2879_v58 }
0x3370   :  { %v2960_v4 = vpop.f32.mrb[44].mxu1 }
0x3371   :  { %v3506_v36 = vpop.f32.mrb[45].mxu1  ;;  %v2961_v61 = vadd.f32 %v3190_v31, %v2960_v4 }
0x3378   :  { %v3041_v25 = vpop.f32.mrb[46].mxu1 }
0x3379   :  { %v3042_v1 = vadd.f32 %v3192_v40, %v3041_v25  ;;  %v3517_v28 = vpop.f32.mrb[47].mxu1 }
0x337b   :  { %3058 = vrot.lane.b32.xlu1 %v3042_v1, %s3837_s19 }
0x337f   :  { %3054 = vrot.lane.b32.xlu1 %v4512_v30, %s3839_s24  ;;  %v3061_v30 = vsel %vm271_vm2, %v4546_v51, %v3047_v0 }
0x3380   :  { %v3062_v43 = vsel %vm1179_vm5, %v3061_v30, %v3051_v49 }
0x33ed   :  { %v3059_v37 = vpop.permute.xlu1 %3058 }
0x33ee   :  { %v3065_v8 = vsel %vm271_vm2, %v2961_v61, %v3059_v37 }
0x33ef   :  { %v3067_v45 = vsel %vm3066_vm14, %v3065_v8, 0.0 }
0x33f1   :  { %v3055_v63 = vpop.permute.xlu1 %3054 }
0x33f2   :  { %v3064_v48 = vsel %vm3063_vm15, %v3062_v43, %v3055_v63 }
0x33f3   :  { %v3070_v12 = vcombine.low %v3064_v48, %v3067_v45 }
0x33f5   :  { %3194 = vst.sshfl [vmem:[%s3122_s27] sm:$0x33 pattern:$0x76325410] %v3070_v12 }

</bundles_post_ra>
